<compile_context>
chip_gen: v5e
topology: v5e:2x2
jax: 0.10.0
libtpu: 0.0.40
codegen_flags: <defaults>
</compile_context>

<pallas_src>
import functools
import math

import jax
import jax.numpy as jnp
from jax import lax
from jax.experimental import pallas as pl
from jax.experimental.pallas import tpu as pltpu

_NEG_INF = -1e30  # finite mask sentinel: avoids -inf -> NaN if a row were fully masked


# ------------------------------ in-kernel math ------------------------------ #

def _layer_norm(x, g, b, eps=1e-5):
    """LayerNorm over the last axis; g, b broadcast as [1, C]."""
    mu = jnp.mean(x, axis=-1, keepdims=True)
    var = jnp.mean(jnp.square(x - mu), axis=-1, keepdims=True)
    return (x - mu) * lax.rsqrt(var + eps) * g + b


def _erf(z):
    # Abramowitz & Stegun 7.1.26 polynomial (|err| <= 1.5e-7): exact-GELU semantics
    # without relying on an erf lowering inside Mosaic (uses only exp/mul/add/where).
    a1, a2, a3, a4, a5 = (0.254829592, -0.284496736, 1.421413741,
                          -1.453152027, 1.061405429)
    p = 0.3275911
    az = jnp.abs(z)
    t = 1.0 / (1.0 + p * az)
    poly = ((((a5 * t + a4) * t + a3) * t + a2) * t + a1) * t
    y = 1.0 - poly * jnp.exp(-az * az)
    return jnp.where(z >= 0, y, -y)


def _gelu(x):
    return 0.5 * x * (1.0 + _erf(x * 0.7071067811865476))


def _mhsa(hq, hkv, wq, bq, wk, bk, wv, bv, wp, bp, *, n_head, causal):
    """Multi-head attention + output projection, entirely on VMEM values.

    hq: [Tq, C] (query side, already layer-normed), hkv: [Tk, C] (key/value side).
    Heads are a static loop over lane slices; the output projection is accumulated
    per head, so no concat / head-major reshapes / transposes are needed.
    """
    tq, c = hq.shape
    tk = hkv.shape[0]
    hd = c // n_head
    scale = 1.0 / math.sqrt(hd)

    q = jnp.dot(hq, wq, preferred_element_type=jnp.float32) + bq
    k = jnp.dot(hkv, wk, preferred_element_type=jnp.float32) + bk
    v = jnp.dot(hkv, wv, preferred_element_type=jnp.float32) + bv

    y = None
    for h in range(n_head):
        sl = slice(h * hd, (h + 1) * hd)
        s = jnp.dot(q[:, sl], k[:, sl].T, preferred_element_type=jnp.float32) * scale
        if causal:
            row = lax.broadcasted_iota(jnp.int32, (tq, tk), 0)
            col = lax.broadcasted_iota(jnp.int32, (tq, tk), 1)
            s = jnp.where(row >= col, s, _NEG_INF)
        s = s - jnp.max(s, axis=-1, keepdims=True)
        p = jnp.exp(s)
        p = p / jnp.sum(p, axis=-1, keepdims=True)
        oh = jnp.dot(p, v[:, sl], preferred_element_type=jnp.float32)        # [Tq, hd]
        ph = jnp.dot(oh, wp[sl, :], preferred_element_type=jnp.float32)      # [Tq, C]
        y = ph if y is None else y + ph
    return y + bp


# --------------------------- fused stack kernels ---------------------------- #

def _encoder_stack_kernel(*refs, n_head):
    (x_ref, ln1_g, ln1_b, wq, bq, wk, bk, wv, bv, wp, bp,
     ln2_g, ln2_b, w_fc1, b_fc1, w_fc2, b_fc2, o_ref) = refs

    @pl.when(pl.program_id(1) == 0)          # first layer: load the residual stream
    def _():
        o_ref[...] = x_ref[...]

    x = o_ref[...]                            # [S, C], carried across the layer axis
    h = _layer_norm(x, ln1_g[...], ln1_b[...])
    x = x + _mhsa(h, h, wq[...], bq[...], wk[...], bk[...], wv[...], bv[...],
                  wp[...], bp[...], n_head=n_head, causal=True)
    h = _layer_norm(x, ln2_g[...], ln2_b[...])
    m = _gelu(jnp.dot(h, w_fc1[...], preferred_element_type=jnp.float32) + b_fc1[...])
    x = x + jnp.dot(m, w_fc2[...], preferred_element_type=jnp.float32) + b_fc2[...]
    o_ref[...] = x


def _decoder_stack_kernel(*refs, n_head):
    (x_ref, mem_ref,
     ln1_g, ln1_b, m_wq, m_bq, m_wk, m_bk, m_wv, m_bv, m_wp, m_bp,
     ln2_g, ln2_b, c_wq, c_bq, c_wk, c_bk, c_wv, c_bv, c_wp, c_bp,
     ln3_g, ln3_b, w_fc1, b_fc1, w_fc2, b_fc2, o_ref) = refs

    @pl.when(pl.program_id(1) == 0)
    def _():
        o_ref[...] = x_ref[...]

    x = o_ref[...]                            # [T, C]
    mem = mem_ref[...]                        # [S, C] encoder memory
    # masked (causal) self-attention
    h = _layer_norm(x, ln1_g[...], ln1_b[...])
    x = x + _mhsa(h, h, m_wq[...], m_bq[...], m_wk[...], m_bk[...], m_wv[...],
                  m_bv[...], m_wp[...], m_bp[...], n_head=n_head, causal=True)
    # memory cross-attention (no mask, keys/values from encoder output)
    h = _layer_norm(x, ln2_g[...], ln2_b[...])
    x = x + _mhsa(h, mem, c_wq[...], c_bq[...], c_wk[...], c_bk[...], c_wv[...],
                  c_bv[...], c_wp[...], c_bp[...], n_head=n_head, causal=False)
    # MLP
    h = _layer_norm(x, ln3_g[...], ln3_b[...])
    m = _gelu(jnp.dot(h, w_fc1[...], preferred_element_type=jnp.float32) + b_fc1[...])
    x = x + jnp.dot(m, w_fc2[...], preferred_element_type=jnp.float32) + b_fc2[...]
    o_ref[...] = x


# ------------------------------ stack wrappers ------------------------------ #

def _enc_weights(sb):
    a = sb["attn"]
    return [sb["ln1_g"], sb["ln1_b"],
            a["wq"], a["bq"], a["wk"], a["bk"], a["wv"], a["bv"], a["wp"], a["bp"],
            sb["ln2_g"], sb["ln2_b"],
            sb["w_fc1"], sb["b_fc1"], sb["w_fc2"], sb["b_fc2"]]


def _dec_weights(sb):
    m, c = sb["mask_attn"], sb["memory_attn"]
    return [sb["ln1_g"], sb["ln1_b"],
            m["wq"], m["bq"], m["wk"], m["bk"], m["wv"], m["bv"], m["wp"], m["bp"],
            sb["ln2_g"], sb["ln2_b"],
            c["wq"], c["bq"], c["wk"], c["bk"], c["wv"], c["bv"], c["wp"], c["bp"],
            sb["ln3_g"], sb["ln3_b"],
            sb["w_fc1"], sb["b_fc1"], sb["w_fc2"], sb["b_fc2"]]


def _weight_spec(w):
    # stacked per-layer weight [L, d0, d1] -> this layer's [d0, d1] block per grid step
    return pl.BlockSpec((None,) + w.shape[1:], lambda b, l: (l, 0, 0))


def encoder_stack(x, stacked, n_head):
    """All encoder Blocks in ONE pallas_call; grid = (batch, layer)."""
    B, S, C = x.shape
    ws = _enc_weights(stacked)
    L = ws[0].shape[0]
    act_spec = pl.BlockSpec((None, S, C), lambda b, l: (b, 0, 0))
    return pl.pallas_call(
        functools.partial(_encoder_stack_kernel, n_head=n_head),
        grid=(B, L),
        in_specs=[act_spec] + [_weight_spec(w) for w in ws],
        out_specs=act_spec,
        out_shape=jax.ShapeDtypeStruct((B, S, C), jnp.float32),
        compiler_params=pltpu.CompilerParams(
            dimension_semantics=("parallel", "arbitrary")),
    )(x, *ws)


def decoder_stack(x, mem, stacked, n_head):
    """All DecodeBlocks in ONE pallas_call; grid = (batch, layer)."""
    B, T, C = x.shape
    S = mem.shape[1]
    ws = _dec_weights(stacked)
    L = ws[0].shape[0]
    x_spec = pl.BlockSpec((None, T, C), lambda b, l: (b, 0, 0))
    mem_spec = pl.BlockSpec((None, S, C), lambda b, l: (b, 0, 0))
    return pl.pallas_call(
        functools.partial(_decoder_stack_kernel, n_head=n_head),
        grid=(B, L),
        in_specs=[x_spec, mem_spec] + [_weight_spec(w) for w in ws],
        out_specs=x_spec,
        out_shape=jax.ShapeDtypeStruct((B, T, C), jnp.float32),
        compiler_params=pltpu.CompilerParams(
            dimension_semantics=("parallel", "arbitrary")),
    )(x, mem, *ws)


# --------------------------------- forward ----------------------------------- #

def madt_forward(params, cfg, states, observation, pre_actions, history_action):
    # `observation` is accepted (as in the reference signature) but unused by forward.
    del observation
    B, T, Sdim = states.shape
    C, V, H = cfg["n_embd"], cfg["vocab_size"], cfg["n_head"]

    # ---- prologue (tiny ops: plain XLA) ----
    st = states.astype(jnp.float32).reshape(B * T, Sdim)
    state_emb = jnp.tanh(st @ params["state_enc_w"] + params["state_enc_b"])
    state_emb = state_emb.reshape(B, T, C)
    act_ids = pre_actions.astype(jnp.int32)[..., 0]                      # [B, T]
    action_emb = jnp.tanh(params["action_emb_table"][act_ids])           # [B, T, C]
    token_emb = jnp.stack([state_emb, action_emb], axis=2).reshape(B, 2 * T, C)
    pos = jnp.repeat(params["global_pos_emb"][:, :T, :], 2, axis=1)      # repeat_interleave
    x = token_emb + pos                                                  # drop = identity

    # ---- encoder: one fused Pallas call over (batch, layer) ----
    x = encoder_stack(x, params["enc_blocks"], H)

    # final LayerNorm + value head (N=1): tiny, plain XLA
    x = _layer_norm(x, params["lnf_g"], params["lnf_b"])
    value = (x @ params["head_w"])[:, 1::2, :]                           # state positions

    # ---- decoder (history_action provided -> teacher forcing) ----
    hist = history_action.astype(jnp.int32)
    start_op = jnp.zeros((B, 1, V), jnp.float32)
    dec_tok = jnp.concatenate(
        [start_op, jax.nn.one_hot(hist[:, :-1, -1], V, dtype=jnp.float32)], axis=1)
    dec = jnp.tanh(dec_tok @ params["action_enc_w"] + params["action_enc_b"])
    dec = decoder_stack(dec, x, params["dec_blocks"], H)

    logits = dec @ params["actor_head_w"]                                # N=V=10: plain XLA
    return logits, value, hist


# ------------------------------ parameter init ------------------------------- #
# _init_weights: Linear/Embedding weights ~ N(0, 0.02), biases = 0,
# LayerNorm weight = 1, bias = 0, pos embeddings = 0.  Weights stored [in, out]
# (transpose of torch.nn.Linear.weight); biases / LN params stored [1, N] so the
# kernels never reshape or cast them.

def _dense(key, fan_in, fan_out):
    return jax.random.normal(key, (fan_in, fan_out), jnp.float32) * 0.02


def init_params(key, cfg):
    C, V, S, L = cfg["n_embd"], cfg["vocab_size"], cfg["state_size"], cfg["n_layer"]
    keys = iter(jax.random.split(key, 1024))
    nk = lambda: next(keys)
    zrow = lambda n: jnp.zeros((1, n), jnp.float32)
    orow = lambda n: jnp.ones((1, n), jnp.float32)

    def attn_p():
        return {"wq": _dense(nk(), C, C), "bq": zrow(C),
                "wk": _dense(nk(), C, C), "bk": zrow(C),
                "wv": _dense(nk(), C, C), "bv": zrow(C),
                "wp": _dense(nk(), C, C), "bp": zrow(C)}

    def block_p():
        return {"ln1_g": orow(C), "ln1_b": zrow(C),
                "ln2_g": orow(C), "ln2_b": zrow(C),
                "attn": attn_p(),
                "w_fc1": _dense(nk(), C, 2 * C), "b_fc1": zrow(2 * C),
                "w_fc2": _dense(nk(), 2 * C, C), "b_fc2": zrow(C)}

    def decode_block_p():
        return {"ln1_g": orow(C), "ln1_b": zrow(C),
                "ln2_g": orow(C), "ln2_b": zrow(C),
                "ln3_g": orow(C), "ln3_b": zrow(C),
                "mask_attn": attn_p(), "memory_attn": attn_p(),
                "w_fc1": _dense(nk(), C, 2 * C), "b_fc1": zrow(2 * C),
                "w_fc2": _dense(nk(), 2 * C, C), "b_fc2": zrow(C)}

    # stack per-layer params along a leading L axis so each stack is ONE pallas_call
    stack = lambda blocks: jax.tree_util.tree_map(lambda *xs: jnp.stack(xs, 0), *blocks)

    return {
        "global_pos_emb": jnp.zeros((1, cfg["max_timestep"] + 1, C), jnp.float32),
        "state_enc_w": _dense(nk(), S, C), "state_enc_b": zrow(C),
        "action_emb_table": jax.random.normal(nk(), (V, C), jnp.float32) * 0.02,
        "action_enc_w": _dense(nk(), V, C), "action_enc_b": zrow(C),
        "head_w": _dense(nk(), C, 1),
        "actor_head_w": _dense(nk(), C, V),
        "enc_blocks": stack([block_p() for _ in range(L)]),
        "dec_blocks": stack([decode_block_p() for _ in range(L)]),
        "lnf_g": orow(C), "lnf_b": zrow(C),
    }


# ----------------------------------- main ------------------------------------ #

if __name__ == "__main__":
    cfg = dict(n_embd=32, n_head=2, n_layer=2, vocab_size=10, block_size=8,
               max_timestep=20, state_size=12, model_type="state_action")

    key = jax.random.PRNGKey(0)
    kp, ks, ko, ka, kh = jax.random.split(key, 5)
    params = init_params(kp, cfg)

    B, T = 2, 4
    states = jax.random.normal(ks, (B, T, cfg["state_size"]), jnp.float32)
    observation = jax.random.normal(ko, (B, T, cfg["state_size"]), jnp.float32)  # unused
    pre_actions = jax.random.randint(ka, (B, T, 1), 0, cfg["vocab_size"])
    history_action = jax.random.randint(kh, (B, T, 1), 0, cfg["vocab_size"])

    forward = jax.jit(lambda p, s, o, a, h: madt_forward(p, cfg, s, o, a, h))
    logits, value, action = forward(params, states, observation, pre_actions,
                                    history_action)
    jax.block_until_ready((logits, value, action))

    assert logits.shape == (B, T, cfg["vocab_size"])
    assert value.shape == (B, T, 1)
    assert action.shape == (B, T, 1)
    print("KERNEL_OK")
</pallas_src>

<mosaic_0001>
module attributes {stable_mosaic.version = 11 : i64} {
  func.func @_encoder_stack_kernel(%arg0: i32, %arg1: i32, %arg2: memref<1x8x32xf32, #tpu.memory_space<vmem>>, %arg3: memref<1x1x32xf32, #tpu.memory_space<vmem>>, %arg4: memref<1x1x32xf32, #tpu.memory_space<vmem>>, %arg5: memref<1x32x32xf32, #tpu.memory_space<vmem>>, %arg6: memref<1x1x32xf32, #tpu.memory_space<vmem>>, %arg7: memref<1x32x32xf32, #tpu.memory_space<vmem>>, %arg8: memref<1x1x32xf32, #tpu.memory_space<vmem>>, %arg9: memref<1x32x32xf32, #tpu.memory_space<vmem>>, %arg10: memref<1x1x32xf32, #tpu.memory_space<vmem>>, %arg11: memref<1x32x32xf32, #tpu.memory_space<vmem>>, %arg12: memref<1x1x32xf32, #tpu.memory_space<vmem>>, %arg13: memref<1x1x32xf32, #tpu.memory_space<vmem>>, %arg14: memref<1x1x32xf32, #tpu.memory_space<vmem>>, %arg15: memref<1x32x64xf32, #tpu.memory_space<vmem>>, %arg16: memref<1x1x64xf32, #tpu.memory_space<vmem>>, %arg17: memref<1x64x32xf32, #tpu.memory_space<vmem>>, %arg18: memref<1x1x32xf32, #tpu.memory_space<vmem>>, %arg19: memref<1x8x32xf32, #tpu.memory_space<vmem>>) attributes {dimension_semantics = [#tpu.dimension_semantics<parallel>, #tpu.dimension_semantics<arbitrary>], iteration_bounds = array<i64: 2, 2>, scalar_prefetch = 0 : i64, scratch_operands = 0 : i64, tpu.core_type = #tpu.core_type<tc>, window_params = [{transform_indices = @transform_0, window_bounds = array<i64: 1, 8, 32>}, {transform_indices = @transform_1, window_bounds = array<i64: 1, 1, 32>}, {transform_indices = @transform_2, window_bounds = array<i64: 1, 1, 32>}, {transform_indices = @transform_3, window_bounds = array<i64: 1, 32, 32>}, {transform_indices = @transform_4, window_bounds = array<i64: 1, 1, 32>}, {transform_indices = @transform_5, window_bounds = array<i64: 1, 32, 32>}, {transform_indices = @transform_6, window_bounds = array<i64: 1, 1, 32>}, {transform_indices = @transform_7, window_bounds = array<i64: 1, 32, 32>}, {transform_indices = @transform_8, window_bounds = array<i64: 1, 1, 32>}, {transform_indices = @transform_9, window_bounds = array<i64: 1, 32, 32>}, {transform_indices = @transform_10, window_bounds = array<i64: 1, 1, 32>}, {transform_indices = @transform_11, window_bounds = array<i64: 1, 1, 32>}, {transform_indices = @transform_12, window_bounds = array<i64: 1, 1, 32>}, {transform_indices = @transform_13, window_bounds = array<i64: 1, 32, 64>}, {transform_indices = @transform_14, window_bounds = array<i64: 1, 1, 64>}, {transform_indices = @transform_15, window_bounds = array<i64: 1, 64, 32>}, {transform_indices = @transform_16, window_bounds = array<i64: 1, 1, 32>}, {transform_indices = @transform_17, window_bounds = array<i64: 1, 8, 32>}]} {
    %c0_i32 = arith.constant 0 : i32
    %0 = arith.cmpi eq, %arg1, %c0_i32 : i32
    %1 = arith.extui %0 : i1 to i32
    %c0_i32_0 = arith.constant 0 : i32
    %2 = arith.cmpi ne, %1, %c0_i32_0 : i32
    scf.if %2 {
      %c0_97 = arith.constant 0 : index
      %c0_98 = arith.constant 0 : index
      %c0_99 = arith.constant 0 : index
      %192 = vector.load %arg2[%c0_97, %c0_98, %c0_99] : memref<1x8x32xf32, #tpu.memory_space<vmem>>, vector<1x8x32xf32>
      %193 = vector.shape_cast %192 : vector<1x8x32xf32> to vector<8x32xf32>
      %c0_100 = arith.constant 0 : index
      %c0_101 = arith.constant 0 : index
      %c0_102 = arith.constant 0 : index
      %194 = vector.load %arg19[%c0_100, %c0_101, %c0_102] : memref<1x8x32xf32, #tpu.memory_space<vmem>>, vector<1x8x32xf32>
      %195 = vector.shape_cast %194 : vector<1x8x32xf32> to vector<8x32xf32>
      %196 = vector.shape_cast %193 : vector<8x32xf32> to vector<1x8x32xf32>
      tpu.vector_store %arg19[%c0_100, %c0_101, %c0_102], %196 {strides = array<i32>} : memref<1x8x32xf32, #tpu.memory_space<vmem>>, vector<1x8x32xf32>,
    } else {
    }
    %c0 = arith.constant 0 : index
    %c0_1 = arith.constant 0 : index
    %c0_2 = arith.constant 0 : index
    %3 = vector.load %arg19[%c0, %c0_1, %c0_2] : memref<1x8x32xf32, #tpu.memory_space<vmem>>, vector<1x8x32xf32>
    %4 = vector.shape_cast %3 : vector<1x8x32xf32> to vector<8x32xf32>
    %c0_3 = arith.constant 0 : index
    %c0_4 = arith.constant 0 : index
    %c0_5 = arith.constant 0 : index
    %5 = vector.load %arg3[%c0_3, %c0_4, %c0_5] : memref<1x1x32xf32, #tpu.memory_space<vmem>>, vector<1x1x32xf32>
    %6 = vector.shape_cast %5 : vector<1x1x32xf32> to vector<1x32xf32>
    %c0_6 = arith.constant 0 : index
    %c0_7 = arith.constant 0 : index
    %c0_8 = arith.constant 0 : index
    %7 = vector.load %arg4[%c0_6, %c0_7, %c0_8] : memref<1x1x32xf32, #tpu.memory_space<vmem>>, vector<1x1x32xf32>
    %8 = vector.shape_cast %7 : vector<1x1x32xf32> to vector<1x32xf32>
    %cst = arith.constant dense<0.000000e+00> : vector<8xf32>
    %9 = vector.multi_reduction <add>, %4, %cst [1] : vector<8x32xf32> to vector<8xf32>
    %10 = vector.shape_cast %9 : vector<8xf32> to vector<8x1xf32>
    %cst_9 = arith.constant 3.200000e+01 : f32
    %11 = vector.broadcast %cst_9 : f32 to vector<8x1xf32>
    %12 = arith.divf %10, %11 : vector<8x1xf32>
    %13 = vector.broadcast %12 : vector<8x1xf32> to vector<8x32xf32>
    %14 = arith.subf %4, %13 : vector<8x32xf32>
    %15 = arith.mulf %14, %14 : vector<8x32xf32>
    %cst_10 = arith.constant dense<0.000000e+00> : vector<8xf32>
    %16 = vector.multi_reduction <add>, %15, %cst_10 [1] : vector<8x32xf32> to vector<8xf32>
    %17 = vector.shape_cast %16 : vector<8xf32> to vector<8x1xf32>
    %cst_11 = arith.constant 3.200000e+01 : f32
    %18 = vector.broadcast %cst_11 : f32 to vector<8x1xf32>
    %19 = arith.divf %17, %18 : vector<8x1xf32>
    %20 = vector.broadcast %12 : vector<8x1xf32> to vector<8x32xf32>
    %21 = arith.subf %4, %20 : vector<8x32xf32>
    %cst_12 = arith.constant 9.99999974E-6 : f32
    %22 = vector.broadcast %cst_12 : f32 to vector<8x1xf32>
    %23 = arith.addf %19, %22 : vector<8x1xf32>
    %24 = math.rsqrt %23 : vector<8x1xf32>
    %25 = vector.broadcast %24 : vector<8x1xf32> to vector<8x32xf32>
    %26 = arith.mulf %21, %25 : vector<8x32xf32>
    %27 = vector.broadcast %6 : vector<1x32xf32> to vector<8x32xf32>
    %28 = arith.mulf %26, %27 : vector<8x32xf32>
    %29 = vector.broadcast %8 : vector<1x32xf32> to vector<8x32xf32>
    %30 = arith.addf %28, %29 : vector<8x32xf32>
    %c0_13 = arith.constant 0 : index
    %c0_14 = arith.constant 0 : index
    %c0_15 = arith.constant 0 : index
    %31 = vector.load %arg5[%c0_13, %c0_14, %c0_15] : memref<1x32x32xf32, #tpu.memory_space<vmem>>, vector<1x32x32xf32>
    %32 = vector.shape_cast %31 : vector<1x32x32xf32> to vector<32x32xf32>
    %c0_16 = arith.constant 0 : index
    %c0_17 = arith.constant 0 : index
    %c0_18 = arith.constant 0 : index
    %33 = vector.load %arg6[%c0_16, %c0_17, %c0_18] : memref<1x1x32xf32, #tpu.memory_space<vmem>>, vector<1x1x32xf32>
    %34 = vector.shape_cast %33 : vector<1x1x32xf32> to vector<1x32xf32>
    %c0_19 = arith.constant 0 : index
    %c0_20 = arith.constant 0 : index
    %c0_21 = arith.constant 0 : index
    %35 = vector.load %arg7[%c0_19, %c0_20, %c0_21] : memref<1x32x32xf32, #tpu.memory_space<vmem>>, vector<1x32x32xf32>
    %36 = vector.shape_cast %35 : vector<1x32x32xf32> to vector<32x32xf32>
    %c0_22 = arith.constant 0 : index
    %c0_23 = arith.constant 0 : index
    %c0_24 = arith.constant 0 : index
    %37 = vector.load %arg8[%c0_22, %c0_23, %c0_24] : memref<1x1x32xf32, #tpu.memory_space<vmem>>, vector<1x1x32xf32>
    %38 = vector.shape_cast %37 : vector<1x1x32xf32> to vector<1x32xf32>
    %c0_25 = arith.constant 0 : index
    %c0_26 = arith.constant 0 : index
    %c0_27 = arith.constant 0 : index
    %39 = vector.load %arg9[%c0_25, %c0_26, %c0_27] : memref<1x32x32xf32, #tpu.memory_space<vmem>>, vector<1x32x32xf32>
    %40 = vector.shape_cast %39 : vector<1x32x32xf32> to vector<32x32xf32>
    %c0_28 = arith.constant 0 : index
    %c0_29 = arith.constant 0 : index
    %c0_30 = arith.constant 0 : index
    %41 = vector.load %arg10[%c0_28, %c0_29, %c0_30] : memref<1x1x32xf32, #tpu.memory_space<vmem>>, vector<1x1x32xf32>
    %42 = vector.shape_cast %41 : vector<1x1x32xf32> to vector<1x32xf32>
    %c0_31 = arith.constant 0 : index
    %c0_32 = arith.constant 0 : index
    %c0_33 = arith.constant 0 : index
    %43 = vector.load %arg11[%c0_31, %c0_32, %c0_33] : memref<1x32x32xf32, #tpu.memory_space<vmem>>, vector<1x32x32xf32>
    %44 = vector.shape_cast %43 : vector<1x32x32xf32> to vector<32x32xf32>
    %c0_34 = arith.constant 0 : index
    %c0_35 = arith.constant 0 : index
    %c0_36 = arith.constant 0 : index
    %45 = vector.load %arg12[%c0_34, %c0_35, %c0_36] : memref<1x1x32xf32, #tpu.memory_space<vmem>>, vector<1x1x32xf32>
    %46 = vector.shape_cast %45 : vector<1x1x32xf32> to vector<1x32xf32>
    %cst_37 = arith.constant dense<0.000000e+00> : vector<8x32xf32>
    %47 = tpu.matmul %30, %32, %cst_37 {dimension_numbers = #tpu.dot_dimension_numbers<[1], [0], [0], [1], [0, 0, 1, 1], [], []>} : vector<8x32xf32>, vector<32x32xf32>, vector<8x32xf32> -> vector<8x32xf32>
    %48 = vector.broadcast %34 : vector<1x32xf32> to vector<8x32xf32>
    %49 = arith.addf %47, %48 : vector<8x32xf32>
    %cst_38 = arith.constant dense<0.000000e+00> : vector<8x32xf32>
    %50 = tpu.matmul %30, %36, %cst_38 {dimension_numbers = #tpu.dot_dimension_numbers<[1], [0], [0], [1], [0, 0, 1, 1], [], []>} : vector<8x32xf32>, vector<32x32xf32>, vector<8x32xf32> -> vector<8x32xf32>
    %51 = vector.broadcast %38 : vector<1x32xf32> to vector<8x32xf32>
    %52 = arith.addf %50, %51 : vector<8x32xf32>
    %cst_39 = arith.constant dense<0.000000e+00> : vector<8x32xf32>
    %53 = tpu.matmul %30, %40, %cst_39 {dimension_numbers = #tpu.dot_dimension_numbers<[1], [0], [0], [1], [0, 0, 1, 1], [], []>} : vector<8x32xf32>, vector<32x32xf32>, vector<8x32xf32> -> vector<8x32xf32>
    %54 = vector.broadcast %42 : vector<1x32xf32> to vector<8x32xf32>
    %55 = arith.addf %53, %54 : vector<8x32xf32>
    %56 = vector.extract_strided_slice %49 {offsets = [0, 0], sizes = [8, 16], strides = [1, 1]} : vector<8x32xf32> to vector<8x16xf32>
    %57 = vector.extract_strided_slice %52 {offsets = [0, 0], sizes = [8, 16], strides = [1, 1]} : vector<8x32xf32> to vector<8x16xf32>
    %58 = tpu.transpose %57, [1, 0] : vector<8x16xf32> -> vector<16x8xf32>
    %cst_40 = arith.constant dense<0.000000e+00> : vector<8x8xf32>
    %59 = tpu.matmul %56, %58, %cst_40 {dimension_numbers = #tpu.dot_dimension_numbers<[1], [0], [0], [1], [0, 0, 1, 1], [], []>} : vector<8x16xf32>, vector<16x8xf32>, vector<8x8xf32> -> vector<8x8xf32>
    %cst_41 = arith.constant 2.500000e-01 : f32
    %60 = vector.broadcast %cst_41 : f32 to vector<8x8xf32>
    %61 = arith.mulf %59, %60 : vector<8x8xf32>
    %62 = tpu.iota {dimensions = array<i32: 0>} : vector<8x8xi32>
    %63 = tpu.iota {dimensions = array<i32: 1>} : vector<8x8xi32>
    %64 = arith.cmpi sge, %62, %63 : vector<8x8xi32>
    %cst_42 = arith.constant -1.000000e+30 : f32
    %65 = vector.broadcast %cst_42 : f32 to vector<8x8xf32>
    %66 = arith.select %64, %61, %65 : vector<8x8xi1>, vector<8x8xf32>
    %cst_43 = arith.constant dense<0xFF800000> : vector<8xf32>
    %67 = vector.multi_reduction <maximumf>, %66, %cst_43 [1] : vector<8x8xf32> to vector<8xf32>
    %68 = vector.shape_cast %67 : vector<8xf32> to vector<8x1xf32>
    %69 = vector.broadcast %68 : vector<8x1xf32> to vector<8x8xf32>
    %70 = arith.subf %66, %69 : vector<8x8xf32>
    %71 = math.exp %70 : vector<8x8xf32>
    %cst_44 = arith.constant dense<0.000000e+00> : vector<8xf32>
    %72 = vector.multi_reduction <add>, %71, %cst_44 [1] : vector<8x8xf32> to vector<8xf32>
    %73 = vector.shape_cast %72 : vector<8xf32> to vector<8x1xf32>
    %74 = vector.broadcast %73 : vector<8x1xf32> to vector<8x8xf32>
    %75 = arith.divf %71, %74 : vector<8x8xf32>
    %76 = vector.extract_strided_slice %55 {offsets = [0, 0], sizes = [8, 16], strides = [1, 1]} : vector<8x32xf32> to vector<8x16xf32>
    %cst_45 = arith.constant dense<0.000000e+00> : vector<8x16xf32>
    %77 = tpu.matmul %75, %76, %cst_45 {dimension_numbers = #tpu.dot_dimension_numbers<[1], [0], [0], [1], [0, 0, 1, 1], [], []>} : vector<8x8xf32>, vector<8x16xf32>, vector<8x16xf32> -> vector<8x16xf32>
    %78 = vector.extract_strided_slice %44 {offsets = [0, 0], sizes = [16, 32], strides = [1, 1]} : vector<32x32xf32> to vector<16x32xf32>
    %cst_46 = arith.constant dense<0.000000e+00> : vector<8x32xf32>
    %79 = tpu.matmul %77, %78, %cst_46 {dimension_numbers = #tpu.dot_dimension_numbers<[1], [0], [0], [1], [0, 0, 1, 1], [], []>} : vector<8x16xf32>, vector<16x32xf32>, vector<8x32xf32> -> vector<8x32xf32>
    %80 = vector.extract_strided_slice %49 {offsets = [0, 16], sizes = [8, 16], strides = [1, 1]} : vector<8x32xf32> to vector<8x16xf32>
    %81 = vector.extract_strided_slice %52 {offsets = [0, 16], sizes = [8, 16], strides = [1, 1]} : vector<8x32xf32> to vector<8x16xf32>
    %82 = tpu.transpose %81, [1, 0] : vector<8x16xf32> -> vector<16x8xf32>
    %cst_47 = arith.constant dense<0.000000e+00> : vector<8x8xf32>
    %83 = tpu.matmul %80, %82, %cst_47 {dimension_numbers = #tpu.dot_dimension_numbers<[1], [0], [0], [1], [0, 0, 1, 1], [], []>} : vector<8x16xf32>, vector<16x8xf32>, vector<8x8xf32> -> vector<8x8xf32>
    %cst_48 = arith.constant 2.500000e-01 : f32
    %84 = vector.broadcast %cst_48 : f32 to vector<8x8xf32>
    %85 = arith.mulf %83, %84 : vector<8x8xf32>
    %86 = tpu.iota {dimensions = array<i32: 0>} : vector<8x8xi32>
    %87 = tpu.iota {dimensions = array<i32: 1>} : vector<8x8xi32>
    %88 = arith.cmpi sge, %86, %87 : vector<8x8xi32>
    %cst_49 = arith.constant -1.000000e+30 : f32
    %89 = vector.broadcast %cst_49 : f32 to vector<8x8xf32>
    %90 = arith.select %88, %85, %89 : vector<8x8xi1>, vector<8x8xf32>
    %cst_50 = arith.constant dense<0xFF800000> : vector<8xf32>
    %91 = vector.multi_reduction <maximumf>, %90, %cst_50 [1] : vector<8x8xf32> to vector<8xf32>
    %92 = vector.shape_cast %91 : vector<8xf32> to vector<8x1xf32>
    %93 = vector.broadcast %92 : vector<8x1xf32> to vector<8x8xf32>
    %94 = arith.subf %90, %93 : vector<8x8xf32>
    %95 = math.exp %94 : vector<8x8xf32>
    %cst_51 = arith.constant dense<0.000000e+00> : vector<8xf32>
    %96 = vector.multi_reduction <add>, %95, %cst_51 [1] : vector<8x8xf32> to vector<8xf32>
    %97 = vector.shape_cast %96 : vector<8xf32> to vector<8x1xf32>
    %98 = vector.broadcast %97 : vector<8x1xf32> to vector<8x8xf32>
    %99 = arith.divf %95, %98 : vector<8x8xf32>
    %100 = vector.extract_strided_slice %55 {offsets = [0, 16], sizes = [8, 16], strides = [1, 1]} : vector<8x32xf32> to vector<8x16xf32>
    %cst_52 = arith.constant dense<0.000000e+00> : vector<8x16xf32>
    %101 = tpu.matmul %99, %100, %cst_52 {dimension_numbers = #tpu.dot_dimension_numbers<[1], [0], [0], [1], [0, 0, 1, 1], [], []>} : vector<8x8xf32>, vector<8x16xf32>, vector<8x16xf32> -> vector<8x16xf32>
    %102 = vector.extract_strided_slice %44 {offsets = [16, 0], sizes = [16, 32], strides = [1, 1]} : vector<32x32xf32> to vector<16x32xf32>
    %cst_53 = arith.constant dense<0.000000e+00> : vector<8x32xf32>
    %103 = tpu.matmul %101, %102, %cst_53 {dimension_numbers = #tpu.dot_dimension_numbers<[1], [0], [0], [1], [0, 0, 1, 1], [], []>} : vector<8x16xf32>, vector<16x32xf32>, vector<8x32xf32> -> vector<8x32xf32>
    %104 = arith.addf %79, %103 : vector<8x32xf32>
    %105 = vector.broadcast %46 : vector<1x32xf32> to vector<8x32xf32>
    %106 = arith.addf %104, %105 : vector<8x32xf32>
    %107 = arith.addf %4, %106 : vector<8x32xf32>
    %c0_54 = arith.constant 0 : index
    %c0_55 = arith.constant 0 : index
    %c0_56 = arith.constant 0 : index
    %108 = vector.load %arg13[%c0_54, %c0_55, %c0_56] : memref<1x1x32xf32, #tpu.memory_space<vmem>>, vector<1x1x32xf32>
    %109 = vector.shape_cast %108 : vector<1x1x32xf32> to vector<1x32xf32>
    %c0_57 = arith.constant 0 : index
    %c0_58 = arith.constant 0 : index
    %c0_59 = arith.constant 0 : index
    %110 = vector.load %arg14[%c0_57, %c0_58, %c0_59] : memref<1x1x32xf32, #tpu.memory_space<vmem>>, vector<1x1x32xf32>
    %111 = vector.shape_cast %110 : vector<1x1x32xf32> to vector<1x32xf32>
    %cst_60 = arith.constant dense<0.000000e+00> : vector<8xf32>
    %112 = vector.multi_reduction <add>, %107, %cst_60 [1] : vector<8x32xf32> to vector<8xf32>
    %113 = vector.shape_cast %112 : vector<8xf32> to vector<8x1xf32>
    %cst_61 = arith.constant 3.200000e+01 : f32
    %114 = vector.broadcast %cst_61 : f32 to vector<8x1xf32>
    %115 = arith.divf %113, %114 : vector<8x1xf32>
    %116 = vector.broadcast %115 : vector<8x1xf32> to vector<8x32xf32>
    %117 = arith.subf %107, %116 : vector<8x32xf32>
    %118 = arith.mulf %117, %117 : vector<8x32xf32>
    %cst_62 = arith.constant dense<0.000000e+00> : vector<8xf32>
    %119 = vector.multi_reduction <add>, %118, %cst_62 [1] : vector<8x32xf32> to vector<8xf32>
    %120 = vector.shape_cast %119 : vector<8xf32> to vector<8x1xf32>
    %cst_63 = arith.constant 3.200000e+01 : f32
    %121 = vector.broadcast %cst_63 : f32 to vector<8x1xf32>
    %122 = arith.divf %120, %121 : vector<8x1xf32>
    %123 = vector.broadcast %115 : vector<8x1xf32> to vector<8x32xf32>
    %124 = arith.subf %107, %123 : vector<8x32xf32>
    %cst_64 = arith.constant 9.99999974E-6 : f32
    %125 = vector.broadcast %cst_64 : f32 to vector<8x1xf32>
    %126 = arith.addf %122, %125 : vector<8x1xf32>
    %127 = math.rsqrt %126 : vector<8x1xf32>
    %128 = vector.broadcast %127 : vector<8x1xf32> to vector<8x32xf32>
    %129 = arith.mulf %124, %128 : vector<8x32xf32>
    %130 = vector.broadcast %109 : vector<1x32xf32> to vector<8x32xf32>
    %131 = arith.mulf %129, %130 : vector<8x32xf32>
    %132 = vector.broadcast %111 : vector<1x32xf32> to vector<8x32xf32>
    %133 = arith.addf %131, %132 : vector<8x32xf32>
    %c0_65 = arith.constant 0 : index
    %c0_66 = arith.constant 0 : index
    %c0_67 = arith.constant 0 : index
    %134 = vector.load %arg15[%c0_65, %c0_66, %c0_67] : memref<1x32x64xf32, #tpu.memory_space<vmem>>, vector<1x32x64xf32>
    %135 = vector.shape_cast %134 : vector<1x32x64xf32> to vector<32x64xf32>
    %cst_68 = arith.constant dense<0.000000e+00> : vector<8x64xf32>
    %136 = tpu.matmul %133, %135, %cst_68 {dimension_numbers = #tpu.dot_dimension_numbers<[1], [0], [0], [1], [0, 0, 1, 1], [], []>} : vector<8x32xf32>, vector<32x64xf32>, vector<8x64xf32> -> vector<8x64xf32>
    %c0_69 = arith.constant 0 : index
    %c0_70 = arith.constant 0 : index
    %c0_71 = arith.constant 0 : index
    %137 = vector.load %arg16[%c0_69, %c0_70, %c0_71] : memref<1x1x64xf32, #tpu.memory_space<vmem>>, vector<1x1x64xf32>
    %138 = vector.shape_cast %137 : vector<1x1x64xf32> to vector<1x64xf32>
    %139 = vector.broadcast %138 : vector<1x64xf32> to vector<8x64xf32>
    %140 = arith.addf %136, %139 : vector<8x64xf32>
    %cst_72 = arith.constant 5.000000e-01 : f32
    %141 = vector.broadcast %cst_72 : f32 to vector<8x64xf32>
    %142 = arith.mulf %141, %140 : vector<8x64xf32>
    %cst_73 = arith.constant 0.707106769 : f32
    %143 = vector.broadcast %cst_73 : f32 to vector<8x64xf32>
    %144 = arith.mulf %140, %143 : vector<8x64xf32>
    %145 = math.absf %144 : vector<8x64xf32>
    %cst_74 = arith.constant 0.327591091 : f32
    %146 = vector.broadcast %cst_74 : f32 to vector<8x64xf32>
    %147 = arith.mulf %146, %145 : vector<8x64xf32>
    %cst_75 = arith.constant 1.000000e+00 : f32
    %148 = vector.broadcast %cst_75 : f32 to vector<8x64xf32>
    %149 = arith.addf %148, %147 : vector<8x64xf32>
    %cst_76 = arith.constant 1.000000e+00 : f32
    %150 = vector.broadcast %cst_76 : f32 to vector<8x64xf32>
    %151 = arith.divf %150, %149 : vector<8x64xf32>
    %cst_77 = arith.constant 1.06140542 : f32
    %152 = vector.broadcast %cst_77 : f32 to vector<8x64xf32>
    %153 = arith.mulf %152, %151 : vector<8x64xf32>
    %cst_78 = arith.constant -1.45315206 : f32
    %154 = vector.broadcast %cst_78 : f32 to vector<8x64xf32>
    %155 = arith.addf %153, %154 : vector<8x64xf32>
    %156 = arith.mulf %155, %151 : vector<8x64xf32>
    %cst_79 = arith.constant 1.42141378 : f32
    %157 = vector.broadcast %cst_79 : f32 to vector<8x64xf32>
    %158 = arith.addf %156, %157 : vector<8x64xf32>
    %159 = arith.mulf %158, %151 : vector<8x64xf32>
    %cst_80 = arith.constant -0.284496725 : f32
    %160 = vector.broadcast %cst_80 : f32 to vector<8x64xf32>
    %161 = arith.addf %159, %160 : vector<8x64xf32>
    %162 = arith.mulf %161, %151 : vector<8x64xf32>
    %cst_81 = arith.constant 0.254829586 : f32
    %163 = vector.broadcast %cst_81 : f32 to vector<8x64xf32>
    %164 = arith.addf %162, %163 : vector<8x64xf32>
    %165 = arith.mulf %164, %151 : vector<8x64xf32>
    %cst_82 = arith.constant 0.000000e+00 : f32
    %166 = vector.broadcast %cst_82 : f32 to vector<8x64xf32>
    %167 = arith.subf %166, %145 : vector<8x64xf32>
    %168 = arith.mulf %167, %145 : vector<8x64xf32>
    %169 = math.exp %168 : vector<8x64xf32>
    %170 = arith.mulf %165, %169 : vector<8x64xf32>
    %cst_83 = arith.constant 1.000000e+00 : f32
    %171 = vector.broadcast %cst_83 : f32 to vector<8x64xf32>
    %172 = arith.subf %171, %170 : vector<8x64xf32>
    %cst_84 = arith.constant 0.000000e+00 : f32
    %173 = vector.broadcast %cst_84 : f32 to vector<8x64xf32>
    %174 = arith.cmpf oge, %144, %173 : vector<8x64xf32>
    %cst_85 = arith.constant 0.000000e+00 : f32
    %175 = vector.broadcast %cst_85 : f32 to vector<8x64xf32>
    %176 = arith.subf %175, %172 : vector<8x64xf32>
    %177 = arith.select %174, %172, %176 : vector<8x64xi1>, vector<8x64xf32>
    %cst_86 = arith.constant 1.000000e+00 : f32
    %178 = vector.broadcast %cst_86 : f32 to vector<8x64xf32>
    %179 = arith.addf %178, %177 : vector<8x64xf32>
    %180 = arith.mulf %142, %179 : vector<8x64xf32>
    %c0_87 = arith.constant 0 : index
    %c0_88 = arith.constant 0 : index
    %c0_89 = arith.constant 0 : index
    %181 = vector.load %arg17[%c0_87, %c0_88, %c0_89] : memref<1x64x32xf32, #tpu.memory_space<vmem>>, vector<1x64x32xf32>
    %182 = vector.shape_cast %181 : vector<1x64x32xf32> to vector<64x32xf32>
    %cst_90 = arith.constant dense<0.000000e+00> : vector<8x32xf32>
    %183 = tpu.matmul %180, %182, %cst_90 {dimension_numbers = #tpu.dot_dimension_numbers<[1], [0], [0], [1], [0, 0, 1, 1], [], []>} : vector<8x64xf32>, vector<64x32xf32>, vector<8x32xf32> -> vector<8x32xf32>
    %184 = arith.addf %107, %183 : vector<8x32xf32>
    %c0_91 = arith.constant 0 : index
    %c0_92 = arith.constant 0 : index
    %c0_93 = arith.constant 0 : index
    %185 = vector.load %arg18[%c0_91, %c0_92, %c0_93] : memref<1x1x32xf32, #tpu.memory_space<vmem>>, vector<1x1x32xf32>
    %186 = vector.shape_cast %185 : vector<1x1x32xf32> to vector<1x32xf32>
    %187 = vector.broadcast %186 : vector<1x32xf32> to vector<8x32xf32>
    %188 = arith.addf %184, %187 : vector<8x32xf32>
    %c0_94 = arith.constant 0 : index
    %c0_95 = arith.constant 0 : index
    %c0_96 = arith.constant 0 : index
    %189 = vector.load %arg19[%c0_94, %c0_95, %c0_96] : memref<1x8x32xf32, #tpu.memory_space<vmem>>, vector<1x8x32xf32>
    %190 = vector.shape_cast %189 : vector<1x8x32xf32> to vector<8x32xf32>
    %191 = vector.shape_cast %188 : vector<8x32xf32> to vector<1x8x32xf32>
    tpu.vector_store %arg19[%c0_94, %c0_95, %c0_96], %191 {strides = array<i32>} : memref<1x8x32xf32, #tpu.memory_space<vmem>>, vector<1x8x32xf32>,
    return
  }
  func.func @transform_0(%arg0: i32, %arg1: i32) -> (i32, i32, i32) {
    %c0_i32 = arith.constant 0 : i32
    %c0_i32_0 = arith.constant 0 : i32
    %c0_i32_1 = arith.constant 0 : i32
    return %arg0, %c0_i32, %c0_i32_0 : i32, i32, i32
  }
  func.func @transform_1(%arg0: i32, %arg1: i32) -> (i32, i32, i32) {
    %c0_i32 = arith.constant 0 : i32
    %c0_i32_0 = arith.constant 0 : i32
    %c0_i32_1 = arith.constant 0 : i32
    return %arg1, %c0_i32, %c0_i32_0 : i32, i32, i32
  }
  func.func @transform_2(%arg0: i32, %arg1: i32) -> (i32, i32, i32) {
    %c0_i32 = arith.constant 0 : i32
    %c0_i32_0 = arith.constant 0 : i32
    %c0_i32_1 = arith.constant 0 : i32
    return %arg1, %c0_i32, %c0_i32_0 : i32, i32, i32
  }
  func.func @transform_3(%arg0: i32, %arg1: i32) -> (i32, i32, i32) {
    %c0_i32 = arith.constant 0 : i32
    %c0_i32_0 = arith.constant 0 : i32
    %c0_i32_1 = arith.constant 0 : i32
    return %arg1, %c0_i32, %c0_i32_0 : i32, i32, i32
  }
  func.func @transform_4(%arg0: i32, %arg1: i32) -> (i32, i32, i32) {
    %c0_i32 = arith.constant 0 : i32
    %c0_i32_0 = arith.constant 0 : i32
    %c0_i32_1 = arith.constant 0 : i32
    return %arg1, %c0_i32, %c0_i32_0 : i32, i32, i32
  }
  func.func @transform_5(%arg0: i32, %arg1: i32) -> (i32, i32, i32) {
    %c0_i32 = arith.constant 0 : i32
    %c0_i32_0 = arith.constant 0 : i32
    %c0_i32_1 = arith.constant 0 : i32
    return %arg1, %c0_i32, %c0_i32_0 : i32, i32, i32
  }
  func.func @transform_6(%arg0: i32, %arg1: i32) -> (i32, i32, i32) {
    %c0_i32 = arith.constant 0 : i32
    %c0_i32_0 = arith.constant 0 : i32
    %c0_i32_1 = arith.constant 0 : i32
    return %arg1, %c0_i32, %c0_i32_0 : i32, i32, i32
  }
  func.func @transform_7(%arg0: i32, %arg1: i32) -> (i32, i32, i32) {
    %c0_i32 = arith.constant 0 : i32
    %c0_i32_0 = arith.constant 0 : i32
    %c0_i32_1 = arith.constant 0 : i32
    return %arg1, %c0_i32, %c0_i32_0 : i32, i32, i32
  }
  func.func @transform_8(%arg0: i32, %arg1: i32) -> (i32, i32, i32) {
    %c0_i32 = arith.constant 0 : i32
    %c0_i32_0 = arith.constant 0 : i32
    %c0_i32_1 = arith.constant 0 : i32
    return %arg1, %c0_i32, %c0_i32_0 : i32, i32, i32
  }
  func.func @transform_9(%arg0: i32, %arg1: i32) -> (i32, i32, i32) {
    %c0_i32 = arith.constant 0 : i32
    %c0_i32_0 = arith.constant 0 : i32
    %c0_i32_1 = arith.constant 0 : i32
    return %arg1, %c0_i32, %c0_i32_0 : i32, i32, i32
  }
  func.func @transform_10(%arg0: i32, %arg1: i32) -> (i32, i32, i32) {
    %c0_i32 = arith.constant 0 : i32
    %c0_i32_0 = arith.constant 0 : i32
    %c0_i32_1 = arith.constant 0 : i32
    return %arg1, %c0_i32, %c0_i32_0 : i32, i32, i32
  }
  func.func @transform_11(%arg0: i32, %arg1: i32) -> (i32, i32, i32) {
    %c0_i32 = arith.constant 0 : i32
    %c0_i32_0 = arith.constant 0 : i32
    %c0_i32_1 = arith.constant 0 : i32
    return %arg1, %c0_i32, %c0_i32_0 : i32, i32, i32
  }
  func.func @transform_12(%arg0: i32, %arg1: i32) -> (i32, i32, i32) {
    %c0_i32 = arith.constant 0 : i32
    %c0_i32_0 = arith.constant 0 : i32
    %c0_i32_1 = arith.constant 0 : i32
    return %arg1, %c0_i32, %c0_i32_0 : i32, i32, i32
  }
  func.func @transform_13(%arg0: i32, %arg1: i32) -> (i32, i32, i32) {
    %c0_i32 = arith.constant 0 : i32
    %c0_i32_0 = arith.constant 0 : i32
    %c0_i32_1 = arith.constant 0 : i32
    return %arg1, %c0_i32, %c0_i32_0 : i32, i32, i32
  }
  func.func @transform_14(%arg0: i32, %arg1: i32) -> (i32, i32, i32) {
    %c0_i32 = arith.constant 0 : i32
    %c0_i32_0 = arith.constant 0 : i32
    %c0_i32_1 = arith.constant 0 : i32
    return %arg1, %c0_i32, %c0_i32_0 : i32, i32, i32
  }
  func.func @transform_15(%arg0: i32, %arg1: i32) -> (i32, i32, i32) {
    %c0_i32 = arith.constant 0 : i32
    %c0_i32_0 = arith.constant 0 : i32
    %c0_i32_1 = arith.constant 0 : i32
    return %arg1, %c0_i32, %c0_i32_0 : i32, i32, i32
  }
  func.func @transform_16(%arg0: i32, %arg1: i32) -> (i32, i32, i32) {
    %c0_i32 = arith.constant 0 : i32
    %c0_i32_0 = arith.constant 0 : i32
    %c0_i32_1 = arith.constant 0 : i32
    return %arg1, %c0_i32, %c0_i32_0 : i32, i32, i32
  }
  func.func @transform_17(%arg0: i32, %arg1: i32) -> (i32, i32, i32) {
    %c0_i32 = arith.constant 0 : i32
    %c0_i32_0 = arith.constant 0 : i32
    %c0_i32_1 = arith.constant 0 : i32
    return %arg0, %c0_i32, %c0_i32_0 : i32, i32, i32
  }
}

module attributes {stable_mosaic.version = 11 : i64} {
  func.func @_decoder_stack_kernel(%arg0: i32, %arg1: i32, %arg2: memref<1x4x32xf32, #tpu.memory_space<vmem>>, %arg3: memref<1x8x32xf32, #tpu.memory_space<vmem>>, %arg4: memref<1x1x32xf32, #tpu.memory_space<vmem>>, %arg5: memref<1x1x32xf32, #tpu.memory_space<vmem>>, %arg6: memref<1x32x32xf32, #tpu.memory_space<vmem>>, %arg7: memref<1x1x32xf32, #tpu.memory_space<vmem>>, %arg8: memref<1x32x32xf32, #tpu.memory_space<vmem>>, %arg9: memref<1x1x32xf32, #tpu.memory_space<vmem>>, %arg10: memref<1x32x32xf32, #tpu.memory_space<vmem>>, %arg11: memref<1x1x32xf32, #tpu.memory_space<vmem>>, %arg12: memref<1x32x32xf32, #tpu.memory_space<vmem>>, %arg13: memref<1x1x32xf32, #tpu.memory_space<vmem>>, %arg14: memref<1x1x32xf32, #tpu.memory_space<vmem>>, %arg15: memref<1x1x32xf32, #tpu.memory_space<vmem>>, %arg16: memref<1x32x32xf32, #tpu.memory_space<vmem>>, %arg17: memref<1x1x32xf32, #tpu.memory_space<vmem>>, %arg18: memref<1x32x32xf32, #tpu.memory_space<vmem>>, %arg19: memref<1x1x32xf32, #tpu.memory_space<vmem>>, %arg20: memref<1x32x32xf32, #tpu.memory_space<vmem>>, %arg21: memref<1x1x32xf32, #tpu.memory_space<vmem>>, %arg22: memref<1x32x32xf32, #tpu.memory_space<vmem>>, %arg23: memref<1x1x32xf32, #tpu.memory_space<vmem>>, %arg24: memref<1x1x32xf32, #tpu.memory_space<vmem>>, %arg25: memref<1x1x32xf32, #tpu.memory_space<vmem>>, %arg26: memref<1x32x64xf32, #tpu.memory_space<vmem>>, %arg27: memref<1x1x64xf32, #tpu.memory_space<vmem>>, %arg28: memref<1x64x32xf32, #tpu.memory_space<vmem>>, %arg29: memref<1x1x32xf32, #tpu.memory_space<vmem>>, %arg30: memref<1x4x32xf32, #tpu.memory_space<vmem>>) attributes {dimension_semantics = [#tpu.dimension_semantics<parallel>, #tpu.dimension_semantics<arbitrary>], iteration_bounds = array<i64: 2, 2>, scalar_prefetch = 0 : i64, scratch_operands = 0 : i64, tpu.core_type = #tpu.core_type<tc>, window_params = [{transform_indices = @transform_0, window_bounds = array<i64: 1, 4, 32>}, {transform_indices = @transform_1, window_bounds = array<i64: 1, 8, 32>}, {transform_indices = @transform_2, window_bounds = array<i64: 1, 1, 32>}, {transform_indices = @transform_3, window_bounds = array<i64: 1, 1, 32>}, {transform_indices = @transform_4, window_bounds = array<i64: 1, 32, 32>}, {transform_indices = @transform_5, window_bounds = array<i64: 1, 1, 32>}, {transform_indices = @transform_6, window_bounds = array<i64: 1, 32, 32>}, {transform_indices = @transform_7, window_bounds = array<i64: 1, 1, 32>}, {transform_indices = @transform_8, window_bounds = array<i64: 1, 32, 32>}, {transform_indices = @transform_9, window_bounds = array<i64: 1, 1, 32>}, {transform_indices = @transform_10, window_bounds = array<i64: 1, 32, 32>}, {transform_indices = @transform_11, window_bounds = array<i64: 1, 1, 32>}, {transform_indices = @transform_12, window_bounds = array<i64: 1, 1, 32>}, {transform_indices = @transform_13, window_bounds = array<i64: 1, 1, 32>}, {transform_indices = @transform_14, window_bounds = array<i64: 1, 32, 32>}, {transform_indices = @transform_15, window_bounds = array<i64: 1, 1, 32>}, {transform_indices = @transform_16, window_bounds = array<i64: 1, 32, 32>}, {transform_indices = @transform_17, window_bounds = array<i64: 1, 1, 32>}, {transform_indices = @transform_18, window_bounds = array<i64: 1, 32, 32>}, {transform_indices = @transform_19, window_bounds = array<i64: 1, 1, 32>}, {transform_indices = @transform_20, window_bounds = array<i64: 1, 32, 32>}, {transform_indices = @transform_21, window_bounds = array<i64: 1, 1, 32>}, {transform_indices = @transform_22, window_bounds = array<i64: 1, 1, 32>}, {transform_indices = @transform_23, window_bounds = array<i64: 1, 1, 32>}, {transform_indices = @transform_24, window_bounds = array<i64: 1, 32, 64>}, {transform_indices = @transform_25, window_bounds = array<i64: 1, 1, 64>}, {transform_indices = @transform_26, window_bounds = array<i64: 1, 64, 32>}, {transform_indices = @transform_27, window_bounds = array<i64: 1, 1, 32>}, {transform_indices = @transform_28, window_bounds = array<i64: 1, 4, 32>}]} {
    %c0_i32 = arith.constant 0 : i32
    %0 = arith.cmpi eq, %arg1, %c0_i32 : i32
    %1 = arith.extui %0 : i1 to i32
    %c0_i32_0 = arith.constant 0 : i32
    %2 = arith.cmpi ne, %1, %c0_i32_0 : i32
    scf.if %2 {
      %c0_150 = arith.constant 0 : index
      %c0_151 = arith.constant 0 : index
      %c0_152 = arith.constant 0 : index
      %287 = vector.load %arg2[%c0_150, %c0_151, %c0_152] : memref<1x4x32xf32, #tpu.memory_space<vmem>>, vector<1x4x32xf32>
      %288 = vector.shape_cast %287 : vector<1x4x32xf32> to vector<4x32xf32>
      %c0_153 = arith.constant 0 : index
      %c0_154 = arith.constant 0 : index
      %c0_155 = arith.constant 0 : index
      %289 = vector.load %arg30[%c0_153, %c0_154, %c0_155] : memref<1x4x32xf32, #tpu.memory_space<vmem>>, vector<1x4x32xf32>
      %290 = vector.shape_cast %289 : vector<1x4x32xf32> to vector<4x32xf32>
      %291 = vector.shape_cast %288 : vector<4x32xf32> to vector<1x4x32xf32>
      tpu.vector_store %arg30[%c0_153, %c0_154, %c0_155], %291 {strides = array<i32>} : memref<1x4x32xf32, #tpu.memory_space<vmem>>, vector<1x4x32xf32>,
    } else {
    }
    %c0 = arith.constant 0 : index
    %c0_1 = arith.constant 0 : index
    %c0_2 = arith.constant 0 : index
    %3 = vector.load %arg30[%c0, %c0_1, %c0_2] : memref<1x4x32xf32, #tpu.memory_space<vmem>>, vector<1x4x32xf32>
    %4 = vector.shape_cast %3 : vector<1x4x32xf32> to vector<4x32xf32>
    %c0_3 = arith.constant 0 : index
    %c0_4 = arith.constant 0 : index
    %c0_5 = arith.constant 0 : index
    %5 = vector.load %arg3[%c0_3, %c0_4, %c0_5] : memref<1x8x32xf32, #tpu.memory_space<vmem>>, vector<1x8x32xf32>
    %6 = vector.shape_cast %5 : vector<1x8x32xf32> to vector<8x32xf32>
    %c0_6 = arith.constant 0 : index
    %c0_7 = arith.constant 0 : index
    %c0_8 = arith.constant 0 : index
    %7 = vector.load %arg4[%c0_6, %c0_7, %c0_8] : memref<1x1x32xf32, #tpu.memory_space<vmem>>, vector<1x1x32xf32>
    %8 = vector.shape_cast %7 : vector<1x1x32xf32> to vector<1x32xf32>
    %c0_9 = arith.constant 0 : index
    %c0_10 = arith.constant 0 : index
    %c0_11 = arith.constant 0 : index
    %9 = vector.load %arg5[%c0_9, %c0_10, %c0_11] : memref<1x1x32xf32, #tpu.memory_space<vmem>>, vector<1x1x32xf32>
    %10 = vector.shape_cast %9 : vector<1x1x32xf32> to vector<1x32xf32>
    %cst = arith.constant dense<0.000000e+00> : vector<4xf32>
    %11 = vector.multi_reduction <add>, %4, %cst [1] : vector<4x32xf32> to vector<4xf32>
    %12 = vector.shape_cast %11 : vector<4xf32> to vector<4x1xf32>
    %cst_12 = arith.constant 3.200000e+01 : f32
    %13 = vector.broadcast %cst_12 : f32 to vector<4x1xf32>
    %14 = arith.divf %12, %13 : vector<4x1xf32>
    %15 = vector.broadcast %14 : vector<4x1xf32> to vector<4x32xf32>
    %16 = arith.subf %4, %15 : vector<4x32xf32>
    %17 = arith.mulf %16, %16 : vector<4x32xf32>
    %cst_13 = arith.constant dense<0.000000e+00> : vector<4xf32>
    %18 = vector.multi_reduction <add>, %17, %cst_13 [1] : vector<4x32xf32> to vector<4xf32>
    %19 = vector.shape_cast %18 : vector<4xf32> to vector<4x1xf32>
    %cst_14 = arith.constant 3.200000e+01 : f32
    %20 = vector.broadcast %cst_14 : f32 to vector<4x1xf32>
    %21 = arith.divf %19, %20 : vector<4x1xf32>
    %22 = vector.broadcast %14 : vector<4x1xf32> to vector<4x32xf32>
    %23 = arith.subf %4, %22 : vector<4x32xf32>
    %cst_15 = arith.constant 9.99999974E-6 : f32
    %24 = vector.broadcast %cst_15 : f32 to vector<4x1xf32>
    %25 = arith.addf %21, %24 : vector<4x1xf32>
    %26 = math.rsqrt %25 : vector<4x1xf32>
    %27 = vector.broadcast %26 : vector<4x1xf32> to vector<4x32xf32>
    %28 = arith.mulf %23, %27 : vector<4x32xf32>
    %29 = vector.broadcast %8 : vector<1x32xf32> to vector<4x32xf32>
    %30 = arith.mulf %28, %29 : vector<4x32xf32>
    %31 = vector.broadcast %10 : vector<1x32xf32> to vector<4x32xf32>
    %32 = arith.addf %30, %31 : vector<4x32xf32>
    %c0_16 = arith.constant 0 : index
    %c0_17 = arith.constant 0 : index
    %c0_18 = arith.constant 0 : index
    %33 = vector.load %arg6[%c0_16, %c0_17, %c0_18] : memref<1x32x32xf32, #tpu.memory_space<vmem>>, vector<1x32x32xf32>
    %34 = vector.shape_cast %33 : vector<1x32x32xf32> to vector<32x32xf32>
    %c0_19 = arith.constant 0 : index
    %c0_20 = arith.constant 0 : index
    %c0_21 = arith.constant 0 : index
    %35 = vector.load %arg7[%c0_19, %c0_20, %c0_21] : memref<1x1x32xf32, #tpu.memory_space<vmem>>, vector<1x1x32xf32>
    %36 = vector.shape_cast %35 : vector<1x1x32xf32> to vector<1x32xf32>
    %c0_22 = arith.constant 0 : index
    %c0_23 = arith.constant 0 : index
    %c0_24 = arith.constant 0 : index
    %37 = vector.load %arg8[%c0_22, %c0_23, %c0_24] : memref<1x32x32xf32, #tpu.memory_space<vmem>>, vector<1x32x32xf32>
    %38 = vector.shape_cast %37 : vector<1x32x32xf32> to vector<32x32xf32>
    %c0_25 = arith.constant 0 : index
    %c0_26 = arith.constant 0 : index
    %c0_27 = arith.constant 0 : index
    %39 = vector.load %arg9[%c0_25, %c0_26, %c0_27] : memref<1x1x32xf32, #tpu.memory_space<vmem>>, vector<1x1x32xf32>
    %40 = vector.shape_cast %39 : vector<1x1x32xf32> to vector<1x32xf32>
    %c0_28 = arith.constant 0 : index
    %c0_29 = arith.constant 0 : index
    %c0_30 = arith.constant 0 : index
    %41 = vector.load %arg10[%c0_28, %c0_29, %c0_30] : memref<1x32x32xf32, #tpu.memory_space<vmem>>, vector<1x32x32xf32>
    %42 = vector.shape_cast %41 : vector<1x32x32xf32> to vector<32x32xf32>
    %c0_31 = arith.constant 0 : index
    %c0_32 = arith.constant 0 : index
    %c0_33 = arith.constant 0 : index
    %43 = vector.load %arg11[%c0_31, %c0_32, %c0_33] : memref<1x1x32xf32, #tpu.memory_space<vmem>>, vector<1x1x32xf32>
    %44 = vector.shape_cast %43 : vector<1x1x32xf32> to vector<1x32xf32>
    %c0_34 = arith.constant 0 : index
    %c0_35 = arith.constant 0 : index
    %c0_36 = arith.constant 0 : index
    %45 = vector.load %arg12[%c0_34, %c0_35, %c0_36] : memref<1x32x32xf32, #tpu.memory_space<vmem>>, vector<1x32x32xf32>
    %46 = vector.shape_cast %45 : vector<1x32x32xf32> to vector<32x32xf32>
    %c0_37 = arith.constant 0 : index
    %c0_38 = arith.constant 0 : index
    %c0_39 = arith.constant 0 : index
    %47 = vector.load %arg13[%c0_37, %c0_38, %c0_39] : memref<1x1x32xf32, #tpu.memory_space<vmem>>, vector<1x1x32xf32>
    %48 = vector.shape_cast %47 : vector<1x1x32xf32> to vector<1x32xf32>
    %cst_40 = arith.constant dense<0.000000e+00> : vector<4x32xf32>
    %49 = tpu.matmul %32, %34, %cst_40 {dimension_numbers = #tpu.dot_dimension_numbers<[1], [0], [0], [1], [0, 0, 1, 1], [], []>} : vector<4x32xf32>, vector<32x32xf32>, vector<4x32xf32> -> vector<4x32xf32>
    %50 = vector.broadcast %36 : vector<1x32xf32> to vector<4x32xf32>
    %51 = arith.addf %49, %50 : vector<4x32xf32>
    %cst_41 = arith.constant dense<0.000000e+00> : vector<4x32xf32>
    %52 = tpu.matmul %32, %38, %cst_41 {dimension_numbers = #tpu.dot_dimension_numbers<[1], [0], [0], [1], [0, 0, 1, 1], [], []>} : vector<4x32xf32>, vector<32x32xf32>, vector<4x32xf32> -> vector<4x32xf32>
    %53 = vector.broadcast %40 : vector<1x32xf32> to vector<4x32xf32>
    %54 = arith.addf %52, %53 : vector<4x32xf32>
    %cst_42 = arith.constant dense<0.000000e+00> : vector<4x32xf32>
    %55 = tpu.matmul %32, %42, %cst_42 {dimension_numbers = #tpu.dot_dimension_numbers<[1], [0], [0], [1], [0, 0, 1, 1], [], []>} : vector<4x32xf32>, vector<32x32xf32>, vector<4x32xf32> -> vector<4x32xf32>
    %56 = vector.broadcast %44 : vector<1x32xf32> to vector<4x32xf32>
    %57 = arith.addf %55, %56 : vector<4x32xf32>
    %58 = vector.extract_strided_slice %51 {offsets = [0, 0], sizes = [4, 16], strides = [1, 1]} : vector<4x32xf32> to vector<4x16xf32>
    %59 = vector.extract_strided_slice %54 {offsets = [0, 0], sizes = [4, 16], strides = [1, 1]} : vector<4x32xf32> to vector<4x16xf32>
    %60 = tpu.transpose %59, [1, 0] : vector<4x16xf32> -> vector<16x4xf32>
    %cst_43 = arith.constant dense<0.000000e+00> : vector<4x4xf32>
    %61 = tpu.matmul %58, %60, %cst_43 {dimension_numbers = #tpu.dot_dimension_numbers<[1], [0], [0], [1], [0, 0, 1, 1], [], []>} : vector<4x16xf32>, vector<16x4xf32>, vector<4x4xf32> -> vector<4x4xf32>
    %cst_44 = arith.constant 2.500000e-01 : f32
    %62 = vector.broadcast %cst_44 : f32 to vector<4x4xf32>
    %63 = arith.mulf %61, %62 : vector<4x4xf32>
    %64 = tpu.iota {dimensions = array<i32: 0>} : vector<4x4xi32>
    %65 = tpu.iota {dimensions = array<i32: 1>} : vector<4x4xi32>
    %66 = arith.cmpi sge, %64, %65 : vector<4x4xi32>
    %cst_45 = arith.constant -1.000000e+30 : f32
    %67 = vector.broadcast %cst_45 : f32 to vector<4x4xf32>
    %68 = arith.select %66, %63, %67 : vector<4x4xi1>, vector<4x4xf32>
    %cst_46 = arith.constant dense<0xFF800000> : vector<4xf32>
    %69 = vector.multi_reduction <maximumf>, %68, %cst_46 [1] : vector<4x4xf32> to vector<4xf32>
    %70 = vector.shape_cast %69 : vector<4xf32> to vector<4x1xf32>
    %71 = vector.broadcast %70 : vector<4x1xf32> to vector<4x4xf32>
    %72 = arith.subf %68, %71 : vector<4x4xf32>
    %73 = math.exp %72 : vector<4x4xf32>
    %cst_47 = arith.constant dense<0.000000e+00> : vector<4xf32>
    %74 = vector.multi_reduction <add>, %73, %cst_47 [1] : vector<4x4xf32> to vector<4xf32>
    %75 = vector.shape_cast %74 : vector<4xf32> to vector<4x1xf32>
    %76 = vector.broadcast %75 : vector<4x1xf32> to vector<4x4xf32>
    %77 = arith.divf %73, %76 : vector<4x4xf32>
    %78 = vector.extract_strided_slice %57 {offsets = [0, 0], sizes = [4, 16], strides = [1, 1]} : vector<4x32xf32> to vector<4x16xf32>
    %cst_48 = arith.constant dense<0.000000e+00> : vector<4x16xf32>
    %79 = tpu.matmul %77, %78, %cst_48 {dimension_numbers = #tpu.dot_dimension_numbers<[1], [0], [0], [1], [0, 0, 1, 1], [], []>} : vector<4x4xf32>, vector<4x16xf32>, vector<4x16xf32> -> vector<4x16xf32>
    %80 = vector.extract_strided_slice %46 {offsets = [0, 0], sizes = [16, 32], strides = [1, 1]} : vector<32x32xf32> to vector<16x32xf32>
    %cst_49 = arith.constant dense<0.000000e+00> : vector<4x32xf32>
    %81 = tpu.matmul %79, %80, %cst_49 {dimension_numbers = #tpu.dot_dimension_numbers<[1], [0], [0], [1], [0, 0, 1, 1], [], []>} : vector<4x16xf32>, vector<16x32xf32>, vector<4x32xf32> -> vector<4x32xf32>
    %82 = vector.extract_strided_slice %51 {offsets = [0, 16], sizes = [4, 16], strides = [1, 1]} : vector<4x32xf32> to vector<4x16xf32>
    %83 = vector.extract_strided_slice %54 {offsets = [0, 16], sizes = [4, 16], strides = [1, 1]} : vector<4x32xf32> to vector<4x16xf32>
    %84 = tpu.transpose %83, [1, 0] : vector<4x16xf32> -> vector<16x4xf32>
    %cst_50 = arith.constant dense<0.000000e+00> : vector<4x4xf32>
    %85 = tpu.matmul %82, %84, %cst_50 {dimension_numbers = #tpu.dot_dimension_numbers<[1], [0], [0], [1], [0, 0, 1, 1], [], []>} : vector<4x16xf32>, vector<16x4xf32>, vector<4x4xf32> -> vector<4x4xf32>
    %cst_51 = arith.constant 2.500000e-01 : f32
    %86 = vector.broadcast %cst_51 : f32 to vector<4x4xf32>
    %87 = arith.mulf %85, %86 : vector<4x4xf32>
    %88 = tpu.iota {dimensions = array<i32: 0>} : vector<4x4xi32>
    %89 = tpu.iota {dimensions = array<i32: 1>} : vector<4x4xi32>
    %90 = arith.cmpi sge, %88, %89 : vector<4x4xi32>
    %cst_52 = arith.constant -1.000000e+30 : f32
    %91 = vector.broadcast %cst_52 : f32 to vector<4x4xf32>
    %92 = arith.select %90, %87, %91 : vector<4x4xi1>, vector<4x4xf32>
    %cst_53 = arith.constant dense<0xFF800000> : vector<4xf32>
    %93 = vector.multi_reduction <maximumf>, %92, %cst_53 [1] : vector<4x4xf32> to vector<4xf32>
    %94 = vector.shape_cast %93 : vector<4xf32> to vector<4x1xf32>
    %95 = vector.broadcast %94 : vector<4x1xf32> to vector<4x4xf32>
    %96 = arith.subf %92, %95 : vector<4x4xf32>
    %97 = math.exp %96 : vector<4x4xf32>
    %cst_54 = arith.constant dense<0.000000e+00> : vector<4xf32>
    %98 = vector.multi_reduction <add>, %97, %cst_54 [1] : vector<4x4xf32> to vector<4xf32>
    %99 = vector.shape_cast %98 : vector<4xf32> to vector<4x1xf32>
    %100 = vector.broadcast %99 : vector<4x1xf32> to vector<4x4xf32>
    %101 = arith.divf %97, %100 : vector<4x4xf32>
    %102 = vector.extract_strided_slice %57 {offsets = [0, 16], sizes = [4, 16], strides = [1, 1]} : vector<4x32xf32> to vector<4x16xf32>
    %cst_55 = arith.constant dense<0.000000e+00> : vector<4x16xf32>
    %103 = tpu.matmul %101, %102, %cst_55 {dimension_numbers = #tpu.dot_dimension_numbers<[1], [0], [0], [1], [0, 0, 1, 1], [], []>} : vector<4x4xf32>, vector<4x16xf32>, vector<4x16xf32> -> vector<4x16xf32>
    %104 = vector.extract_strided_slice %46 {offsets = [16, 0], sizes = [16, 32], strides = [1, 1]} : vector<32x32xf32> to vector<16x32xf32>
    %cst_56 = arith.constant dense<0.000000e+00> : vector<4x32xf32>
    %105 = tpu.matmul %103, %104, %cst_56 {dimension_numbers = #tpu.dot_dimension_numbers<[1], [0], [0], [1], [0, 0, 1, 1], [], []>} : vector<4x16xf32>, vector<16x32xf32>, vector<4x32xf32> -> vector<4x32xf32>
    %106 = arith.addf %81, %105 : vector<4x32xf32>
    %107 = vector.broadcast %48 : vector<1x32xf32> to vector<4x32xf32>
    %108 = arith.addf %106, %107 : vector<4x32xf32>
    %109 = arith.addf %4, %108 : vector<4x32xf32>
    %c0_57 = arith.constant 0 : index
    %c0_58 = arith.constant 0 : index
    %c0_59 = arith.constant 0 : index
    %110 = vector.load %arg14[%c0_57, %c0_58, %c0_59] : memref<1x1x32xf32, #tpu.memory_space<vmem>>, vector<1x1x32xf32>
    %111 = vector.shape_cast %110 : vector<1x1x32xf32> to vector<1x32xf32>
    %c0_60 = arith.constant 0 : index
    %c0_61 = arith.constant 0 : index
    %c0_62 = arith.constant 0 : index
    %112 = vector.load %arg15[%c0_60, %c0_61, %c0_62] : memref<1x1x32xf32, #tpu.memory_space<vmem>>, vector<1x1x32xf32>
    %113 = vector.shape_cast %112 : vector<1x1x32xf32> to vector<1x32xf32>
    %cst_63 = arith.constant dense<0.000000e+00> : vector<4xf32>
    %114 = vector.multi_reduction <add>, %109, %cst_63 [1] : vector<4x32xf32> to vector<4xf32>
    %115 = vector.shape_cast %114 : vector<4xf32> to vector<4x1xf32>
    %cst_64 = arith.constant 3.200000e+01 : f32
    %116 = vector.broadcast %cst_64 : f32 to vector<4x1xf32>
    %117 = arith.divf %115, %116 : vector<4x1xf32>
    %118 = vector.broadcast %117 : vector<4x1xf32> to vector<4x32xf32>
    %119 = arith.subf %109, %118 : vector<4x32xf32>
    %120 = arith.mulf %119, %119 : vector<4x32xf32>
    %cst_65 = arith.constant dense<0.000000e+00> : vector<4xf32>
    %121 = vector.multi_reduction <add>, %120, %cst_65 [1] : vector<4x32xf32> to vector<4xf32>
    %122 = vector.shape_cast %121 : vector<4xf32> to vector<4x1xf32>
    %cst_66 = arith.constant 3.200000e+01 : f32
    %123 = vector.broadcast %cst_66 : f32 to vector<4x1xf32>
    %124 = arith.divf %122, %123 : vector<4x1xf32>
    %125 = vector.broadcast %117 : vector<4x1xf32> to vector<4x32xf32>
    %126 = arith.subf %109, %125 : vector<4x32xf32>
    %cst_67 = arith.constant 9.99999974E-6 : f32
    %127 = vector.broadcast %cst_67 : f32 to vector<4x1xf32>
    %128 = arith.addf %124, %127 : vector<4x1xf32>
    %129 = math.rsqrt %128 : vector<4x1xf32>
    %130 = vector.broadcast %129 : vector<4x1xf32> to vector<4x32xf32>
    %131 = arith.mulf %126, %130 : vector<4x32xf32>
    %132 = vector.broadcast %111 : vector<1x32xf32> to vector<4x32xf32>
    %133 = arith.mulf %131, %132 : vector<4x32xf32>
    %134 = vector.broadcast %113 : vector<1x32xf32> to vector<4x32xf32>
    %135 = arith.addf %133, %134 : vector<4x32xf32>
    %c0_68 = arith.constant 0 : index
    %c0_69 = arith.constant 0 : index
    %c0_70 = arith.constant 0 : index
    %136 = vector.load %arg16[%c0_68, %c0_69, %c0_70] : memref<1x32x32xf32, #tpu.memory_space<vmem>>, vector<1x32x32xf32>
    %137 = vector.shape_cast %136 : vector<1x32x32xf32> to vector<32x32xf32>
    %c0_71 = arith.constant 0 : index
    %c0_72 = arith.constant 0 : index
    %c0_73 = arith.constant 0 : index
    %138 = vector.load %arg17[%c0_71, %c0_72, %c0_73] : memref<1x1x32xf32, #tpu.memory_space<vmem>>, vector<1x1x32xf32>
    %139 = vector.shape_cast %138 : vector<1x1x32xf32> to vector<1x32xf32>
    %c0_74 = arith.constant 0 : index
    %c0_75 = arith.constant 0 : index
    %c0_76 = arith.constant 0 : index
    %140 = vector.load %arg18[%c0_74, %c0_75, %c0_76] : memref<1x32x32xf32, #tpu.memory_space<vmem>>, vector<1x32x32xf32>
    %141 = vector.shape_cast %140 : vector<1x32x32xf32> to vector<32x32xf32>
    %c0_77 = arith.constant 0 : index
    %c0_78 = arith.constant 0 : index
    %c0_79 = arith.constant 0 : index
    %142 = vector.load %arg19[%c0_77, %c0_78, %c0_79] : memref<1x1x32xf32, #tpu.memory_space<vmem>>, vector<1x1x32xf32>
    %143 = vector.shape_cast %142 : vector<1x1x32xf32> to vector<1x32xf32>
    %c0_80 = arith.constant 0 : index
    %c0_81 = arith.constant 0 : index
    %c0_82 = arith.constant 0 : index
    %144 = vector.load %arg20[%c0_80, %c0_81, %c0_82] : memref<1x32x32xf32, #tpu.memory_space<vmem>>, vector<1x32x32xf32>
    %145 = vector.shape_cast %144 : vector<1x32x32xf32> to vector<32x32xf32>
    %c0_83 = arith.constant 0 : index
    %c0_84 = arith.constant 0 : index
    %c0_85 = arith.constant 0 : index
    %146 = vector.load %arg21[%c0_83, %c0_84, %c0_85] : memref<1x1x32xf32, #tpu.memory_space<vmem>>, vector<1x1x32xf32>
    %147 = vector.shape_cast %146 : vector<1x1x32xf32> to vector<1x32xf32>
    %c0_86 = arith.constant 0 : index
    %c0_87 = arith.constant 0 : index
    %c0_88 = arith.constant 0 : index
    %148 = vector.load %arg22[%c0_86, %c0_87, %c0_88] : memref<1x32x32xf32, #tpu.memory_space<vmem>>, vector<1x32x32xf32>
    %149 = vector.shape_cast %148 : vector<1x32x32xf32> to vector<32x32xf32>
    %c0_89 = arith.constant 0 : index
    %c0_90 = arith.constant 0 : index
    %c0_91 = arith.constant 0 : index
    %150 = vector.load %arg23[%c0_89, %c0_90, %c0_91] : memref<1x1x32xf32, #tpu.memory_space<vmem>>, vector<1x1x32xf32>
    %151 = vector.shape_cast %150 : vector<1x1x32xf32> to vector<1x32xf32>
    %cst_92 = arith.constant dense<0.000000e+00> : vector<4x32xf32>
    %152 = tpu.matmul %135, %137, %cst_92 {dimension_numbers = #tpu.dot_dimension_numbers<[1], [0], [0], [1], [0, 0, 1, 1], [], []>} : vector<4x32xf32>, vector<32x32xf32>, vector<4x32xf32> -> vector<4x32xf32>
    %153 = vector.broadcast %139 : vector<1x32xf32> to vector<4x32xf32>
    %154 = arith.addf %152, %153 : vector<4x32xf32>
    %cst_93 = arith.constant dense<0.000000e+00> : vector<8x32xf32>
    %155 = tpu.matmul %6, %141, %cst_93 {dimension_numbers = #tpu.dot_dimension_numbers<[1], [0], [0], [1], [0, 0, 1, 1], [], []>} : vector<8x32xf32>, vector<32x32xf32>, vector<8x32xf32> -> vector<8x32xf32>
    %156 = vector.broadcast %143 : vector<1x32xf32> to vector<8x32xf32>
    %157 = arith.addf %155, %156 : vector<8x32xf32>
    %cst_94 = arith.constant dense<0.000000e+00> : vector<8x32xf32>
    %158 = tpu.matmul %6, %145, %cst_94 {dimension_numbers = #tpu.dot_dimension_numbers<[1], [0], [0], [1], [0, 0, 1, 1], [], []>} : vector<8x32xf32>, vector<32x32xf32>, vector<8x32xf32> -> vector<8x32xf32>
    %159 = vector.broadcast %147 : vector<1x32xf32> to vector<8x32xf32>
    %160 = arith.addf %158, %159 : vector<8x32xf32>
    %161 = vector.extract_strided_slice %154 {offsets = [0, 0], sizes = [4, 16], strides = [1, 1]} : vector<4x32xf32> to vector<4x16xf32>
    %162 = vector.extract_strided_slice %157 {offsets = [0, 0], sizes = [8, 16], strides = [1, 1]} : vector<8x32xf32> to vector<8x16xf32>
    %163 = tpu.transpose %162, [1, 0] : vector<8x16xf32> -> vector<16x8xf32>
    %cst_95 = arith.constant dense<0.000000e+00> : vector<4x8xf32>
    %164 = tpu.matmul %161, %163, %cst_95 {dimension_numbers = #tpu.dot_dimension_numbers<[1], [0], [0], [1], [0, 0, 1, 1], [], []>} : vector<4x16xf32>, vector<16x8xf32>, vector<4x8xf32> -> vector<4x8xf32>
    %cst_96 = arith.constant 2.500000e-01 : f32
    %165 = vector.broadcast %cst_96 : f32 to vector<4x8xf32>
    %166 = arith.mulf %164, %165 : vector<4x8xf32>
    %cst_97 = arith.constant dense<0xFF800000> : vector<4xf32>
    %167 = vector.multi_reduction <maximumf>, %166, %cst_97 [1] : vector<4x8xf32> to vector<4xf32>
    %168 = vector.shape_cast %167 : vector<4xf32> to vector<4x1xf32>
    %169 = vector.broadcast %168 : vector<4x1xf32> to vector<4x8xf32>
    %170 = arith.subf %166, %169 : vector<4x8xf32>
    %171 = math.exp %170 : vector<4x8xf32>
    %cst_98 = arith.constant dense<0.000000e+00> : vector<4xf32>
    %172 = vector.multi_reduction <add>, %171, %cst_98 [1] : vector<4x8xf32> to vector<4xf32>
    %173 = vector.shape_cast %172 : vector<4xf32> to vector<4x1xf32>
    %174 = vector.broadcast %173 : vector<4x1xf32> to vector<4x8xf32>
    %175 = arith.divf %171, %174 : vector<4x8xf32>
    %176 = vector.extract_strided_slice %160 {offsets = [0, 0], sizes = [8, 16], strides = [1, 1]} : vector<8x32xf32> to vector<8x16xf32>
    %cst_99 = arith.constant dense<0.000000e+00> : vector<4x16xf32>
    %177 = tpu.matmul %175, %176, %cst_99 {dimension_numbers = #tpu.dot_dimension_numbers<[1], [0], [0], [1], [0, 0, 1, 1], [], []>} : vector<4x8xf32>, vector<8x16xf32>, vector<4x16xf32> -> vector<4x16xf32>
    %178 = vector.extract_strided_slice %149 {offsets = [0, 0], sizes = [16, 32], strides = [1, 1]} : vector<32x32xf32> to vector<16x32xf32>
    %cst_100 = arith.constant dense<0.000000e+00> : vector<4x32xf32>
    %179 = tpu.matmul %177, %178, %cst_100 {dimension_numbers = #tpu.dot_dimension_numbers<[1], [0], [0], [1], [0, 0, 1, 1], [], []>} : vector<4x16xf32>, vector<16x32xf32>, vector<4x32xf32> -> vector<4x32xf32>
    %180 = vector.extract_strided_slice %154 {offsets = [0, 16], sizes = [4, 16], strides = [1, 1]} : vector<4x32xf32> to vector<4x16xf32>
    %181 = vector.extract_strided_slice %157 {offsets = [0, 16], sizes = [8, 16], strides = [1, 1]} : vector<8x32xf32> to vector<8x16xf32>
    %182 = tpu.transpose %181, [1, 0] : vector<8x16xf32> -> vector<16x8xf32>
    %cst_101 = arith.constant dense<0.000000e+00> : vector<4x8xf32>
    %183 = tpu.matmul %180, %182, %cst_101 {dimension_numbers = #tpu.dot_dimension_numbers<[1], [0], [0], [1], [0, 0, 1, 1], [], []>} : vector<4x16xf32>, vector<16x8xf32>, vector<4x8xf32> -> vector<4x8xf32>
    %cst_102 = arith.constant 2.500000e-01 : f32
    %184 = vector.broadcast %cst_102 : f32 to vector<4x8xf32>
    %185 = arith.mulf %183, %184 : vector<4x8xf32>
    %cst_103 = arith.constant dense<0xFF800000> : vector<4xf32>
    %186 = vector.multi_reduction <maximumf>, %185, %cst_103 [1] : vector<4x8xf32> to vector<4xf32>
    %187 = vector.shape_cast %186 : vector<4xf32> to vector<4x1xf32>
    %188 = vector.broadcast %187 : vector<4x1xf32> to vector<4x8xf32>
    %189 = arith.subf %185, %188 : vector<4x8xf32>
    %190 = math.exp %189 : vector<4x8xf32>
    %cst_104 = arith.constant dense<0.000000e+00> : vector<4xf32>
    %191 = vector.multi_reduction <add>, %190, %cst_104 [1] : vector<4x8xf32> to vector<4xf32>
    %192 = vector.shape_cast %191 : vector<4xf32> to vector<4x1xf32>
    %193 = vector.broadcast %192 : vector<4x1xf32> to vector<4x8xf32>
    %194 = arith.divf %190, %193 : vector<4x8xf32>
    %195 = vector.extract_strided_slice %160 {offsets = [0, 16], sizes = [8, 16], strides = [1, 1]} : vector<8x32xf32> to vector<8x16xf32>
    %cst_105 = arith.constant dense<0.000000e+00> : vector<4x16xf32>
    %196 = tpu.matmul %194, %195, %cst_105 {dimension_numbers = #tpu.dot_dimension_numbers<[1], [0], [0], [1], [0, 0, 1, 1], [], []>} : vector<4x8xf32>, vector<8x16xf32>, vector<4x16xf32> -> vector<4x16xf32>
    %197 = vector.extract_strided_slice %149 {offsets = [16, 0], sizes = [16, 32], strides = [1, 1]} : vector<32x32xf32> to vector<16x32xf32>
    %cst_106 = arith.constant dense<0.000000e+00> : vector<4x32xf32>
    %198 = tpu.matmul %196, %197, %cst_106 {dimension_numbers = #tpu.dot_dimension_numbers<[1], [0], [0], [1], [0, 0, 1, 1], [], []>} : vector<4x16xf32>, vector<16x32xf32>, vector<4x32xf32> -> vector<4x32xf32>
    %199 = arith.addf %179, %198 : vector<4x32xf32>
    %200 = vector.broadcast %151 : vector<1x32xf32> to vector<4x32xf32>
    %201 = arith.addf %199, %200 : vector<4x32xf32>
    %202 = arith.addf %109, %201 : vector<4x32xf32>
    %c0_107 = arith.constant 0 : index
    %c0_108 = arith.constant 0 : index
    %c0_109 = arith.constant 0 : index
    %203 = vector.load %arg24[%c0_107, %c0_108, %c0_109] : memref<1x1x32xf32, #tpu.memory_space<vmem>>, vector<1x1x32xf32>
    %204 = vector.shape_cast %203 : vector<1x1x32xf32> to vector<1x32xf32>
    %c0_110 = arith.constant 0 : index
    %c0_111 = arith.constant 0 : index
    %c0_112 = arith.constant 0 : index
    %205 = vector.load %arg25[%c0_110, %c0_111, %c0_112] : memref<1x1x32xf32, #tpu.memory_space<vmem>>, vector<1x1x32xf32>
    %206 = vector.shape_cast %205 : vector<1x1x32xf32> to vector<1x32xf32>
    %cst_113 = arith.constant dense<0.000000e+00> : vector<4xf32>
    %207 = vector.multi_reduction <add>, %202, %cst_113 [1] : vector<4x32xf32> to vector<4xf32>
    %208 = vector.shape_cast %207 : vector<4xf32> to vector<4x1xf32>
    %cst_114 = arith.constant 3.200000e+01 : f32
    %209 = vector.broadcast %cst_114 : f32 to vector<4x1xf32>
    %210 = arith.divf %208, %209 : vector<4x1xf32>
    %211 = vector.broadcast %210 : vector<4x1xf32> to vector<4x32xf32>
    %212 = arith.subf %202, %211 : vector<4x32xf32>
    %213 = arith.mulf %212, %212 : vector<4x32xf32>
    %cst_115 = arith.constant dense<0.000000e+00> : vector<4xf32>
    %214 = vector.multi_reduction <add>, %213, %cst_115 [1] : vector<4x32xf32> to vector<4xf32>
    %215 = vector.shape_cast %214 : vector<4xf32> to vector<4x1xf32>
    %cst_116 = arith.constant 3.200000e+01 : f32
    %216 = vector.broadcast %cst_116 : f32 to vector<4x1xf32>
    %217 = arith.divf %215, %216 : vector<4x1xf32>
    %218 = vector.broadcast %210 : vector<4x1xf32> to vector<4x32xf32>
    %219 = arith.subf %202, %218 : vector<4x32xf32>
    %cst_117 = arith.constant 9.99999974E-6 : f32
    %220 = vector.broadcast %cst_117 : f32 to vector<4x1xf32>
    %221 = arith.addf %217, %220 : vector<4x1xf32>
    %222 = math.rsqrt %221 : vector<4x1xf32>
    %223 = vector.broadcast %222 : vector<4x1xf32> to vector<4x32xf32>
    %224 = arith.mulf %219, %223 : vector<4x32xf32>
    %225 = vector.broadcast %204 : vector<1x32xf32> to vector<4x32xf32>
    %226 = arith.mulf %224, %225 : vector<4x32xf32>
    %227 = vector.broadcast %206 : vector<1x32xf32> to vector<4x32xf32>
    %228 = arith.addf %226, %227 : vector<4x32xf32>
    %c0_118 = arith.constant 0 : index
    %c0_119 = arith.constant 0 : index
    %c0_120 = arith.constant 0 : index
    %229 = vector.load %arg26[%c0_118, %c0_119, %c0_120] : memref<1x32x64xf32, #tpu.memory_space<vmem>>, vector<1x32x64xf32>
    %230 = vector.shape_cast %229 : vector<1x32x64xf32> to vector<32x64xf32>
    %cst_121 = arith.constant dense<0.000000e+00> : vector<4x64xf32>
    %231 = tpu.matmul %228, %230, %cst_121 {dimension_numbers = #tpu.dot_dimension_numbers<[1], [0], [0], [1], [0, 0, 1, 1], [], []>} : vector<4x32xf32>, vector<32x64xf32>, vector<4x64xf32> -> vector<4x64xf32>
    %c0_122 = arith.constant 0 : index
    %c0_123 = arith.constant 0 : index
    %c0_124 = arith.constant 0 : index
    %232 = vector.load %arg27[%c0_122, %c0_123, %c0_124] : memref<1x1x64xf32, #tpu.memory_space<vmem>>, vector<1x1x64xf32>
    %233 = vector.shape_cast %232 : vector<1x1x64xf32> to vector<1x64xf32>
    %234 = vector.broadcast %233 : vector<1x64xf32> to vector<4x64xf32>
    %235 = arith.addf %231, %234 : vector<4x64xf32>
    %cst_125 = arith.constant 5.000000e-01 : f32
    %236 = vector.broadcast %cst_125 : f32 to vector<4x64xf32>
    %237 = arith.mulf %236, %235 : vector<4x64xf32>
    %cst_126 = arith.constant 0.707106769 : f32
    %238 = vector.broadcast %cst_126 : f32 to vector<4x64xf32>
    %239 = arith.mulf %235, %238 : vector<4x64xf32>
    %240 = math.absf %239 : vector<4x64xf32>
    %cst_127 = arith.constant 0.327591091 : f32
    %241 = vector.broadcast %cst_127 : f32 to vector<4x64xf32>
    %242 = arith.mulf %241, %240 : vector<4x64xf32>
    %cst_128 = arith.constant 1.000000e+00 : f32
    %243 = vector.broadcast %cst_128 : f32 to vector<4x64xf32>
    %244 = arith.addf %243, %242 : vector<4x64xf32>
    %cst_129 = arith.constant 1.000000e+00 : f32
    %245 = vector.broadcast %cst_129 : f32 to vector<4x64xf32>
    %246 = arith.divf %245, %244 : vector<4x64xf32>
    %cst_130 = arith.constant 1.06140542 : f32
    %247 = vector.broadcast %cst_130 : f32 to vector<4x64xf32>
    %248 = arith.mulf %247, %246 : vector<4x64xf32>
    %cst_131 = arith.constant -1.45315206 : f32
    %249 = vector.broadcast %cst_131 : f32 to vector<4x64xf32>
    %250 = arith.addf %248, %249 : vector<4x64xf32>
    %251 = arith.mulf %250, %246 : vector<4x64xf32>
    %cst_132 = arith.constant 1.42141378 : f32
    %252 = vector.broadcast %cst_132 : f32 to vector<4x64xf32>
    %253 = arith.addf %251, %252 : vector<4x64xf32>
    %254 = arith.mulf %253, %246 : vector<4x64xf32>
    %cst_133 = arith.constant -0.284496725 : f32
    %255 = vector.broadcast %cst_133 : f32 to vector<4x64xf32>
    %256 = arith.addf %254, %255 : vector<4x64xf32>
    %257 = arith.mulf %256, %246 : vector<4x64xf32>
    %cst_134 = arith.constant 0.254829586 : f32
    %258 = vector.broadcast %cst_134 : f32 to vector<4x64xf32>
    %259 = arith.addf %257, %258 : vector<4x64xf32>
    %260 = arith.mulf %259, %246 : vector<4x64xf32>
    %cst_135 = arith.constant 0.000000e+00 : f32
    %261 = vector.broadcast %cst_135 : f32 to vector<4x64xf32>
    %262 = arith.subf %261, %240 : vector<4x64xf32>
    %263 = arith.mulf %262, %240 : vector<4x64xf32>
    %264 = math.exp %263 : vector<4x64xf32>
    %265 = arith.mulf %260, %264 : vector<4x64xf32>
    %cst_136 = arith.constant 1.000000e+00 : f32
    %266 = vector.broadcast %cst_136 : f32 to vector<4x64xf32>
    %267 = arith.subf %266, %265 : vector<4x64xf32>
    %cst_137 = arith.constant 0.000000e+00 : f32
    %268 = vector.broadcast %cst_137 : f32 to vector<4x64xf32>
    %269 = arith.cmpf oge, %239, %268 : vector<4x64xf32>
    %cst_138 = arith.constant 0.000000e+00 : f32
    %270 = vector.broadcast %cst_138 : f32 to vector<4x64xf32>
    %271 = arith.subf %270, %267 : vector<4x64xf32>
    %272 = arith.select %269, %267, %271 : vector<4x64xi1>, vector<4x64xf32>
    %cst_139 = arith.constant 1.000000e+00 : f32
    %273 = vector.broadcast %cst_139 : f32 to vector<4x64xf32>
    %274 = arith.addf %273, %272 : vector<4x64xf32>
    %275 = arith.mulf %237, %274 : vector<4x64xf32>
    %c0_140 = arith.constant 0 : index
    %c0_141 = arith.constant 0 : index
    %c0_142 = arith.constant 0 : index
    %276 = vector.load %arg28[%c0_140, %c0_141, %c0_142] : memref<1x64x32xf32, #tpu.memory_space<vmem>>, vector<1x64x32xf32>
    %277 = vector.shape_cast %276 : vector<1x64x32xf32> to vector<64x32xf32>
    %cst_143 = arith.constant dense<0.000000e+00> : vector<4x32xf32>
    %278 = tpu.matmul %275, %277, %cst_143 {dimension_numbers = #tpu.dot_dimension_numbers<[1], [0], [0], [1], [0, 0, 1, 1], [], []>} : vector<4x64xf32>, vector<64x32xf32>, vector<4x32xf32> -> vector<4x32xf32>
    %279 = arith.addf %202, %278 : vector<4x32xf32>
    %c0_144 = arith.constant 0 : index
    %c0_145 = arith.constant 0 : index
    %c0_146 = arith.constant 0 : index
    %280 = vector.load %arg29[%c0_144, %c0_145, %c0_146] : memref<1x1x32xf32, #tpu.memory_space<vmem>>, vector<1x1x32xf32>
    %281 = vector.shape_cast %280 : vector<1x1x32xf32> to vector<1x32xf32>
    %282 = vector.broadcast %281 : vector<1x32xf32> to vector<4x32xf32>
    %283 = arith.addf %279, %282 : vector<4x32xf32>
    %c0_147 = arith.constant 0 : index
    %c0_148 = arith.constant 0 : index
    %c0_149 = arith.constant 0 : index
    %284 = vector.load %arg30[%c0_147, %c0_148, %c0_149] : memref<1x4x32xf32, #tpu.memory_space<vmem>>, vector<1x4x32xf32>
    %285 = vector.shape_cast %284 : vector<1x4x32xf32> to vector<4x32xf32>
    %286 = vector.shape_cast %283 : vector<4x32xf32> to vector<1x4x32xf32>
    tpu.vector_store %arg30[%c0_147, %c0_148, %c0_149], %286 {strides = array<i32>} : memref<1x4x32xf32, #tpu.memory_space<vmem>>, vector<1x4x32xf32>,
    return
  }
  func.func @transform_0(%arg0: i32, %arg1: i32) -> (i32, i32, i32) {
    %c0_i32 = arith.constant 0 : i32
    %c0_i32_0 = arith.constant 0 : i32
    %c0_i32_1 = arith.constant 0 : i32
    return %arg0, %c0_i32, %c0_i32_0 : i32, i32, i32
  }
  func.func @transform_1(%arg0: i32, %arg1: i32) -> (i32, i32, i32) {
    %c0_i32 = arith.constant 0 : i32
    %c0_i32_0 = arith.constant 0 : i32
    %c0_i32_1 = arith.constant 0 : i32
    return %arg0, %c0_i32, %c0_i32_0 : i32, i32, i32
  }
  func.func @transform_2(%arg0: i32, %arg1: i32) -> (i32, i32, i32) {
    %c0_i32 = arith.constant 0 : i32
    %c0_i32_0 = arith.constant 0 : i32
    %c0_i32_1 = arith.constant 0 : i32
    return %arg1, %c0_i32, %c0_i32_0 : i32, i32, i32
  }
  func.func @transform_3(%arg0: i32, %arg1: i32) -> (i32, i32, i32) {
    %c0_i32 = arith.constant 0 : i32
    %c0_i32_0 = arith.constant 0 : i32
    %c0_i32_1 = arith.constant 0 : i32
    return %arg1, %c0_i32, %c0_i32_0 : i32, i32, i32
  }
  func.func @transform_4(%arg0: i32, %arg1: i32) -> (i32, i32, i32) {
    %c0_i32 = arith.constant 0 : i32
    %c0_i32_0 = arith.constant 0 : i32
    %c0_i32_1 = arith.constant 0 : i32
    return %arg1, %c0_i32, %c0_i32_0 : i32, i32, i32
  }
  func.func @transform_5(%arg0: i32, %arg1: i32) -> (i32, i32, i32) {
    %c0_i32 = arith.constant 0 : i32
    %c0_i32_0 = arith.constant 0 : i32
    %c0_i32_1 = arith.constant 0 : i32
    return %arg1, %c0_i32, %c0_i32_0 : i32, i32, i32
  }
  func.func @transform_6(%arg0: i32, %arg1: i32) -> (i32, i32, i32) {
    %c0_i32 = arith.constant 0 : i32
    %c0_i32_0 = arith.constant 0 : i32
    %c0_i32_1 = arith.constant 0 : i32
    return %arg1, %c0_i32, %c0_i32_0 : i32, i32, i32
  }
  func.func @transform_7(%arg0: i32, %arg1: i32) -> (i32, i32, i32) {
    %c0_i32 = arith.constant 0 : i32
    %c0_i32_0 = arith.constant 0 : i32
    %c0_i32_1 = arith.constant 0 : i32
    return %arg1, %c0_i32, %c0_i32_0 : i32, i32, i32
  }
  func.func @transform_8(%arg0: i32, %arg1: i32) -> (i32, i32, i32) {
    %c0_i32 = arith.constant 0 : i32
    %c0_i32_0 = arith.constant 0 : i32
    %c0_i32_1 = arith.constant 0 : i32
    return %arg1, %c0_i32, %c0_i32_0 : i32, i32, i32
  }
  func.func @transform_9(%arg0: i32, %arg1: i32) -> (i32, i32, i32) {
    %c0_i32 = arith.constant 0 : i32
    %c0_i32_0 = arith.constant 0 : i32
    %c0_i32_1 = arith.constant 0 : i32
    return %arg1, %c0_i32, %c0_i32_0 : i32, i32, i32
  }
  func.func @transform_10(%arg0: i32, %arg1: i32) -> (i32, i32, i32) {
    %c0_i32 = arith.constant 0 : i32
    %c0_i32_0 = arith.constant 0 : i32
    %c0_i32_1 = arith.constant 0 : i32
    return %arg1, %c0_i32, %c0_i32_0 : i32, i32, i32
  }
  func.func @transform_11(%arg0: i32, %arg1: i32) -> (i32, i32, i32) {
    %c0_i32 = arith.constant 0 : i32
    %c0_i32_0 = arith.constant 0 : i32
    %c0_i32_1 = arith.constant 0 : i32
    return %arg1, %c0_i32, %c0_i32_0 : i32, i32, i32
  }
  func.func @transform_12(%arg0: i32, %arg1: i32) -> (i32, i32, i32) {
    %c0_i32 = arith.constant 0 : i32
    %c0_i32_0 = arith.constant 0 : i32
    %c0_i32_1 = arith.constant 0 : i32
    return %arg1, %c0_i32, %c0_i32_0 : i32, i32, i32
  }
  func.func @transform_13(%arg0: i32, %arg1: i32) -> (i32, i32, i32) {
    %c0_i32 = arith.constant 0 : i32
    %c0_i32_0 = arith.constant 0 : i32
    %c0_i32_1 = arith.constant 0 : i32
    return %arg1, %c0_i32, %c0_i32_0 : i32, i32, i32
  }
  func.func @transform_14(%arg0: i32, %arg1: i32) -> (i32, i32, i32) {
    %c0_i32 = arith.constant 0 : i32
    %c0_i32_0 = arith.constant 0 : i32
    %c0_i32_1 = arith.constant 0 : i32
    return %arg1, %c0_i32, %c0_i32_0 : i32, i32, i32
  }
  func.func @transform_15(%arg0: i32, %arg1: i32) -> (i32, i32, i32) {
    %c0_i32 = arith.constant 0 : i32
    %c0_i32_0 = arith.constant 0 : i32
    %c0_i32_1 = arith.constant 0 : i32
    return %arg1, %c0_i32, %c0_i32_0 : i32, i32, i32
  }
  func.func @transform_16(%arg0: i32, %arg1: i32) -> (i32, i32, i32) {
    %c0_i32 = arith.constant 0 : i32
    %c0_i32_0 = arith.constant 0 : i32
    %c0_i32_1 = arith.constant 0 : i32
    return %arg1, %c0_i32, %c0_i32_0 : i32, i32, i32
  }
  func.func @transform_17(%arg0: i32, %arg1: i32) -> (i32, i32, i32) {
    %c0_i32 = arith.constant 0 : i32
    %c0_i32_0 = arith.constant 0 : i32
    %c0_i32_1 = arith.constant 0 : i32
    return %arg1, %c0_i32, %c0_i32_0 : i32, i32, i32
  }
  func.func @transform_18(%arg0: i32, %arg1: i32) -> (i32, i32, i32) {
    %c0_i32 = arith.constant 0 : i32
    %c0_i32_0 = arith.constant 0 : i32
    %c0_i32_1 = arith.constant 0 : i32
    return %arg1, %c0_i32, %c0_i32_0 : i32, i32, i32
  }
  func.func @transform_19(%arg0: i32, %arg1: i32) -> (i32, i32, i32) {
    %c0_i32 = arith.constant 0 : i32
    %c0_i32_0 = arith.constant 0 : i32
    %c0_i32_1 = arith.constant 0 : i32
    return %arg1, %c0_i32, %c0_i32_0 : i32, i32, i32
  }
  func.func @transform_20(%arg0: i32, %arg1: i32) -> (i32, i32, i32) {
    %c0_i32 = arith.constant 0 : i32
    %c0_i32_0 = arith.constant 0 : i32
    %c0_i32_1 = arith.constant 0 : i32
    return %arg1, %c0_i32, %c0_i32_0 : i32, i32, i32
  }
  func.func @transform_21(%arg0: i32, %arg1: i32) -> (i32, i32, i32) {
    %c0_i32 = arith.constant 0 : i32
    %c0_i32_0 = arith.constant 0 : i32
    %c0_i32_1 = arith.constant 0 : i32
    return %arg1, %c0_i32, %c0_i32_0 : i32, i32, i32
  }
  func.func @transform_22(%arg0: i32, %arg1: i32) -> (i32, i32, i32) {
    %c0_i32 = arith.constant 0 : i32
    %c0_i32_0 = arith.constant 0 : i32
    %c0_i32_1 = arith.constant 0 : i32
    return %arg1, %c0_i32, %c0_i32_0 : i32, i32, i32
  }
  func.func @transform_23(%arg0: i32, %arg1: i32) -> (i32, i32, i32) {
    %c0_i32 = arith.constant 0 : i32
    %c0_i32_0 = arith.constant 0 : i32
    %c0_i32_1 = arith.constant 0 : i32
    return %arg1, %c0_i32, %c0_i32_0 : i32, i32, i32
  }
  func.func @transform_24(%arg0: i32, %arg1: i32) -> (i32, i32, i32) {
    %c0_i32 = arith.constant 0 : i32
    %c0_i32_0 = arith.constant 0 : i32
    %c0_i32_1 = arith.constant 0 : i32
    return %arg1, %c0_i32, %c0_i32_0 : i32, i32, i32
  }
  func.func @transform_25(%arg0: i32, %arg1: i32) -> (i32, i32, i32) {
    %c0_i32 = arith.constant 0 : i32
    %c0_i32_0 = arith.constant 0 : i32
    %c0_i32_1 = arith.constant 0 : i32
    return %arg1, %c0_i32, %c0_i32_0 : i32, i32, i32
  }
  func.func @transform_26(%arg0: i32, %arg1: i32) -> (i32, i32, i32) {
    %c0_i32 = arith.constant 0 : i32
    %c0_i32_0 = arith.constant 0 : i32
    %c0_i32_1 = arith.constant 0 : i32
    return %arg1, %c0_i32, %c0_i32_0 : i32, i32, i32
  }
  func.func @transform_27(%arg0: i32, %arg1: i32) -> (i32, i32, i32) {
    %c0_i32 = arith.constant 0 : i32
    %c0_i32_0 = arith.constant 0 : i32
    %c0_i32_1 = arith.constant 0 : i32
    return %arg1, %c0_i32, %c0_i32_0 : i32, i32, i32
  }
  func.func @transform_28(%arg0: i32, %arg1: i32) -> (i32, i32, i32) {
    %c0_i32 = arith.constant 0 : i32
    %c0_i32_0 = arith.constant 0 : i32
    %c0_i32_1 = arith.constant 0 : i32
    return %arg0, %c0_i32, %c0_i32_0 : i32, i32, i32
  }
}

</mosaic_0001>

<bundles_post_ra>
// kernel: _lambda_.2
= control target key start
LH: loop header
LB: loop body
LE: loop exit
PB: predicated region body
PF: predicated region fallthrough
CT: control target
= control target key end

     0   :  { %s1781_s24 = smov 0   ;;  %s1783_s25 = smov 0   ;;  %s2034_s0 = inlined_call_operand.vmem [shape: f32[2,8,32], index: 0, kind: input, shape index: {}]   ;;  %s2035_s1 = inlined_call_operand.vmem [shape: f32[2,1,32], index: 1, kind: input, shape index: {}]   ;;  %s2036_s2 = inlined_call_operand.vmem [shape: f32[2,1,32], index: 2, kind: input, shape index: {}]   ;;  %s2037_s3 = inlined_call_operand.vmem [shape: f32[2,32,32], index: 3, kind: input, shape index: {}]   ;;  %s2038_s4 = inlined_call_operand.vmem [shape: f32[2,1,32], index: 4, kind: input, shape index: {}]   ;;  %s2039_s5 = inlined_call_operand.vmem [shape: f32[2,32,32], index: 5, kind: input, shape index: {}]   ;;  %s2040_s6 = inlined_call_operand.vmem [shape: f32[2,1,32], index: 6, kind: input, shape index: {}]   ;;  %s2041_s7 = inlined_call_operand.vmem [shape: f32[2,32,32], index: 7, kind: input, shape index: {}]   ;;  %s2042_s8 = inlined_call_operand.vmem [shape: f32[2,1,32], index: 8, kind: input, shape index: {}]   ;;  %s2043_s9 = inlined_call_operand.vmem [shape: f32[2,32,32], index: 9, kind: input, shape index: {}]   ;;  %s2044_s10 = inlined_call_operand.vmem [shape: f32[2,1,32], index: 10, kind: input, shape index: {}]   ;;  %s2045_s11 = inlined_call_operand.vmem [shape: f32[2,1,32], index: 11, kind: input, shape index: {}]   ;;  %s2046_s12 = inlined_call_operand.vmem [shape: f32[2,1,32], index: 12, kind: input, shape index: {}]   ;;  %s2047_s13 = inlined_call_operand.vmem [shape: f32[2,32,64], index: 13, kind: input, shape index: {}]   ;;  %s2048_s14 = inlined_call_operand.vmem [shape: f32[2,1,64], index: 14, kind: input, shape index: {}]   ;;  %s2049_s15 = inlined_call_operand.vmem [shape: f32[2,64,32], index: 15, kind: input, shape index: {}]   ;;  %s2050_s16 = inlined_call_operand.vmem [shape: f32[2,1,32], index: 16, kind: input, shape index: {}]   ;;  %s2051_s17 = inlined_call_operand.vmem [shape: f32[2,8,32], index: 17, kind: output, shape index: {}]  }
   0x1   :  { %2057 = sst [smem:[#allocation9_spill]] %s2034_s0  ;;  %s1785_s26 = smov 0  }
   0x2   :  { %2058 = sst [smem:[#allocation10_spill]] %s2035_s1  ;;  %s1787_s27 = smov 0  }
   0x3   :  { %2059 = sst [smem:[#allocation11_spill]] %s2037_s3  ;;  %s1789_s28 = smov 0  }
   0x4   :  { %2060 = sst [smem:[#allocation12_spill]] %s2038_s4 }
   0x5   :  { %2061 = sst [smem:[#allocation13_spill]] %s2039_s5 }
   0x6   :  { %2062 = sst [smem:[#allocation14_spill]] %s2041_s7 }
   0x7   :  { %2063 = sst [smem:[#allocation15_spill]] %s2043_s9 }
   0x8   :  { %2064 = sst [smem:[#allocation16_spill]] %s2044_s10 }
   0x9   :  { %2065 = sst [smem:[#allocation17_spill]] %s2045_s11 }
   0xa   :  { %2066 = sst [smem:[#allocation18_spill]] %s2048_s14 }
   0xb   :  { %2067 = sst [smem:[#allocation19_spill]] %s2049_s15 }
   0xc   :  { %2068 = sst [smem:[#allocation20_spill]] %s2050_s16 }
   0xd   :  { %2069 = sst [smem:[#allocation21_spill]] %s2051_s17 }
   0xe LB: > { %2070 = sst [smem:[#allocation2_spill]] %s1671_s24  ;;  %s36_s29 = sadd.s32 1, %s1679_s26  ;;  %s1687_s28 = sphi %s1789_s28, %s27_s28   ;;  %s1683_s27 = sphi %s1787_s27, %s2110_s27   ;;  %s1679_s26 = sphi %s1785_s26, %s2109_s26   ;;  %s1675_s25 = sphi %s1783_s25, %s2108_s25   ;;  %s1671_s24 = sphi %s1781_s24, %s2107_s24  }
   0xf   : > { %2071 = sst [smem:[#allocation3_spill]] %s1679_s26  ;;  %s39_s0 = sadd.s32 1, %s1683_s27 }
  0x10   : > { %2072 = sst [smem:[#allocation4_spill]] %s1683_s27  ;;  %p37_p0 = scmp.ge.s32.totalorder %s36_s29, 2 }
  0x11   : > { %2073 = sst [smem:[#allocation5_spill]] %s1687_s28  ;;  %p1542_p1 = scmp.ge.s32.totalorder %s1687_s28, 1 }
  0x12   : > { %p638_p2 = scmp.lt.s32.totalorder %s1687_s28, 5  ;;  %s2112_s29 = smov (%p37_p0, %s36_s29), 0 }
  0x13   : > { %2074 = sst [smem:[#allocation6_spill]] %s2112_s29  ;;  %s2114_s0 = smov (!%p37_p0, %s39_s0), %s1683_s27 }
  0x14   : > { %p639_p3 = pnand %p1542_p1, %p638_p2  ;;  %p41_p4 = scmp.ge.s32.totalorder %s2114_s0, 2 }
  0x16   : > { %s2116_s0 = smov (%p41_p4, %s2114_s0), 0  ;;  %642 = sbr.rel (%p639_p3) target bundleno = 1824 (0x720), region = 88 }
  0x17   : > { %2075 = sst [smem:[#allocation7_spill]] %s2116_s0 }
  0x1b   : > { %p748_p5 = scmp.lt.s32.totalorder %s1675_s25, 1  ;;  %p752_p6 = scmp.lt.s32.totalorder %s1671_s24, 1 }
  0x1c   : > { %s2076_s20 = sld [smem:[#allocation9_spill]] }
  0x1d   : > { %s2118_s25 = smov (!%p748_p5, %s1675_s25), 1  ;;  %s2078_s3 = sld [smem:[#allocation11_spill]] }
  0x1e   : > { %s1815_s30 = scalar_select %p752_p6, %s1671_s24, 1 }
  0x1f   : > { %s1543_s18 = sshll.u32 %s2118_s25, 3  ;;  %s2080_s5 = sld [smem:[#allocation13_spill]] }
  0x20   : > { %s1573_s24 = sshll.u32 %s1815_s30, 5  ;;  %s2081_s7 = sld [smem:[#allocation14_spill]] }
  0x21   : > { %s2082_s9 = sld [smem:[#allocation15_spill]]  ;;  %s1876_s17 = scalar_lea.vmem %s2047_s13, %s1573_s24 }
  0x22   : > { %s751_s21 = scalar_lea.vmem %s2076_s20, %s1543_s18  ;;  %s2088_s26 = sld [smem:[#allocation19_spill]] }
  0x23   : > { %s1832_s25 = scalar_lea.vmem %s2078_s3, %s1573_s24  ;;  %s2086_s3 = sld [smem:[#allocation18_spill]] }
  0x25   : > { %s1841_s22 = scalar_lea.vmem %s2080_s5, %s1573_s24  ;;  %s2087_s5 = sld [smem:[#allocation20_spill]] }
  0x26   : > { %s1850_s29 = scalar_lea.vmem %s2081_s7, %s1573_s24  ;;  %s2089_s7 = sld [smem:[#allocation21_spill]] }
  0x27   : > { %s1859_s1 = scalar_lea.vmem %s2082_s9, %s1573_s24  ;;  %s2090_s24 = sld [smem:[#allocation2_spill]] }
  0x28   : > { %2083 = sst [smem:[#allocation8_spill]] %s1859_s1  ;;  %s1578_s1 = sshll.u32 %s1815_s30, 6 }
  0x29   : > { %s803_s9 = scalar_lea.vmem %s2086_s3, %s1815_s30  ;;  %s1890_s11 = scalar_lea.vmem %s2088_s26, %s1578_s1 }
  0x2b   : > { %s811_s10 = scalar_lea.vmem %s2087_s5, %s1815_s30 }
  0x2c   : > { %s1895_s4 = scalar_lea.vmem %s2089_s7, %s1543_s18 }
  0x2d   : > { %p1557_p7 = scmp.ne.s32.totalorder %s2090_s24, 0 }
  0x2f   : > { %819 = sbr.rel (%p1557_p7) target bundleno = 54 (0x36), region = 92 }
  0x34   : > { %v820_v0 = vld [vmem:[%s751_s21] sm:$0xff]  ;;  %vm821_vm0 = vcmask 261120  }
  0x35   : > { %822 = vst.msk [vmem:[%s1895_s4] sm:$0xff] %vm821_vm0, %v820_v0 }
  0x36 PF: > { %vm826_vm1 = vcmask 261120   ;;  %v1689_v3 = vmov 32.0   ;;  %v867_v15 = vld [vmem:[%s1832_s25 + $0x18] sm:$0xff]  ;;  %v866_v17 = vld [vmem:[%s1832_s25 + $0x10] sm:$0xff]  ;;  %v865_v19 = vld [vmem:[%s1832_s25 + $0x8] sm:$0xff]  ;;  %s2091_s7 = sld [smem:[#allocation10_spill]]  ;;  %s2094_s26 = scalar_lea.vmem %s2040_s6, %s1815_s30  ;;  %v984_v53 = vlaneseq }
  0x37   : > { %1631 = vrcp.f32 %v1689_v3  ;;  %v872_v16 = vld [vmem:[%s1841_s22 + $0x18] sm:$0xff]  ;;  %902 = vmatpush.msra.mxu0 %v867_v15  ;;  %v871_v18 = vld [vmem:[%s1841_s22 + $0x10] sm:$0xff]  ;;  %v870_v20 = vld [vmem:[%s1841_s22 + $0x8] sm:$0xff]  ;;  %s2095_s19 = sld [smem:[#allocation12_spill]]  ;;  %vm956_vm6 = vcmask 130048   ;;  %s1690_s20 = smov 112  }
  0x38   : > { %925 = vmatpush.msra.mxu2 %v872_v16  ;;  %v864_v21 = vld [vmem:[%s1832_s25] sm:$0xff]  ;;  %v877_v23 = vld [vmem:[%s1850_s29 + $0x18] sm:$0xff]  ;;  %v876_v24 = vld [vmem:[%s1850_s29 + $0x10] sm:$0xff]  ;;  %s2093_s25 = scalar_lea.vmem %s2036_s2, %s1815_s30  ;;  %s2097_s28 = scalar_lea.vmem %s2042_s8, %s1815_s30  ;;  %v985_v54 = vshrl.u32 %v984_v53, 7  ;;  %v987_v55 = vand.u32 127, %v984_v53  ;;  %vm990_vm8 = vcmask 64512  }
  0x39   : > { %903 = vmatpush.msra.mxu0 %v866_v17  ;;  %v869_v22 = vld [vmem:[%s1841_s22] sm:$0xff]  ;;  %v875_v25 = vld [vmem:[%s1850_s29 + $0x8] sm:$0xff]  ;;  %s2098_s27 = sld [smem:[#allocation8_spill]]  ;;  %s2103_s22 = scalar_lea.vmem %s2046_s12, %s1815_s30 }
  0x3a   : > { %926 = vmatpush.msra.mxu2 %v871_v18  ;;  %v874_v28 = vld [vmem:[%s1850_s29] sm:$0xff]  ;;  %vm988_vm7 = vcmp.ge.s32.totalorder %v985_v54, %v987_v55  ;;  %s2099_s5 = sld [smem:[#allocation16_spill]]  ;;  %v1205_v55 = vld [vmem:[%s1876_s17 + $0x18] sm:$0xff] }
  0x3b   : > { %904 = vmatpush.msra.mxu0 %v865_v19  ;;  %v1622_v39 = vld [vmem:[%s2093_s25] ss:$0 sm:$0xff] }
  0x3c   : > { %v1900_v1 = vld [vmem:[%s1895_s4] sm:$0xff]  ;;  %927 = vmatpush.msra.mxu2 %v870_v20  ;;  %s2092_s29 = scalar_lea.vmem %s2091_s7, %s1815_s30 }
  0x3d   : > { %v827_v2 = vsel %vm826_vm1, %v1900_v1, 0.0  ;;  %v1632_v4 = vpop.eup %1631  ;;  %905 = vmatpush.msra.mxu0 %v864_v21  ;;  %v1621_v36 = vld [vmem:[%s2092_s29] ss:$0 sm:$0xff]  ;;  %s2096_s14 = scalar_lea.vmem %s2095_s19, %s1815_s30 }
  0x3e   : > { %828 = vadd.xlane.f32.xlu0 %v827_v2  ;;  %v831_v5 = vmul.f32 32.0, %v1632_v4  ;;  %vm835_vm2 = vweird.f32 %v1632_v4  ;;  %928 = vmatpush.msra.mxu2 %v869_v22  ;;  %v1624_v42 = vld [vmem:[%s2094_s26] ss:$0 sm:$0xff] }
  0x3f   : > { %v1623_v43 = vld [vmem:[%s2096_s14] ss:$0 sm:$0xff] }
  0x40   : > { %v832_v6 = vsub.f32 1.0, %v831_v5  ;;  %948 = vmatpush.msrb.mxu2 %v877_v23  ;;  %v1625_v48 = vld [vmem:[%s2097_s28] ss:$0 sm:$0xff]  ;;  %s2100_s7 = scalar_lea.vmem %s2099_s5, %s1815_s30 }
  0x42   : > { %v833_v7 = vmul.f32 %v1632_v4, %v832_v6  ;;  %949 = vmatpush.msrb.mxu2 %v876_v24 }
  0x44   : > { %v834_v8 = vadd.f32 %v1632_v4, %v833_v7  ;;  %950 = vmatpush.msrb.mxu2 %v875_v25  ;;  %v880_v25 = vld [vmem:[%s2098_s27 + $0x8] sm:$0xff] }
  0x46   : > { %v1904_v9 = vsel %vm835_vm2, %v1632_v4, %v834_v8  ;;  %951 = vmatpush.msrb.mxu2 %v874_v28  ;;  %v882_v28 = vld [vmem:[%s2098_s27 + $0x18] sm:$0xff] }
  0xb1   : > { %v829_v10 = vpop.xlane.xlu0 %828 }
  0xb2   : > { %v837_v11 = vmul.f32 %v1904_v9, %v829_v10 }
  0xb4   : > { %v838_v12 = vsub.f32 %v1900_v1, %v837_v11 }
  0xb6   : > { %v839_v13 = vmul.f32 %v838_v12, %v838_v12 }
  0xb8   : > { %v840_v14 = vsel %vm826_vm1, %v839_v13, 0.0 }
  0xb9   : > { %841 = vadd.xlane.f32.xlu0 %v840_v14 }
 0x12c   : > { %v842_v26 = vpop.xlane.xlu0 %841 }
 0x12d   : > { %v843_v27 = vmul.f32 %v842_v26, %v1904_v9 }
 0x12f   : > { %v844_v29 = vadd.f32 1e-05, %v843_v27  ;;  %v879_v27 = vld [vmem:[%s2098_s27] sm:$0xff] }
 0x131   : > { %1633 = vrsqrt.f32 %v844_v29  ;;  %vm851_vm4 = vweird.f32 %v844_v29 }
 0x137   : > { %v1634_v30 = vpop.eup %1633 }
 0x138   : > { %v846_v31 = vmul.f32 %v1634_v30, %v844_v29  ;;  %vm852_vm3 = vweird.f32 %v1634_v30  ;;  %v881_v29 = vld [vmem:[%s2098_s27 + $0x10] sm:$0xff] }
 0x139   : > { %vm853_vm5 = vmor %vm851_vm4, %vm852_vm3 }
 0x13a   : > { %v847_v32 = vmul.f32 %v1634_v30, %v846_v31 }
 0x13c   : > { %v848_v33 = vmul.f32 0.5, %v847_v32 }
 0x13e   : > { %v849_v34 = vsub.f32 1.5, %v848_v33 }
 0x140   : > { %v850_v35 = vmul.f32 %v1634_v30, %v849_v34 }
 0x142   : > { %v854_v37 = vsel %vm853_vm5, %v1634_v30, %v850_v35 }
 0x143   : > { %v855_v38 = vmul.f32 %v854_v37, %v838_v12 }
 0x145   : > { %v859_v40 = vmul.f32 %v1621_v36, %v855_v38 }
 0x147   : > { %v863_v41 = vadd.f32 %v1622_v39, %v859_v40 }
 0x149   : > { %1558 = vmatmul.msk.f32.vlgmr.msra.gmra.mxu0 %vm826_vm1, %v863_v41  ;;  %1559 = vmatmul.msk.f32.vlgmr.msra.gmra.mxu2 %vm826_vm1, %v863_v41 }
 0x14a   : > { %1136 = vmatpush.msra.mxu2 %v882_v28 }
 0x14c   : > { %1137 = vmatpush.msra.mxu2 %v881_v29  ;;  %v1274_v29 = vld [vmem:[%s1890_s11 + $0x8] sm:$0xff] }
 0x151   : > { %1560 = vmatmul.msk.f32.vlgmr.msrb.gmra.mxu2 %vm826_vm1, %v863_v41 }
 0x1c6   : > { %v907_v45 = vpop.f32.mrf.mxu0 }
 0x1c7   : > { %v908_v47 = vadd.f32 %v1623_v43, %v907_v45  ;;  %v1626_v43 = vld [vmem:[%s2100_s7] ss:$0 sm:$0xff] }
 0x1cc   : > { %v930_v44 = vpop.f32.mrf.mxu2 }
 0x1cd   : > { %v931_v46 = vadd.f32 %v1624_v42, %v930_v44 }
 0x1cf   : > { %1040 = vrot.lane.b32.xlu1 %v931_v46, %s1690_s20  ;;  %1561 = vmatpush.xpose.msk.msra.mxu3 %vm956_vm6, %v931_v46 }
 0x1d2   : > { %1562 = vmatmul.msk.f32.vlgmr.msra.gmra.mxu3 %vm956_vm6, %v908_v47 }
 0x1d4   : > { %v953_v49 = vpop.f32.mrf.mxu2 }
 0x1d5   : > { %v954_v50 = vadd.f32 %v1625_v48, %v953_v49 }
 0x1d7   : > { %1033 = vmatpush.msrb.mxu3 %v954_v50  ;;  %1038 = vrot.lane.b32.xlu1 %v908_v47, %s1690_s20 }
 0x1d9   : > { %1159 = vmatpush.msra.mxu3 %v880_v25  ;;  %v1275_v25 = vld [vmem:[%s1890_s11 + $0x10] sm:$0xff] }
 0x1db   : > { %1160 = vmatpush.msra.mxu3 %v879_v27 }
 0x241   : > { %v1041_v51 = vpop.permute.xlu1 %1040 }
 0x242   : > { %1564 = vmatpush.xpose.msk.msrb.mxu0 %vm956_vm6, %v1041_v51 }
 0x246   : > { %1225 = vmatpush.msra.mxu0 %v1205_v55 }
 0x249   : > { %v1039_v52 = vpop.permute.xlu1 %1038 }
 0x24a   : > { %1565 = vmatmul.msk.f32.vlgmr.msrb.gmra.mxu0 %vm956_vm6, %v1039_v52 }
 0x255   : > { %v980_v56 = vpop.f32.mrf.mxu3 }
 0x256   : > { %v983_v57 = vmul.f32 0.25, %v980_v56  ;;  %v1204_v56 = vld [vmem:[%s1876_s17 + $0x10] sm:$0xff] }
 0x257   : > { %1226 = vmatpush.msra.mxu0 %v1204_v56  ;;  %v1630_v56 = vld [vmem:[%s811_s10] ss:$0 sm:$0xff] }
 0x258   : > { %v989_v58 = vsel %vm988_vm7, %v983_v57, -1e+30  ;;  %v1203_v57 = vld [vmem:[%s1876_s17 + $0x8] sm:$0xff] }
 0x259   : > { %v991_v59 = vsel %vm990_vm8, %v989_v58, -inf  ;;  %1227 = vmatpush.msra.mxu0 %v1203_v57 }
 0x25a   : > { %992 = vmax.xlane.f32.xlu2 %v991_v59 }
 0x2c7   : > { %v1063_v60 = vpop.f32.mrf.mxu0 }
 0x2c8   : > { %v1066_v61 = vmul.f32 0.25, %v1063_v60 }
 0x2ca   : > { %v1067_v62 = vsel %vm988_vm7, %v1066_v61, -1e+30 }
 0x2cb   : > { %v1068_v63 = vsel %vm990_vm8, %v1067_v62, -inf }
 0x2cc   : > { %1069 = vmax.xlane.f32.xlu2 %v1068_v63 }
 0x2cd   : > { %v993_v0 = vpop.xlane.xlu2 %992 }
 0x2ce   : > { %v994_v2 = vsub.f32 %v989_v58, %v993_v0 }
 0x2d0   : > { %v995_v3 = vmul.f32 1.442695, %v994_v2 }
 0x2d2   : > { %1635 = vpow2.f32 %v995_v3 }
 0x2d8   : > { %v1636_v4 = vpop.eup %1635 }
 0x2d9   : > { %v997_v5 = vsel %vm990_vm8, %v1636_v4, 0.0 }
 0x2da   : > { %998 = vadd.xlane.f32.xlu0 %v997_v5 }
 0x2e4   : > { %1093 = vrot.lane.b32.xlu2 %v954_v50, %s1690_s20 }
 0x33f   : > { %v1070_v6 = vpop.xlane.xlu2 %1069 }
 0x340   : > { %v1071_v7 = vsub.f32 %v1067_v62, %v1070_v6  ;;  %v1628_v6 = vld [vmem:[%s2103_s22] ss:$0 sm:$0xff] }
 0x342   : > { %v1072_v8 = vmul.f32 1.442695, %v1071_v7 }
 0x344   : > { %1637 = vpow2.f32 %v1072_v8 }
 0x347   : > { %v1094_v10 = vpop.permute.xlu2 %1093 }
 0x348   : > { %1114 = vmatpush.msra.mxu1 %v1094_v10  ;;  %v1629_v10 = vld [vmem:[%s803_s9] ss:$0 sm:$0xff] }
 0x34a   : > { %v1638_v11 = vpop.eup %1637 }
 0x34b   : > { %v1074_v12 = vsel %vm990_vm8, %v1638_v11, 0.0 }
 0x34c   : > { %1075 = vadd.xlane.f32.xlu1 %v1074_v12 }
 0x34d   : > { %v999_v13 = vpop.xlane.xlu0 %998 }
 0x34e   : > { %1639 = vrcp.f32 %v999_v13  ;;  %v1011_v17 = vand.u32 2147483648, %v999_v13  ;;  %v1009_v19 = vand.u32 2147483647, %v999_v13  ;;  %vm1005_vm10 = vweird.f32 %v999_v13 }
 0x350   : > { %v1012_v21 = vor.u32 1.1754944e-38, %v1011_v17  ;;  %vm1010_vm12 = vcmp.eq.f32.partialorder %v1009_v19, 8.507059e+37  ;;  %v1280_v17 = vld [vmem:[%s1890_s11 + $0x38] sm:$0xff]  ;;  %v1278_v19 = vld [vmem:[%s1890_s11 + $0x28] sm:$0xff] }
 0x351   : > { %1293 = vmatpush.msrb.mxu1 %v1280_v17 }
 0x354   : > { %v1640_v14 = vpop.eup %1639 }
 0x355   : > { %v1001_v15 = vmul.f32 %v1640_v14, %v999_v13  ;;  %vm1006_vm9 = vweird.f32 %v1640_v14 }
 0x356   : > { %vm1007_vm11 = vmor %vm1005_vm10, %vm1006_vm9  ;;  %vm1281_vm10 = vcmask 523264  }
 0x357   : > { %v1002_v16 = vsub.f32 1.0, %v1001_v15 }
 0x359   : > { %v1003_v18 = vmul.f32 %v1640_v14, %v1002_v16 }
 0x35b   : > { %v1004_v20 = vadd.f32 %v1640_v14, %v1003_v18  ;;  %v1279_v18 = vld [vmem:[%s1890_s11 + $0x30] sm:$0xff] }
 0x35c   : > { %1294 = vmatpush.msrb.mxu1 %v1279_v18 }
 0x35d   : > { %v1008_v22 = vsel %vm1007_vm11, %v1640_v14, %v1004_v20  ;;  %v1277_v20 = vld [vmem:[%s1890_s11 + $0x20] sm:$0xff] }
 0x35e   : > { %v1013_v23 = vsel %vm1010_vm12, %v1012_v21, %v1008_v22  ;;  %1295 = vmatpush.msrb.mxu1 %v1278_v19 }
 0x35f   : > { %v1014_v24 = vmul.f32 %v1636_v4, %v1013_v23  ;;  %v1276_v23 = vld [vmem:[%s1890_s11 + $0x18] sm:$0xff] }
 0x360   : > { %1296 = vmatpush.msrb.mxu1 %v1277_v20 }
 0x361   : > { %1563 = vmatmul.msk.f32.vlgmr.msrb.gmra.mxu3 %vm990_vm8, %v1014_v24 }
 0x362   : > { %1297 = vmatpush.msrb.mxu1 %v1276_v23 }
 0x364   : > { %1298 = vmatpush.msrb.mxu1 %v1275_v25 }
 0x366   : > { %1299 = vmatpush.msrb.mxu1 %v1274_v29 }
 0x3bf   : > { %v1076_v26 = vpop.xlane.xlu1 %1075 }
 0x3c0   : > { %1641 = vrcp.f32 %v1076_v26  ;;  %v1088_v33 = vand.u32 2147483648, %v1076_v26  ;;  %v1086_v35 = vand.u32 2147483647, %v1076_v26  ;;  %vm1082_vm14 = vweird.f32 %v1076_v26 }
 0x3c2   : > { %v1089_v37 = vor.u32 1.1754944e-38, %v1088_v33  ;;  %vm1087_vm0 = vcmp.eq.f32.partialorder %v1086_v35, 8.507059e+37 }
 0x3c6   : > { %v1642_v30 = vpop.eup %1641 }
 0x3c7   : > { %v1078_v31 = vmul.f32 %v1642_v30, %v1076_v26  ;;  %vm1083_vm13 = vweird.f32 %v1642_v30 }
 0x3c8   : > { %vm1084_vm15 = vmor %vm1082_vm14, %vm1083_vm13 }
 0x3c9   : > { %v1079_v32 = vsub.f32 1.0, %v1078_v31 }
 0x3cb   : > { %v1080_v34 = vmul.f32 %v1642_v30, %v1079_v32 }
 0x3cd   : > { %v1081_v36 = vadd.f32 %v1642_v30, %v1080_v34 }
 0x3cf   : > { %v1085_v38 = vsel %vm1084_vm15, %v1642_v30, %v1081_v36  ;;  %v1273_v30 = vld [vmem:[%s1890_s11] sm:$0xff] }
 0x3d0   : > { %v1090_v39 = vsel %vm1087_vm0, %v1089_v37, %v1085_v38  ;;  %1300 = vmatpush.msrb.mxu1 %v1273_v30 }
 0x3d1   : > { %v1091_v40 = vmul.f32 %v1638_v11, %v1090_v39 }
 0x3d3   : > { %1566 = vmatmul.msk.f32.vlgmr.msra.gmra.mxu1 %vm990_vm8, %v1091_v40 }
 0x3e4   : > { %v1035_v41 = vpop.f32.mrf.mxu3 }
 0x3e5   : > { %1568 = vmatmul.msk.f32.vlgmr.msra.gmra.mxu3 %vm956_vm6, %v1035_v41 }
 0x450   : > { %v1116_v42 = vpop.f32.mrf.mxu1 }
 0x451   : > { %1567 = vmatmul.msk.f32.vlgmr.msra.gmra.mxu2 %vm956_vm6, %v1116_v42 }
 0x468   : > { %v1162_v44 = vpop.f32.mrf.mxu3 }
 0x4d4   : > { %v1139_v45 = vpop.f32.mrf.mxu2 }
 0x4d5   : > { %v1163_v46 = vadd.f32 %v1162_v44, %v1139_v45 }
 0x4d7   : > { %v1168_v47 = vadd.f32 %v1626_v43, %v1163_v46 }
 0x4d9   : > { %v1975_v48 = vadd.f32 %v1168_v47, %v1900_v1  ;;  %v1202_v1 = vld [vmem:[%s1876_s17] sm:$0xff]  ;;  %s2101_s17 = sld [smem:[#allocation17_spill]] }
 0x4da   : > { %1228 = vmatpush.msra.mxu0 %v1202_v1 }
 0x4db   : > { %v1172_v49 = vsel %vm826_vm1, %v1975_v48, 0.0 }
 0x4dc   : > { %1173 = vadd.xlane.f32.xlu0 %v1172_v49 }
 0x4df   : > { %s2102_s21 = scalar_lea.vmem %s2101_s17, %s1815_s30 }
 0x4e0   : > { %v1627_v4 = vld [vmem:[%s2102_s21] ss:$0 sm:$0xff] }
 0x54f   : > { %v1174_v50 = vpop.xlane.xlu0 %1173 }
 0x550   : > { %v1175_v51 = vmul.f32 %v1174_v50, %v1904_v9 }
 0x552   : > { %v1176_v52 = vsub.f32 %v1975_v48, %v1175_v51 }
 0x554   : > { %v1177_v53 = vmul.f32 %v1176_v52, %v1176_v52 }
 0x556   : > { %v1178_v54 = vsel %vm826_vm1, %v1177_v53, 0.0 }
 0x557   : > { %1179 = vadd.xlane.f32.xlu0 %v1178_v54 }
 0x5ca   : > { %v1180_v58 = vpop.xlane.xlu0 %1179 }
 0x5cb   : > { %v1181_v59 = vmul.f32 %v1180_v58, %v1904_v9 }
 0x5cd   : > { %v1182_v60 = vadd.f32 1e-05, %v1181_v59 }
 0x5cf   : > { %1643 = vrsqrt.f32 %v1182_v60  ;;  %vm1189_vm3 = vweird.f32 %v1182_v60 }
 0x5d5   : > { %v1644_v61 = vpop.eup %1643 }
 0x5d6   : > { %v1184_v62 = vmul.f32 %v1644_v61, %v1182_v60  ;;  %vm1190_vm2 = vweird.f32 %v1644_v61 }
 0x5d7   : > { %vm1191_vm4 = vmor %vm1189_vm3, %vm1190_vm2 }
 0x5d8   : > { %v1185_v63 = vmul.f32 %v1644_v61, %v1184_v62 }
 0x5da   : > { %v1186_v0 = vmul.f32 0.5, %v1185_v63 }
 0x5dc   : > { %v1187_v2 = vsub.f32 1.5, %v1186_v0 }
 0x5de   : > { %v1188_v3 = vmul.f32 %v1644_v61, %v1187_v2 }
 0x5e0   : > { %v1192_v5 = vsel %vm1191_vm4, %v1644_v61, %v1188_v3 }
 0x5e1   : > { %v1193_v9 = vmul.f32 %v1192_v5, %v1176_v52 }
 0x5e3   : > { %v1197_v7 = vmul.f32 %v1627_v4, %v1193_v9 }
 0x5e5   : > { %v1201_v8 = vadd.f32 %v1628_v6, %v1197_v7 }
 0x5e7   : > { %1569 = vmatmul.msk.f32.vlgmr.msra.gmra.mxu0 %vm826_vm1, %v1201_v8 }
 0x664   : > { %v1230_v11 = vpop.f32.mrf.mxu0 }
 0x665   : > { %v1231_v12 = vadd.f32 %v1629_v10, %v1230_v11 }
 0x667   : > { %v1234_v13 = vmul.f32 0.70710677, %v1231_v12  ;;  %v1233_v53 = vmul.f32 0.5, %v1231_v12 }
 0x669   : > { %v1235_v14 = vand.u32 2147483647, %v1234_v13  ;;  %vm1268_vm9 = vcmp.ge.f32.partialorder %v1234_v13, 0.0 }
 0x66b   : > { %v1236_v15 = vmul.f32 0.3275911, %v1235_v14  ;;  %v1262_v35 = vsub.f32 0.0, %v1235_v14 }
 0x66d   : > { %v1237_v16 = vadd.f32 1.0, %v1236_v15  ;;  %v1263_v38 = vmul.f32 %v1262_v35, %v1235_v14 }
 0x66f   : > { %1645 = vrcp.f32 %v1237_v16  ;;  %v1249_v26 = vand.u32 2147483648, %v1237_v16  ;;  %v1247_v28 = vand.u32 2147483647, %v1237_v16  ;;  %vm1243_vm6 = vweird.f32 %v1237_v16 }
 0x670   : > { %v1264_v41 = vmul.f32 1.442695, %v1263_v38 }
 0x671   : > { %v1250_v32 = vor.u32 1.1754944e-38, %v1249_v26  ;;  %vm1248_vm8 = vcmp.eq.f32.partialorder %v1247_v28, 8.507059e+37 }
 0x672   : > { %1647 = vpow2.f32 %v1264_v41 }
 0x675   : > { %v1646_v21 = vpop.eup %1645 }
 0x676   : > { %v1239_v22 = vmul.f32 %v1646_v21, %v1237_v16  ;;  %vm1244_vm5 = vweird.f32 %v1646_v21 }
 0x677   : > { %vm1245_vm7 = vmor %vm1243_vm6, %vm1244_vm5 }
 0x678   : > { %v1240_v24 = vsub.f32 1.0, %v1239_v22  ;;  %v1648_v47 = vpop.eup %1647 }
 0x67a   : > { %v1241_v27 = vmul.f32 %v1646_v21, %v1240_v24 }
 0x67c   : > { %v1242_v31 = vadd.f32 %v1646_v21, %v1241_v27 }
 0x67e   : > { %v1246_v33 = vsel %vm1245_vm7, %v1646_v21, %v1242_v31 }
 0x67f   : > { %v1251_v34 = vsel %vm1248_vm8, %v1250_v32, %v1246_v33 }
 0x680   : > { %v1253_v36 = vmul.f32 1.0614054, %v1251_v34 }
 0x682   : > { %v1254_v37 = vadd.f32 -1.4531521, %v1253_v36 }
 0x684   : > { %v1255_v39 = vmul.f32 %v1254_v37, %v1251_v34 }
 0x686   : > { %v1256_v40 = vadd.f32 1.4214138, %v1255_v39 }
 0x688   : > { %v1257_v42 = vmul.f32 %v1256_v40, %v1251_v34 }
 0x68a   : > { %v1258_v43 = vadd.f32 -0.28449672, %v1257_v42 }
 0x68c   : > { %v1259_v44 = vmul.f32 %v1258_v43, %v1251_v34 }
 0x68e   : > { %v1260_v45 = vadd.f32 0.2548296, %v1259_v44 }
 0x690   : > { %v1261_v46 = vmul.f32 %v1260_v45, %v1251_v34 }
 0x692   : > { %v1266_v49 = vmul.f32 %v1648_v47, %v1261_v46 }
 0x694   : > { %v1267_v50 = vsub.f32 1.0, %v1266_v49 }
 0x696   : > { %v1269_v51 = vsub.f32 0.0, %v1267_v50 }
 0x698   : > { %v1270_v52 = vsel %vm1268_vm9, %v1267_v50, %v1269_v51 }
 0x699   : > { %v1271_v54 = vadd.f32 1.0, %v1270_v52 }
 0x69b   : > { %v1272_v55 = vmul.f32 %v1271_v54, %v1233_v53 }
 0x69d   : > { %1570 = vmatmul.msk.f32.vlgmr.msrb.gmra.mxu1 %vm1281_vm10, %v1272_v55 }
 0x71a   : > { %v1302_v57 = vpop.f32.mrf.mxu1 }
 0x71b   : > { %v1305_v1 = vadd.f32 %v1302_v57, %v1975_v48 }
 0x71d   : > { %v1310_v58 = vadd.f32 %v1630_v56, %v1305_v1 }
 0x71f   : > { %1311 = vst.msk [vmem:[%s1895_s4] sm:$0xff] %vm826_vm1, %v1310_v58 }
 0x720 PF: > { %s2106_s14 = sld [smem:[#allocation5_spill]] }
 0x721   : > { %s2107_s24 = sld [smem:[#allocation3_spill]] }
 0x722   : > { %s2108_s25 = sld [smem:[#allocation4_spill]] }
 0x723   : > { %s2109_s26 = sld [smem:[#allocation6_spill]] }
 0x724   : > { %s2110_s27 = sld [smem:[#allocation7_spill]] }
 0x726   : > { %s27_s28 = sadd.s32 1, %s2106_s14  }
 0x727   : > { %p24_p8 = scmp.ge.s32.totalorder %s27_s28, 6  }
 0x729   :  { %26 = sbr.rel (!%p24_p8) target bundleno = 14 (0xe), region = 170 }

// kernel: _lambda_.3
= control target key start
LH: loop header
LB: loop body
LE: loop exit
PB: predicated region body
PF: predicated region fallthrough
CT: control target
= control target key end

     0   :  { %s3807_s0 = inlined_call_operand.vmem [shape: f32[2,4,32], index: 0, kind: input, shape index: {}]   ;;  %s3808_s1 = inlined_call_operand.vmem [shape: f32[2,8,32], index: 1, kind: input, shape index: {}]   ;;  %s3809_s2 = inlined_call_operand.vmem [shape: f32[2,1,32], index: 2, kind: input, shape index: {}]   ;;  %s3810_s3 = inlined_call_operand.vmem [shape: f32[2,1,32], index: 3, kind: input, shape index: {}]   ;;  %s3811_s4 = inlined_call_operand.vmem [shape: f32[2,32,32], index: 4, kind: input, shape index: {}]   ;;  %s3812_s5 = inlined_call_operand.vmem [shape: f32[2,1,32], index: 5, kind: input, shape index: {}]   ;;  %s3813_s6 = inlined_call_operand.vmem [shape: f32[2,32,32], index: 6, kind: input, shape index: {}]   ;;  %s3814_s7 = inlined_call_operand.vmem [shape: f32[2,1,32], index: 7, kind: input, shape index: {}]   ;;  %s3815_s8 = inlined_call_operand.vmem [shape: f32[2,32,32], index: 8, kind: input, shape index: {}]   ;;  %s3816_s9 = inlined_call_operand.vmem [shape: f32[2,1,32], index: 9, kind: input, shape index: {}]   ;;  %s3817_s10 = inlined_call_operand.hbm [shape: f32[2,32,32], index: 10, kind: input, shape index: {}]   ;;  %s3818_s11 = inlined_call_operand.vmem [shape: f32[2,1,32], index: 11, kind: input, shape index: {}]   ;;  %s3819_s12 = inlined_call_operand.vmem [shape: f32[2,1,32], index: 12, kind: input, shape index: {}]   ;;  %s3820_s13 = inlined_call_operand.vmem [shape: f32[2,1,32], index: 13, kind: input, shape index: {}]   ;;  %s3821_s14 = inlined_call_operand.hbm [shape: f32[2,32,32], index: 14, kind: input, shape index: {}]   ;;  %s3822_s15 = inlined_call_operand.vmem [shape: f32[2,1,32], index: 15, kind: input, shape index: {}]   ;;  %s3823_s16 = inlined_call_operand.hbm [shape: f32[2,32,32], index: 16, kind: input, shape index: {}]   ;;  %s3824_s17 = inlined_call_operand.vmem [shape: f32[2,1,32], index: 17, kind: input, shape index: {}]   ;;  %s3825_s18 = inlined_call_operand.hbm [shape: f32[2,32,32], index: 18, kind: input, shape index: {}]   ;;  %s3826_s19 = inlined_call_operand.vmem [shape: f32[2,1,32], index: 19, kind: input, shape index: {}]   ;;  %s3827_s20 = inlined_call_operand.hbm [shape: f32[2,32,32], index: 20, kind: input, shape index: {}]   ;;  %s3828_s21 = inlined_call_operand.vmem [shape: f32[2,1,32], index: 21, kind: input, shape index: {}]   ;;  %s3829_s22 = inlined_call_operand.vmem [shape: f32[2,1,32], index: 22, kind: input, shape index: {}]   ;;  %s3830_s23 = inlined_call_operand.vmem [shape: f32[2,1,32], index: 23, kind: input, shape index: {}]   ;;  %s3831_s24 = inlined_call_operand.hbm [shape: f32[2,32,64], index: 24, kind: input, shape index: {}]   ;;  %s3832_s25 = inlined_call_operand.vmem [shape: f32[2,1,64], index: 25, kind: input, shape index: {}]   ;;  %s3833_s26 = inlined_call_operand.vmem [shape: f32[2,64,32], index: 26, kind: input, shape index: {}]   ;;  %s3834_s27 = inlined_call_operand.vmem [shape: f32[2,1,32], index: 27, kind: input, shape index: {}]   ;;  %s3835_s28 = inlined_call_operand.vmem [shape: f32[2,4,32], index: 28, kind: output, shape index: {}]  }
   0x1   :  { %3848 = sst [smem:[#allocation30_spill]] %s3807_s0 }
   0x2   :  { %3849 = sst [smem:[#allocation31_spill]] %s3808_s1 }
   0x3   :  { %3850 = sst [smem:[#allocation32_spill]] %s3809_s2 }
   0x4   :  { %3851 = sst [smem:[#allocation33_spill]] %s3810_s3 }
   0x5   :  { %3852 = sst [smem:[#allocation34_spill]] %s3811_s4 }
   0x6   :  { %3853 = sst [smem:[#allocation35_spill]] %s3812_s5 }
   0x7   :  { %3854 = sst [smem:[#allocation36_spill]] %s3813_s6 }
   0x8   :  { %3855 = sst [smem:[#allocation37_spill]] %s3814_s7 }
   0x9   :  { %3856 = sst [smem:[#allocation38_spill]] %s3815_s8 }
   0xa   :  { %3857 = sst [smem:[#allocation39_spill]] %s3816_s9 }
   0xb   :  { %3858 = sst [smem:[#allocation40_spill]] %s3817_s10 }
   0xc   :  { %3859 = sst [smem:[#allocation41_spill]] %s3818_s11 }
   0xd   :  { %3860 = sst [smem:[#allocation42_spill]] %s3819_s12 }
   0xe   :  { %3861 = sst [smem:[#allocation43_spill]] %s3820_s13 }
   0xf   :  { %3862 = sst [smem:[#allocation44_spill]] %s3821_s14 }
  0x10   :  { %3863 = sst [smem:[#allocation45_spill]] %s3822_s15 }
  0x11   :  { %3864 = sst [smem:[#allocation46_spill]] %s3823_s16 }
  0x12   :  { %3865 = sst [smem:[#allocation47_spill]] %s3825_s18 }
  0x13   :  { %3866 = sst [smem:[#allocation48_spill]] %s3826_s19 }
  0x14   :  { %3867 = sst [smem:[#allocation49_spill]] %s3827_s20 }
  0x15   :  { %3868 = sst [smem:[#allocation50_spill]] %s3828_s21 }
  0x16   :  { %3869 = sst [smem:[#allocation51_spill]] %s3829_s22 }
  0x17   :  { %3870 = sst [smem:[#allocation52_spill]] %s3830_s23 }
  0x18   :  { %3871 = sst [smem:[#allocation53_spill]] %s3831_s24 }
  0x19   :  { %3872 = sst [smem:[#allocation54_spill]] %s3832_s25 }
  0x1a   :  { %3873 = sst [smem:[#allocation55_spill]] %s3833_s26 }
  0x1b   :  { %3874 = sst [smem:[#allocation56_spill]] %s3834_s27 }
  0x1c   :  { %3875 = sst [smem:[#allocation57_spill]] %s3835_s28 }
  0x1d   :  { %33 = vsyncpa [#allocation3], 0 }
  0x1e   :  { %35 = vsyncpa [#allocation3 + $0x1], 0 }
  0x1f   :  { %36 = vsyncpa [#allocation5], 0 }
  0x20   :  { %38 = vsyncpa [#allocation5 + $0x1], 0 }
  0x21   :  { %39 = vsyncpa [#allocation8], 0 }
  0x22   :  { %41 = vsyncpa [#allocation8 + $0x1], 0 }
  0x23   :  { %42 = vsyncpa [#allocation11], 0 }
  0x24   :  { %44 = vsyncpa [#allocation11 + $0x1], 0  ;;  %s3290_s8 = smov 0   ;;  %s3292_s5 = smov 0  }
  0x25   :  { %s3294_s9 = smov 0   ;;  %s3296_s30 = smov 0  }
  0x26   :  { %s3298_s3 = smov 0   ;;  %s3300_s6 = smov 0  }
  0x27   :  { %s3302_s10 = smov 0   ;;  %s3304_s0 = smov 0  }
  0x28 LB: > { %3876 = sst [smem:[#allocation16_spill]] %s3115_s5  ;;  %s3838_s11 = sadd.s32 4294967295, %s3139_s0   ;;  %s3139_s0 = sphi %s3304_s0, %s50_s0   ;;  %s3135_s10 = sphi %s3302_s10, %s3962_s10   ;;  %s3131_s6 = sphi %s3300_s6, %s3961_s6   ;;  %s3127_s3 = sphi %s3298_s3, %s3960_s3   ;;  %s3123_s30 = sphi %s3296_s30, %s3959_s30   ;;  %s3119_s9 = sphi %s3294_s9, %s3958_s9   ;;  %s3115_s5 = sphi %s3292_s5, %s3957_s5   ;;  %s3111_s8 = sphi %s3290_s8, %s3956_s8  }
  0x29   : > { %3877 = sst [smem:[#allocation17_spill]] %s3119_s9  ;;  %s59_s29 = sadd.s32 1, %s3131_s6 }
  0x2a   : > { %3878 = sst [smem:[#allocation18_spill]] %s3131_s6  ;;  %p60_p0 = scmp.ge.s32.totalorder %s59_s29, 2 }
  0x2b   : > { %3879 = sst [smem:[#allocation19_spill]] %s3135_s10  ;;  %s62_s2 = sadd.s32 1, %s3135_s10 }
  0x2c   : > { %3880 = sst [smem:[#allocation20_spill]] %s3139_s0  ;;  %s329_s7 = sadd.s32 1, %s3119_s9 }
  0x2d   : > { %p336_p1 = scmp.ne.s32.totalorder %s3119_s9, %s3115_s5  ;;  %s3964_s29 = smov (%p60_p0, %s59_s29), 0 }
  0x2e   : > { %3881 = sst [smem:[#allocation21_spill]] %s3964_s29  ;;  %s3966_s2 = smov (!%p60_p0, %s62_s2), %s3135_s10 }
  0x2f   : > { %s326_s12 = ssub.s32 %s3131_s6, %s3964_s29  ;;  %p337_p2 = scmp.eq.s32.totalorder %s3139_s0, 0 }
  0x30   : > { %p64_p3 = scmp.ge.s32.totalorder %s3966_s2, 2  ;;  %p327_p4 = scmp.eq.s32.totalorder %s326_s12, 0 }
  0x31   : > { %p338_p5 = por %p337_p2, %p336_p1  ;;  %p342_p6 = scmp.ne.s32.totalorder %s3115_s5, %s3111_s8 }
  0x32   : > { %s3968_s2 = smov (%p64_p3, %s3966_s2), 0  ;;  %p343_p7 = scmp.eq.s32.totalorder %s3838_s11, 0 }
  0x33   : > { %3882 = sst [smem:[#allocation22_spill]] %s3968_s2  ;;  %p2768_p8 = scmp.lt.s32.totalorder %s3139_s0, 4 }
  0x34   : > { %s3344_s1 = scalar_select %p327_p4, %s3119_s9, %s329_s7  }
  0x35   : > { %s3350_s4 = sand.u32 1, %s3119_s9   ;;  %p3352_p9 = por %p343_p7, %p342_p6 }
  0x36   : > { %3883 = sst [smem:[#allocation23_spill]] %s3344_s1  ;;  %s3357_s29 = sshll.u32 %s3350_s4, 5 }
  0x37   : > { %s3360_s8 = sshll.u32 %s3131_s6, 5  ;;  %p3362_p10 = pnand %p2768_p8, %p338_p5 }
  0x38   : > { %s942_s12 = sand.u32 1, %s3139_s0   ;;  %s3886_s14 = sld [smem:[#allocation44_spill]] }
  0x39   : > { %s946_s9 = scalar_lea.vmem [#allocation4], %s3357_s29  ;;  %p2680_p11 = scmp.ge.s32.totalorder %s3139_s0, 1 }
  0x3a   : > { %s954_s28 = sshll.u32 %s946_s9, 4  ;;  %s3373_s6 = scalar_lea.sflag [#allocation5], %s942_s12  ;;  %s955_s28 = int_to_ptr.vmem [resolvable:$true] %s954_s28 }
  0x3b   : > { %s3141_s26 = smov 128   ;;  %s3142_s25 = smov 8  }
  0x3c   : > { %p1106_p12 = scmp.lt.s32.totalorder %s3139_s0, 5  ;;  %s3887_s18 = sld [smem:[#allocation47_spill]] }
  0x3d   : > { %s1002_s23 = scalar_lea.vmem [#allocation7], %s3357_s29  ;;  %s999_s21 = scalar_lea.sflag [#allocation8], %s942_s12 }
  0x3e   : > { %s951_s1 = scalar_lea.hbm %s3886_s14, %s3360_s8  ;;  %p3386_p13 = pnand %p2680_p11, %p1106_p12 }
  0x3f   : > { %s952_s27 = sshll.u32 %s951_s1, 4  ;;  %s1010_s22 = sshll.u32 %s1002_s23, 4  ;;  %s953_s27 = int_to_ptr.hbm [resolvable:$true] %s952_s27  ;;  %s1011_s22 = int_to_ptr.vmem [resolvable:$true] %s1010_s22 }
  0x40   : > { %2755 = dma.hbm_to_vmem [thread:$0]  (!%p3362_p10), %s953_s27, 512, %s955_s28, %s3373_s6, %s3141_s26, %s3141_s26, %s3142_s25  }
  0x41   : > { %s3889_s11 = sld [smem:[#allocation40_spill]]  ;;  %s903_s23 = scalar_lea.sflag [#allocation3], %s3350_s4 }
  0x42   : > { %s1007_s2 = scalar_lea.hbm %s3887_s18, %s3360_s8  ;;  %s3890_s16 = sld [smem:[#allocation46_spill]] }
  0x43   : > { %s1008_s14 = sshll.u32 %s1007_s2, 4  ;;  %s906_s2 = scalar_lea.vmem [#allocation2], %s3357_s29  ;;  %s1009_s14 = int_to_ptr.hbm [resolvable:$true] %s1008_s14 }
  0x44   : > { %2761 = dma.hbm_to_vmem [thread:$0]  (!%p3362_p10), %s1009_s14, 512, %s1011_s22, %s999_s21, %s3141_s26, %s3141_s26, %s3142_s25  }
  0x45   : > { %s914_s19 = sshll.u32 %s906_s2, 4  ;;  %s974_s28 = scalar_lea.vmem [#allocation6], %s3357_s29  ;;  %s915_s19 = int_to_ptr.vmem [resolvable:$true] %s914_s19 }
  0x46   : > { %s3891_s20 = sld [smem:[#allocation49_spill]] }
  0x47   : > { %s911_s9 = scalar_lea.hbm %s3889_s11, %s3360_s8  ;;  %s982_s11 = sshll.u32 %s974_s28, 4  ;;  %s983_s11 = int_to_ptr.vmem [resolvable:$true] %s982_s11 }
  0x48   : > { %s912_s18 = sshll.u32 %s911_s9, 4  ;;  %s979_s12 = scalar_lea.hbm %s3890_s16, %s3360_s8  ;;  %s913_s18 = int_to_ptr.hbm [resolvable:$true] %s912_s18 }
  0x49   : > { %2752 = dma.hbm_to_vmem [thread:$0]  (!%p3362_p10), %s913_s18, 512, %s915_s19, %s903_s23, %s3141_s26, %s3141_s26, %s3142_s25  }
  0x4a   : > { %s980_s27 = sshll.u32 %s979_s12, 4  ;;  %s1030_s23 = scalar_lea.vmem [#allocation9], %s3357_s29  ;;  %s981_s27 = int_to_ptr.hbm [resolvable:$true] %s980_s27 }
  0x4b   : > { %2758 = dma.hbm_to_vmem [thread:$0]  (!%p3362_p10), %s981_s27, 512, %s983_s11, %s3373_s6, %s3141_s26, %s3141_s26, %s3142_s25  }
  0x4c   : > { %s1035_s18 = scalar_lea.hbm %s3891_s20, %s3360_s8  ;;  %s1038_s14 = sshll.u32 %s1030_s23, 4  ;;  %s1039_s14 = int_to_ptr.vmem [resolvable:$true] %s1038_s14 }
  0x4d   : > { %s1036_s19 = sshll.u32 %s1035_s18, 4  ;;  %s3892_s24 = sld [smem:[#allocation53_spill]]  ;;  %s1037_s19 = int_to_ptr.hbm [resolvable:$true] %s1036_s19 }
  0x4e   : > { %2764 = dma.hbm_to_vmem [thread:$0]  (!%p3362_p10), %s1037_s19, 512, %s1039_s14, %s999_s21, %s3141_s26, %s3141_s26, %s3142_s25  }
  0x4f   : > { %s1070_s16 = scalar_lea.vmem [#allocation10], %s3357_s29  ;;  %s1067_s11 = scalar_lea.sflag [#allocation11], %s3350_s4 }
  0x50   : > { %s1078_s6 = sshll.u32 %s1070_s16, 4  ;;  %s1079_s6 = int_to_ptr.vmem [resolvable:$true] %s1078_s6 }
  0x51   : > { %1110 = sbr.rel (%p3386_p13) target bundleno = 3058 (0xbf2), region = 132 }
  0x53   : > { %s1075_s28 = scalar_lea.hbm %s3892_s24, %s3360_s8 }
  0x54   : > { %s1076_s27 = sshll.u32 %s1075_s28, 4  ;;  %s1077_s27 = int_to_ptr.hbm [resolvable:$true] %s1076_s27 }
  0x55   : > { %2767 = dma.hbm_to_vmem [thread:$0]  (!%p3362_p10), %s1077_s27, 512, %s1079_s6, %s1067_s11, %s3141_s26, %s3141_s26, %s3142_s25  }
  0x56   : > { %s1112_s21 = sand.u32 1, %s3115_s5  }
  0x57   : > { %s2681_s9 = sshll.u32 %s1112_s21, 5  ;;  %s1113_s2 = scalar_lea.sflag [#allocation3], %s1112_s21 }
  0x58   : > { %s3442_s8 = scalar_lea.vmem [#allocation2], %s2681_s9 }
  0x59   : > { %3094 = dma.done.wait (%p3352_p9), %s1113_s2, 512  }
  0x5a   : > { %3096 = vsyncadd (%p3352_p9), %s1113_s2, 4294966784  ;;  %s3893_s16 = sadd.s32 4294967295, %s3139_s0   ;;  %s3450_s26 = scalar_lea.vmem [#allocation4], %s2681_s9 }
  0x5b   : > { %s1122_s29 = sand.u32 1, %s3893_s16   ;;  %3894 = sst [smem:[#allocation24_spill]] %s3450_s26 }
  0x5c   : > { %s1123_s25 = scalar_lea.sflag [#allocation5], %s1122_s29 }
  0x5d   : > { %3098 = dma.done.wait (%p3352_p9), %s1123_s25, 1024  }
  0x5e   : > { %3100 = vsyncadd (%p3352_p9), %s1123_s25, 4294966272  ;;  %s3456_s4 = scalar_lea.vmem [#allocation6], %s2681_s9  ;;  %s1143_s7 = scalar_lea.sflag [#allocation8], %s1122_s29 }
  0x5f   : > { %3895 = sst [smem:[#allocation25_spill]] %s3456_s4  ;;  %s3458_s1 = scalar_lea.vmem [#allocation7], %s2681_s9 }
  0x60   : > { %3896 = sst [smem:[#allocation26_spill]] %s3458_s1 }
  0x61   : > { %3102 = dma.done.wait (%p3352_p9), %s1143_s7, 1024  }
  0x62   : > { %3104 = vsyncadd (%p3352_p9), %s1143_s7, 4294966272  ;;  %s3464_s18 = scalar_lea.vmem [#allocation9], %s2681_s9  ;;  %s1163_s19 = scalar_lea.sflag [#allocation11], %s1112_s21 }
  0x63   : > { %3897 = sst [smem:[#allocation27_spill]] %s3464_s18  ;;  %s3466_s23 = scalar_lea.vmem [#allocation10], %s2681_s9 }
  0x64   : > { %3898 = sst [smem:[#allocation28_spill]] %s3466_s23 }
  0x65   : > { %3106 = dma.done.wait (%p3352_p9), %s1163_s19, 512  }
  0x66   : > { %3108 = vsyncadd (%p3352_p9), %s1163_s19, 4294966784  ;;  %p1340_p0 = scmp.lt.s32.totalorder %s3127_s3, 1  ;;  %p1348_p1 = scmp.lt.s32.totalorder %s3123_s30, 1 }
  0x67   : > { %s3899_s6 = sld [smem:[#allocation30_spill]]  ;;  %p2698_p2 = scmp.ne.s32.totalorder %s3123_s30, 0 }
  0x68   : > { %s3970_s3 = smov (!%p1340_p0, %s3127_s3), 1  ;;  %s3900_s9 = sld [smem:[#allocation31_spill]] }
  0x69   : > { %s3478_s14 = scalar_select %p1348_p1, %s3123_s30, 1 }
  0x6a   : > { %s2687_s10 = sshll.u32 %s3970_s3, 2  ;;  %s2688_s22 = sshll.u32 %s3970_s3, 3 }
  0x6b   : > { %s2733_s12 = sshll.u32 %s3478_s14, 5  ;;  %s3906_s25 = sld [smem:[#allocation36_spill]] }
  0x6c   : > { %s3914_s1 = sld [smem:[#allocation48_spill]]  ;;  %s2736_s11 = sshll.u32 %s3478_s14, 6 }
  0x6d   : > { %s1343_s27 = scalar_lea.vmem %s3899_s6, %s2687_s10  ;;  %s3908_s6 = sld [smem:[#allocation38_spill]] }
  0x6e   : > { %s3488_s2 = scalar_lea.vmem %s3900_s9, %s2688_s22  ;;  %s3905_s9 = sld [smem:[#allocation34_spill]] }
  0x6f   : > { %3901 = sst [smem:[#allocation29_spill]] %s3488_s2 }
  0x70   : > { %s3917_s3 = sld [smem:[#allocation52_spill]] }
  0x71   : > { %s3511_s7 = scalar_lea.vmem %s3906_s25, %s2733_s12  ;;  %s3918_s28 = sld [smem:[#allocation54_spill]] }
  0x72   : > { %s1395_s26 = scalar_lea.vmem %s3914_s1, %s3478_s14  ;;  %s3919_s22 = sld [smem:[#allocation55_spill]] }
  0x73   : > { %s3520_s5 = scalar_lea.vmem %s3908_s6, %s2733_s12  ;;  %s3920_s29 = sld [smem:[#allocation56_spill]] }
  0x74   : > { %s3506_s0 = scalar_lea.vmem %s3905_s9, %s2733_s12  ;;  %s3921_s20 = sld [smem:[#allocation57_spill]] }
  0x76   : > { %s1404_s23 = scalar_lea.vmem %s3917_s3, %s3478_s14  ;;  %1423 = sbr.rel (%p2698_p2) target bundleno = 125 (0x7d), region = 160 }
  0x77   : > { %s1407_s6 = scalar_lea.vmem %s3918_s28, %s3478_s14 }
  0x78   : > { %s3570_s1 = scalar_lea.vmem %s3919_s22, %s2736_s11 }
  0x79   : > { %s1415_s2 = scalar_lea.vmem %s3920_s29, %s3478_s14 }
  0x7a   : > { %s3579_s24 = scalar_lea.vmem %s3921_s20, %s2687_s10 }
  0x7b   : > { %v1424_v0 = vld [vmem:[%s1343_s27] sm:$0xf]  ;;  %vm1425_vm0 = vcmask 257024  }
  0x7c   : > { %1426 = vst.msk [vmem:[%s3579_s24] sm:$0xf] %vm1425_vm0, %v1424_v0 }
  0x7d PF: > { %vm1431_vm1 = vcmask 257024   ;;  %v3143_v3 = vmov 32.0   ;;  %v1472_v15 = vld [vmem:[%s3506_s0 + $0x18] sm:$0xff]  ;;  %v1471_v18 = vld [vmem:[%s3506_s0 + $0x10] sm:$0xff]  ;;  %v1470_v21 = vld [vmem:[%s3506_s0 + $0x8] sm:$0xff]  ;;  %s3922_s30 = sld [smem:[#allocation32_spill]]  ;;  %v1590_v53 = vlaneseq }
  0x7e   : > { %2853 = vrcp.f32 %v3143_v3  ;;  %v1477_v16 = vld [vmem:[%s3511_s7 + $0x18] sm:$0xff]  ;;  %1508 = vmatpush.msra.mxu0 %v1472_v15  ;;  %v1476_v19 = vld [vmem:[%s3511_s7 + $0x10] sm:$0xff]  ;;  %v1475_v22 = vld [vmem:[%s3511_s7 + $0x8] sm:$0xff]  ;;  %vm1492_vm6 = vcmask 261120   ;;  %s3926_s12 = sld [smem:[#allocation37_spill]]  ;;  %vm1562_vm7 = vcmask 130048  }
  0x7f   : > { %v1482_v17 = vld [vmem:[%s3520_s5 + $0x18] sm:$0xff]  ;;  %1531 = vmatpush.msra.mxu1 %v1477_v16  ;;  %v1481_v20 = vld [vmem:[%s3520_s5 + $0x10] sm:$0xff]  ;;  %v1480_v23 = vld [vmem:[%s3520_s5 + $0x8] sm:$0xff]  ;;  %s3928_s21 = sld [smem:[#allocation35_spill]]  ;;  %s3144_s16 = smov 112   ;;  %vm1625_vm8 = vcmask 1043456  }
  0x80   : > { %1554 = vmatpush.msra.mxu2 %v1482_v17  ;;  %1509 = vmatpush.msra.mxu0 %v1471_v18  ;;  %v1469_v24 = vld [vmem:[%s3506_s0] sm:$0xff]  ;;  %s3930_s4 = sld [smem:[#allocation39_spill]]  ;;  %v1591_v54 = vshrl.u32 %v1590_v53, 7  ;;  %v1593_v55 = vand.u32 127, %v1590_v53  ;;  %vm1596_vm10 = vcmask 27648   ;;  %vm1621_vm15 = vcmask 31744  }
  0x81   : > { %1532 = vmatpush.msra.mxu1 %v1476_v19  ;;  %v1474_v25 = vld [vmem:[%s3511_s7] sm:$0xff]  ;;  %s3924_s7 = sld [smem:[#allocation33_spill]] }
  0x82   : > { %1555 = vmatpush.msra.mxu2 %v1481_v20  ;;  %1510 = vmatpush.msra.mxu0 %v1470_v21  ;;  %v1479_v26 = vld [vmem:[%s3520_s5] sm:$0xff]  ;;  %vm1594_vm9 = vcmp.ge.s32.totalorder %v1591_v54, %v1593_v55  ;;  %s3932_s20 = sld [smem:[#allocation25_spill]] }
  0x83   : > { %v3584_v1 = vld [vmem:[%s3579_s24] sm:$0xf]  ;;  %1533 = vmatpush.msra.mxu1 %v1475_v22  ;;  %s3923_s0 = scalar_lea.vmem %s3922_s30, %s3478_s14  ;;  %s3933_s13 = sld [smem:[#allocation29_spill]] }
  0x84   : > { %v1432_v2 = vsel %vm1431_vm1, %v3584_v1, 0.0  ;;  %v2854_v4 = vpop.eup %2853  ;;  %1556 = vmatpush.msra.mxu2 %v1480_v23  ;;  %1511 = vmatpush.msra.mxu0 %v1469_v24  ;;  %v2837_v36 = vld [vmem:[%s3923_s0] ss:$0 sm:$0xff]  ;;  %s3927_s11 = scalar_lea.vmem %s3926_s12, %s3478_s14  ;;  %s3934_s0 = sld [smem:[#allocation41_spill]] }
  0x85   : > { %1433 = vadd.xlane.f32.xlu0 %v1432_v2  ;;  %v1436_v5 = vmul.f32 32.0, %v2854_v4  ;;  %vm1440_vm2 = vweird.f32 %v2854_v4  ;;  %1534 = vmatpush.msra.mxu1 %v1474_v25  ;;  %v2840_v42 = vld [vmem:[%s3927_s11] ss:$0 sm:$0xff]  ;;  %s3929_s22 = scalar_lea.vmem %s3928_s21, %s3478_s14  ;;  %s3938_s12 = sld [smem:[#allocation42_spill]] }
  0x86   : > { %1557 = vmatpush.msra.mxu2 %v1479_v26  ;;  %v2839_v43 = vld [vmem:[%s3929_s22] ss:$0 sm:$0xff]  ;;  %s3931_s25 = scalar_lea.vmem %s3930_s4, %s3478_s14  ;;  %s3940_s21 = sld [smem:[#allocation43_spill]] }
  0x87   : > { %v1437_v6 = vsub.f32 1.0, %v1436_v5  ;;  %s3925_s5 = scalar_lea.vmem %s3924_s7, %s3478_s14  ;;  %v2841_v48 = vld [vmem:[%s3931_s25] ss:$0 sm:$0xff]  ;;  %s3942_s18 = sld [smem:[#allocation26_spill]] }
  0x88   : > { %v2838_v39 = vld [vmem:[%s3925_s5] ss:$0 sm:$0xff]  ;;  %s3937_s5 = scalar_lea.vmem %s3824_s17, %s3478_s14  ;;  %s3943_s25 = sld [smem:[#allocation45_spill]] }
  0x89   : > { %v1438_v7 = vmul.f32 %v2854_v4, %v1437_v6  ;;  %v1818_v53 = vld [vmem:[%s3932_s20] sm:$0xff]  ;;  %s3950_s9 = sld [smem:[#allocation51_spill]] }
  0x8a   : > { %s3935_s10 = scalar_lea.vmem %s3934_s0, %s3478_s14  ;;  %v3670_v54 = vld [vmem:[%s3933_s13] sm:$0xff] }
  0x8b   : > { %v1439_v8 = vadd.f32 %v2854_v4, %v1438_v7  ;;  %s3939_s11 = scalar_lea.vmem %s3938_s12, %s3478_s14 }
  0x8c   : > { %s3941_s22 = scalar_lea.vmem %s3940_s21, %s3478_s14 }
  0x8d   : > { %v3588_v9 = vsel %vm1440_vm2, %v2854_v4, %v1439_v8 }
  0x8f   : > { %s3951_s19 = scalar_lea.vmem %s3950_s9, %s3478_s14 }
  0xf8   : > { %v1434_v10 = vpop.xlane.xlu0 %1433 }
  0xf9   : > { %v1442_v11 = vmul.f32 %v3588_v9, %v1434_v10 }
  0xfb   : > { %v1443_v12 = vsub.f32 %v3584_v1, %v1442_v11 }
  0xfd   : > { %v1444_v13 = vmul.f32 %v1443_v12, %v1443_v12 }
  0xff   : > { %v1445_v14 = vsel %vm1431_vm1, %v1444_v13, 0.0  ;;  %v1487_v13 = vld [vmem:[%s3442_s8 + $0x18] sm:$0xff] }
 0x100   : > { %1446 = vadd.xlane.f32.xlu0 %v1445_v14 }
 0x173   : > { %v1447_v27 = vpop.xlane.xlu0 %1446 }
 0x174   : > { %v1448_v28 = vmul.f32 %v1447_v27, %v3588_v9 }
 0x176   : > { %v1449_v29 = vadd.f32 1e-05, %v1448_v28 }
 0x178   : > { %2855 = vrsqrt.f32 %v1449_v29  ;;  %vm1456_vm4 = vweird.f32 %v1449_v29 }
 0x17e   : > { %v2856_v30 = vpop.eup %2855 }
 0x17f   : > { %v1451_v31 = vmul.f32 %v2856_v30, %v1449_v29  ;;  %vm1457_vm3 = vweird.f32 %v2856_v30 }
 0x180   : > { %vm1458_vm5 = vmor %vm1456_vm4, %vm1457_vm3 }
 0x181   : > { %v1452_v32 = vmul.f32 %v2856_v30, %v1451_v31 }
 0x183   : > { %v1453_v33 = vmul.f32 0.5, %v1452_v32 }
 0x185   : > { %v1454_v34 = vsub.f32 1.5, %v1453_v33 }
 0x187   : > { %v1455_v35 = vmul.f32 %v2856_v30, %v1454_v34 }
 0x189   : > { %v1459_v37 = vsel %vm1458_vm5, %v2856_v30, %v1455_v35 }
 0x18a   : > { %v1460_v38 = vmul.f32 %v1459_v37, %v1443_v12 }
 0x18c   : > { %v1464_v40 = vmul.f32 %v2837_v36, %v1460_v38  ;;  %v1486_v38 = vld [vmem:[%s3442_s8 + $0x10] sm:$0xff] }
 0x18e   : > { %v1468_v41 = vadd.f32 %v2838_v39, %v1464_v40  ;;  %v1485_v39 = vld [vmem:[%s3442_s8 + $0x8] sm:$0xff]  ;;  %v1484_v40 = vld [vmem:[%s3442_s8] sm:$0xff]  ;;  %s3936_s8 = sld [smem:[#allocation24_spill]] }
 0x190   : > { %2699 = vmatmul.msk.f32.vlgmr.msra.gmra.mxu0 %vm1492_vm6, %v1468_v41  ;;  %2700 = vmatmul.msk.f32.vlgmr.msra.gmra.mxu1 %vm1492_vm6, %v1468_v41 }
 0x191   : > { %2701 = vmatmul.msk.f32.vlgmr.msra.gmra.mxu2 %vm1492_vm6, %v1468_v41 }
 0x20d   : > { %v1536_v44 = vpop.f32.mrf.mxu1  ;;  %v1513_v45 = vpop.f32.mrf.mxu0 }
 0x20e   : > { %v1537_v46 = vadd.f32 %v2840_v42, %v1536_v44  ;;  %v1514_v47 = vadd.f32 %v2839_v43, %v1513_v45  ;;  %v2842_v44 = vld [vmem:[%s3935_s10] ss:$0 sm:$0xff] }
 0x210   : > { %1651 = vrot.lane.b32.xlu1 %v1537_v46, %s3144_s16  ;;  %2702 = vmatpush.xpose.msk.msra.mxu3 %vm1562_vm7, %v1537_v46 }
 0x213   : > { %2703 = vmatmul.msk.f32.vlgmr.msra.gmra.mxu3 %vm1562_vm7, %v1514_v47 }
 0x214   : > { %v1559_v49 = vpop.f32.mrf.mxu2 }
 0x215   : > { %v1560_v50 = vadd.f32 %v2841_v48, %v1559_v49 }
 0x217   : > { %2704 = vmatpush.msk.msrb.mxu3 %vm1625_vm8, %v1560_v50 }
 0x218   : > { %1649 = vrot.lane.b32.xlu1 %v1514_v47, %s3144_s16 }
 0x219   : > { %1747 = vmatpush.msra.mxu3 %v1487_v13  ;;  %v2843_v13 = vld [vmem:[%s3939_s11] ss:$0 sm:$0xff] }
 0x21b   : > { %1748 = vmatpush.msra.mxu3 %v1486_v38 }
 0x282   : > { %v1652_v51 = vpop.permute.xlu1 %1651 }
 0x283   : > { %2706 = vmatpush.xpose.msk.msrb.mxu0 %vm1562_vm7, %v1652_v51  ;;  %v1820_v51 = vld [vmem:[%s3932_s20 + $0x10] sm:$0xff] }
 0x28a   : > { %v1650_v52 = vpop.permute.xlu1 %1649 }
 0x28b   : > { %2707 = vmatmul.msk.f32.vlgmr.msrb.gmra.mxu0 %vm1562_vm7, %v1650_v52  ;;  %v1819_v52 = vld [vmem:[%s3932_s20 + $0x8] sm:$0xff] }
 0x296   : > { %v1586_v58 = vpop.f32.mrf.mxu3 }
 0x297   : > { %v1589_v61 = vmul.f32 0.25, %v1586_v58 }
 0x299   : > { %v1595_v62 = vsel %vm1594_vm9, %v1589_v61, -1e+30  ;;  %v1814_v61 = vld [vmem:[%s3936_s8 + $0x8] sm:$0xff] }
 0x29a   : > { %v1597_v63 = vsel %vm1596_vm10, %v1595_v62, -inf }
 0x308   : > { %v1674_v56 = vpop.f32.mrf.mxu0 }
 0x309   : > { %v1677_v57 = vmul.f32 0.25, %v1674_v56 }
 0x30b   : > { %v1678_v59 = vsel %vm1594_vm9, %v1677_v57, -1e+30 }
 0x30c   : > { %v1679_v60 = vsel %vm1596_vm10, %v1678_v59, -inf }
 0x30d   : > { %1680 = vmax.xlane.f32.xlu2 %v1679_v60  ;;  %v1815_v60 = vld [vmem:[%s3936_s8 + $0x10] sm:$0xff] }
 0x315   : > { %1598 = vmax.xlane.f32.xlu2 %v1597_v63  ;;  %v2845_v63 = vld [vmem:[%s3937_s5] ss:$0 sm:$0xff] }
 0x32d   : > { %1703 = vrot.lane.b32.xlu2 %v1560_v50, %s3144_s16  ;;  %v1821_v50 = vld [vmem:[%s3932_s20 + $0x18] sm:$0xff]  ;;  %s3944_s20 = scalar_lea.vmem %s3943_s25, %s3478_s14 }
 0x380   : > { %v1681_v0 = vpop.xlane.xlu2 %1680 }
 0x381   : > { %v1682_v2 = vsub.f32 %v1678_v59, %v1681_v0  ;;  %v1816_v59 = vld [vmem:[%s3936_s8 + $0x18] sm:$0xff] }
 0x382   : > { %1851 = vmatpush.msra.mxu0 %v1816_v59 }
 0x383   : > { %v1683_v3 = vmul.f32 1.442695, %v1682_v2 }
 0x384   : > { %1852 = vmatpush.msra.mxu0 %v1815_v60 }
 0x385   : > { %2857 = vpow2.f32 %v1683_v3 }
 0x386   : > { %1853 = vmatpush.msra.mxu0 %v1814_v61 }
 0x388   : > { %v1599_v4 = vpop.xlane.xlu2 %1598 }
 0x389   : > { %v1600_v5 = vsub.f32 %v1595_v62, %v1599_v4  ;;  %v1813_v62 = vld [vmem:[%s3936_s8] sm:$0xff]  ;;  %s3948_s8 = sld [smem:[#allocation50_spill]] }
 0x38a   : > { %1854 = vmatpush.msra.mxu0 %v1813_v62 }
 0x38b   : > { %v2858_v6 = vpop.eup %2857  ;;  %v1601_v7 = vmul.f32 1.442695, %v1600_v5 }
 0x38c   : > { %v1685_v8 = vsel %vm1596_vm10, %v2858_v6, 0.0 }
 0x38d   : > { %2859 = vpow2.f32 %v1601_v7  ;;  %1686 = vadd.xlane.f32.xlu0 %v1685_v8 }
 0x38f   : > { %s3949_s27 = scalar_lea.vmem %s3948_s8, %s3478_s14 }
 0x390   : > { %v1704_v10 = vpop.permute.xlu2 %1703 }
 0x391   : > { %2708 = vmatpush.msk.msrb.mxu1 %vm1625_vm8, %v1704_v10 }
 0x393   : > { %v2860_v11 = vpop.eup %2859  ;;  %1877 = vmatpush.msra.mxu1 %v1821_v50 }
 0x394   : > { %v1603_v12 = vsel %vm1596_vm10, %v2860_v11, 0.0  ;;  %vm1935_vm10 = vcmask 60416  }
 0x395   : > { %1604 = vadd.xlane.f32.xlu1 %v1603_v12  ;;  %1878 = vmatpush.msra.mxu1 %v1820_v51 }
 0x397   : > { %1879 = vmatpush.msra.mxu1 %v1819_v52 }
 0x399   : > { %1880 = vmatpush.msra.mxu1 %v1818_v53 }
 0x400   : > { %v1687_v14 = vpop.xlane.xlu0 %1686 }
 0x401   : > { %2861 = vrcp.f32 %v1687_v14  ;;  %v1699_v19 = vand.u32 2147483648, %v1687_v14  ;;  %v1697_v21 = vand.u32 2147483647, %v1687_v14  ;;  %vm1693_vm12 = vweird.f32 %v1687_v14 }
 0x403   : > { %v1700_v24 = vor.u32 1.1754944e-38, %v1699_v19  ;;  %vm1698_vm14 = vcmp.eq.f32.partialorder %v1697_v21, 8.507059e+37 }
 0x407   : > { %v2862_v15 = vpop.eup %2861 }
 0x408   : > { %v1689_v16 = vmul.f32 %v2862_v15, %v1687_v14  ;;  %v1605_v17 = vpop.xlane.xlu1 %1604  ;;  %vm1694_vm11 = vweird.f32 %v2862_v15 }
 0x409   : > { %2863 = vrcp.f32 %v1605_v17  ;;  %vm1695_vm13 = vmor %vm1693_vm12, %vm1694_vm11  ;;  %v1617_v30 = vand.u32 2147483648, %v1605_v17  ;;  %v1615_v32 = vand.u32 2147483647, %v1605_v17  ;;  %vm1611_vm2 = vweird.f32 %v1605_v17 }
 0x40a   : > { %v1690_v18 = vsub.f32 1.0, %v1689_v16  ;;  %v2844_v16 = vld [vmem:[%s3941_s22] ss:$0 sm:$0xff] }
 0x40b   : > { %v1618_v34 = vor.u32 1.1754944e-38, %v1617_v30  ;;  %vm1616_vm4 = vcmp.eq.f32.partialorder %v1615_v32, 8.507059e+37  ;;  %v1823_v30 = vld [vmem:[%s3942_s18] sm:$0xff] }
 0x40c   : > { %v1691_v20 = vmul.f32 %v2862_v15, %v1690_v18 }
 0x40e   : > { %v1692_v22 = vadd.f32 %v2862_v15, %v1691_v20  ;;  %v2846_v20 = vld [vmem:[%s3944_s20] ss:$0 sm:$0xff] }
 0x40f   : > { %v2864_v23 = vpop.eup %2863 }
 0x410   : > { %v1607_v25 = vmul.f32 %v2864_v23, %v1605_v17  ;;  %v1696_v26 = vsel %vm1695_vm13, %v2862_v15, %v1692_v22  ;;  %vm1612_vm0 = vweird.f32 %v2864_v23 }
 0x411   : > { %v1701_v27 = vsel %vm1698_vm14, %v1700_v24, %v1696_v26  ;;  %vm1613_vm3 = vmor %vm1611_vm2, %vm1612_vm0 }
 0x412   : > { %v1608_v28 = vsub.f32 1.0, %v1607_v25  ;;  %v1702_v29 = vmul.f32 %v2858_v6, %v1701_v27  ;;  %v1826_v27 = vld [vmem:[%s3942_s18 + $0x18] sm:$0xff] }
 0x413   : > { %1900 = vmatpush.msrb.mxu2 %v1826_v27 }
 0x414   : > { %v1609_v31 = vmul.f32 %v2864_v23, %v1608_v28  ;;  %2709 = vmatmul.msk.f32.vlgmr.msrb.gmra.mxu1 %vm1621_vm15, %v1702_v29  ;;  %v1825_v28 = vld [vmem:[%s3942_s18 + $0x10] sm:$0xff]  ;;  %v1824_v29 = vld [vmem:[%s3942_s18 + $0x8] sm:$0xff] }
 0x415   : > { %1901 = vmatpush.msrb.mxu2 %v1825_v28 }
 0x416   : > { %v1610_v33 = vadd.f32 %v2864_v23, %v1609_v31 }
 0x417   : > { %1902 = vmatpush.msrb.mxu2 %v1824_v29 }
 0x418   : > { %v1614_v35 = vsel %vm1613_vm3, %v2864_v23, %v1610_v33 }
 0x419   : > { %v1619_v36 = vsel %vm1616_vm4, %v1618_v34, %v1614_v35  ;;  %1903 = vmatpush.msrb.mxu2 %v1823_v30 }
 0x41a   : > { %v1620_v37 = vmul.f32 %v2860_v11, %v1619_v36  ;;  %2714 = vmatmul.msk.f32.vlgmr.msrb.gmra.mxu2 %vm1492_vm6, %v3670_v54 }
 0x41c   : > { %2705 = vmatmul.msk.f32.vlgmr.msrb.gmra.mxu3 %vm1621_vm15, %v1620_v37  ;;  %2713 = vmatmul.msk.f32.vlgmr.msra.gmra.mxu1 %vm1492_vm6, %v3670_v54  ;;  %vm1960_vm15 = vcmask 64512  }
 0x41d   : > { %1770 = vmatpush.msrb.mxu3 %v1485_v39  ;;  %v2847_v39 = vld [vmem:[%s1395_s26] ss:$0 sm:$0xff]  ;;  %s3946_s26 = sld [smem:[#allocation27_spill]] }
 0x41f   : > { %1771 = vmatpush.msrb.mxu3 %v1484_v40 }
 0x423   : > { %v1829_v60 = vld [vmem:[%s3946_s26 + $0x8] sm:$0xff] }
 0x491   : > { %v1727_v41 = vpop.f32.mrf.mxu1 }
 0x492   : > { %2710 = vmatmul.msk.f32.vlgmr.msra.gmra.mxu3 %vm1562_vm7, %v1727_v41 }
 0x499   : > { %v1882_v0 = vpop.f32.mrf.mxu1 }
 0x49a   : > { %v1883_v2 = vadd.f32 %v2845_v63, %v1882_v0 }
 0x49c   : > { %2715 = vmatpush.xpose.msk.msra.mxu3 %vm1562_vm7, %v1883_v2 }
 0x49d   : > { %v1905_v40 = vpop.f32.mrf.mxu2 }
 0x49e   : > { %v1906_v41 = vadd.f32 %v2847_v39, %v1905_v40  ;;  %v2849_v40 = vld [vmem:[%s3951_s19] ss:$0 sm:$0xff] }
 0x49f   : > { %v1646_v42 = vpop.f32.mrf.mxu3 }
 0x4a0   : > { %2711 = vmatmul.msk.f32.vlgmr.msrb.gmra.mxu3 %vm1562_vm7, %v1646_v42  ;;  %1979 = vmatpush.msrb.mxu0 %v1906_v41 }
 0x515   : > { %v1750_v43 = vpop.f32.mrf.mxu3 }
 0x523   : > { %v1773_v45 = vpop.f32.mrf.mxu3 }
 0x524   : > { %v1774_v46 = vadd.f32 %v1773_v45, %v1750_v43 }
 0x526   : > { %v1779_v47 = vadd.f32 %v2842_v44, %v1774_v46 }
 0x528   : > { %v3661_v48 = vadd.f32 %v1779_v47, %v3584_v1 }
 0x52a   : > { %v1783_v49 = vsel %vm1431_vm1, %v3661_v48, 0.0 }
 0x52b   : > { %1784 = vadd.xlane.f32.xlu0 %v1783_v49 }
 0x59e   : > { %v1785_v1 = vpop.xlane.xlu0 %1784 }
 0x59f   : > { %v1786_v55 = vmul.f32 %v1785_v1, %v3588_v9 }
 0x5a1   : > { %v1787_v56 = vsub.f32 %v3661_v48, %v1786_v55 }
 0x5a3   : > { %v1788_v57 = vmul.f32 %v1787_v56, %v1787_v56 }
 0x5a5   : > { %v1789_v58 = vsel %vm1431_vm1, %v1788_v57, 0.0 }
 0x5a6   : > { %1790 = vadd.xlane.f32.xlu0 %v1789_v58 }
 0x5ba   : > { %1986 = vrot.lane.b32.xlu0 %v1883_v2, %s3144_s16 }
 0x619   : > { %v1791_v3 = vpop.xlane.xlu0 %1790 }
 0x61a   : > { %v1792_v4 = vmul.f32 %v1791_v3, %v3588_v9 }
 0x61c   : > { %v1793_v5 = vadd.f32 1e-05, %v1792_v4 }
 0x61e   : > { %2865 = vrsqrt.f32 %v1793_v5  ;;  %vm1800_vm8 = vweird.f32 %v1793_v5 }
 0x624   : > { %v2866_v6 = vpop.eup %2865 }
 0x625   : > { %v1795_v7 = vmul.f32 %v2866_v6, %v1793_v5  ;;  %vm1801_vm5 = vweird.f32 %v2866_v6 }
 0x626   : > { %vm1802_vm9 = vmor %vm1800_vm8, %vm1801_vm5 }
 0x627   : > { %v1796_v8 = vmul.f32 %v2866_v6, %v1795_v7 }
 0x629   : > { %v1797_v10 = vmul.f32 0.5, %v1796_v8 }
 0x62b   : > { %v1798_v11 = vsub.f32 1.5, %v1797_v10 }
 0x62c   : > { %v1987_v19 = vpop.permute.xlu0 %1986 }
 0x62d   : > { %v1799_v12 = vmul.f32 %v2866_v6, %v1798_v11  ;;  %2718 = vmatpush.xpose.msk.msrb.mxu1 %vm1562_vm7, %v1987_v19  ;;  %v1828_v11 = vld [vmem:[%s3946_s26] sm:$0xff] }
 0x62f   : > { %v1803_v14 = vsel %vm1802_vm9, %v2866_v6, %v1799_v12  ;;  %v1831_v12 = vld [vmem:[%s3946_s26 + $0x18] sm:$0xff] }
 0x630   : > { %v1804_v15 = vmul.f32 %v1803_v14, %v1787_v56  ;;  %2081 = vmatpush.msrb.mxu3 %v1831_v12 }
 0x632   : > { %v1808_v17 = vmul.f32 %v2843_v13, %v1804_v15  ;;  %v1830_v13 = vld [vmem:[%s3946_s26 + $0x10] sm:$0xff] }
 0x633   : > { %2082 = vmatpush.msrb.mxu3 %v1830_v13 }
 0x634   : > { %v1812_v18 = vadd.f32 %v2844_v16, %v1808_v17  ;;  %v2848_v16 = vld [vmem:[%s3949_s27] ss:$0 sm:$0xff] }
 0x636   : > { %2712 = vmatmul.msk.f32.vlgmr.msra.gmra.mxu0 %vm1492_vm6, %v1812_v18 }
 0x637   : > { %2104 = vmatpush.msra.mxu0 %v1829_v60  ;;  %v2220_v60 = vld [vmem:[%s3570_s1 + $0x10] sm:$0xff] }
 0x639   : > { %2105 = vmatpush.msra.mxu0 %v1828_v11 }
 0x6b3   : > { %v1856_v21 = vpop.f32.mrf.mxu0 }
 0x6b4   : > { %v1857_v22 = vadd.f32 %v2846_v20, %v1856_v21 }
 0x6b6   : > { %1984 = vrot.lane.b32.xlu2 %v1857_v22, %s3144_s16  ;;  %2716 = vmatmul.msk.f32.vlgmr.msra.gmra.mxu3 %vm1562_vm7, %v1857_v22 }
 0x710   : > { %v1985_v23 = vpop.permute.xlu2 %1984 }
 0x711   : > { %2719 = vmatmul.msk.f32.vlgmr.msrb.gmra.mxu1 %vm1562_vm7, %v1985_v23 }
 0x739   : > { %v1931_v24 = vpop.f32.mrf.mxu3 }
 0x73a   : > { %v1934_v25 = vmul.f32 0.25, %v1931_v24 }
 0x73c   : > { %v1936_v26 = vsel %vm1935_vm10, %v1934_v25, -inf }
 0x73d   : > { %1937 = vmax.xlane.f32.xlu1 %v1936_v26 }
 0x78e   : > { %v2009_v31 = vpop.f32.mrf.mxu1 }
 0x78f   : > { %v2012_v32 = vmul.f32 0.25, %v2009_v31 }
 0x791   : > { %v2013_v33 = vsel %vm1935_vm10, %v2012_v32, -inf }
 0x792   : > { %2014 = vmax.xlane.f32.xlu2 %v2013_v33 }
 0x7b0   : > { %v1938_v34 = vpop.xlane.xlu1 %1937 }
 0x7b1   : > { %v1939_v35 = vsub.f32 %v1934_v25, %v1938_v34 }
 0x7b3   : > { %v1940_v36 = vmul.f32 1.442695, %v1939_v35 }
 0x7b5   : > { %2867 = vpow2.f32 %v1940_v36 }
 0x7bb   : > { %v2868_v37 = vpop.eup %2867 }
 0x7bc   : > { %v1942_v38 = vsel %vm1935_vm10, %v2868_v37, 0.0 }
 0x7bd   : > { %1943 = vadd.xlane.f32.xlu1 %v1942_v38 }
 0x7d6   : > { %2038 = vrot.lane.b32.xlu1 %v1906_v41, %s3144_s16  ;;  %s3947_s16 = sld [smem:[#allocation28_spill]] }
 0x7dc   : > { %v2150_v28 = vld [vmem:[%s3947_s16 + $0x18] sm:$0xff]  ;;  %v2149_v29 = vld [vmem:[%s3947_s16 + $0x10] sm:$0xff]  ;;  %v2148_v30 = vld [vmem:[%s3947_s16 + $0x8] sm:$0xff] }
 0x7dd   : > { %2170 = vmatpush.msra.mxu1 %v2150_v28 }
 0x7df   : > { %2171 = vmatpush.msra.mxu1 %v2149_v29  ;;  %v2852_v29 = vld [vmem:[%s1415_s2] ss:$0 sm:$0xff] }
 0x7e1   : > { %2172 = vmatpush.msra.mxu1 %v2148_v30 }
 0x805   : > { %v2015_v42 = vpop.xlane.xlu2 %2014 }
 0x806   : > { %v2016_v43 = vsub.f32 %v2012_v32, %v2015_v42  ;;  %v2850_v42 = vld [vmem:[%s1404_s23] ss:$0 sm:$0xff] }
 0x808   : > { %v2017_v44 = vmul.f32 1.442695, %v2016_v43 }
 0x80a   : > { %2869 = vpow2.f32 %v2017_v44 }
 0x810   : > { %v2870_v45 = vpop.eup %2869 }
 0x811   : > { %v2019_v46 = vsel %vm1935_vm10, %v2870_v45, 0.0 }
 0x812   : > { %2020 = vadd.xlane.f32.xlu0 %v2019_v46 }
 0x830   : > { %v1944_v47 = vpop.xlane.xlu1 %1943 }
 0x831   : > { %2871 = vrcp.f32 %v1944_v47  ;;  %v1956_v52 = vand.u32 2147483648, %v1944_v47  ;;  %v1954_v54 = vand.u32 2147483647, %v1944_v47  ;;  %vm1950_vm12 = vweird.f32 %v1944_v47 }
 0x833   : > { %v1957_v55 = vor.u32 1.1754944e-38, %v1956_v52  ;;  %vm1955_vm14 = vcmp.eq.f32.partialorder %v1954_v54, 8.507059e+37  ;;  %v2224_v54 = vld [vmem:[%s3570_s1 + $0x30] sm:$0xff] }
 0x837   : > { %v2872_v49 = vpop.eup %2871 }
 0x838   : > { %v1946_v50 = vmul.f32 %v2872_v49, %v1944_v47  ;;  %vm1951_vm11 = vweird.f32 %v2872_v49 }
 0x839   : > { %vm1952_vm13 = vmor %vm1950_vm12, %vm1951_vm11 }
 0x83a   : > { %v1947_v51 = vsub.f32 1.0, %v1946_v50 }
 0x83c   : > { %v1948_v53 = vmul.f32 %v2872_v49, %v1947_v51 }
 0x83e   : > { %v1949_v1 = vadd.f32 %v2872_v49, %v1948_v53  ;;  %v2225_v53 = vld [vmem:[%s3570_s1 + $0x38] sm:$0xff] }
 0x840   : > { %v1953_v56 = vsel %vm1952_vm13, %v2872_v49, %v1949_v1  ;;  %v2223_v1 = vld [vmem:[%s3570_s1 + $0x28] sm:$0xff]  ;;  %vm2226_vm13 = vcmask 523264  }
 0x841   : > { %v1958_v57 = vsel %vm1955_vm14, %v1957_v55, %v1953_v56  ;;  %v2222_v55 = vld [vmem:[%s3570_s1 + $0x20] sm:$0xff] }
 0x842   : > { %v1959_v58 = vmul.f32 %v2868_v37, %v1958_v57 }
 0x844   : > { %2717 = vmatmul.msk.f32.vlgmr.msrb.gmra.mxu0 %vm1960_vm15, %v1959_v58  ;;  %v2221_v58 = vld [vmem:[%s3570_s1 + $0x18] sm:$0xff] }
 0x848   : > { %v2039_v59 = vpop.permute.xlu1 %2038 }
 0x849   : > { %2059 = vmatpush.msra.mxu2 %v2039_v59 }
 0x84b   : > { %2238 = vmatpush.msrb.mxu2 %v2225_v53 }
 0x84d   : > { %2239 = vmatpush.msrb.mxu2 %v2224_v54 }
 0x84f   : > { %2240 = vmatpush.msrb.mxu2 %v2223_v1 }
 0x851   : > { %2241 = vmatpush.msrb.mxu2 %v2222_v55 }
 0x853   : > { %2242 = vmatpush.msrb.mxu2 %v2221_v58 }
 0x855   : > { %2243 = vmatpush.msrb.mxu2 %v2220_v60 }
 0x885   : > { %v2021_v61 = vpop.xlane.xlu0 %2020 }
 0x886   : > { %2873 = vrcp.f32 %v2021_v61  ;;  %v2033_v2 = vand.u32 2147483648, %v2021_v61  ;;  %v2031_v4 = vand.u32 2147483647, %v2021_v61  ;;  %vm2027_vm2 = vweird.f32 %v2021_v61 }
 0x888   : > { %v2034_v6 = vor.u32 1.1754944e-38, %v2033_v2  ;;  %vm2032_vm4 = vcmp.eq.f32.partialorder %v2031_v4, 8.507059e+37  ;;  %v2218_v2 = vld [vmem:[%s3570_s1] sm:$0xff] }
 0x88c   : > { %v2874_v62 = vpop.eup %2873 }
 0x88d   : > { %v2023_v63 = vmul.f32 %v2874_v62, %v2021_v61  ;;  %vm2028_vm0 = vweird.f32 %v2874_v62 }
 0x88e   : > { %vm2029_vm3 = vmor %vm2027_vm2, %vm2028_vm0 }
 0x88f   : > { %v2024_v0 = vsub.f32 1.0, %v2023_v63 }
 0x891   : > { %v2025_v3 = vmul.f32 %v2874_v62, %v2024_v0  ;;  %v2219_v0 = vld [vmem:[%s3570_s1 + $0x8] sm:$0xff] }
 0x892   : > { %2244 = vmatpush.msrb.mxu2 %v2219_v0 }
 0x893   : > { %v2026_v5 = vadd.f32 %v2874_v62, %v2025_v3 }
 0x894   : > { %2245 = vmatpush.msrb.mxu2 %v2218_v2 }
 0x895   : > { %v2030_v7 = vsel %vm2029_vm3, %v2874_v62, %v2026_v5 }
 0x896   : > { %v2035_v8 = vsel %vm2032_vm4, %v2034_v6, %v2030_v7 }
 0x897   : > { %v2036_v10 = vmul.f32 %v2870_v45, %v2035_v8  ;;  %v2851_v45 = vld [vmem:[%s1407_s6] ss:$0 sm:$0xff] }
 0x899   : > { %2720 = vmatmul.msk.f32.vlgmr.msra.gmra.mxu2 %vm1960_vm15, %v2036_v10 }
 0x8c1   : > { %v1981_v14 = vpop.f32.mrf.mxu0 }
 0x8c2   : > { %2722 = vmatmul.msk.f32.vlgmr.msra.gmra.mxu0 %vm1562_vm7, %v1981_v14 }
 0x91c   : > { %v2061_v15 = vpop.f32.mrf.mxu2 }
 0x91d   : > { %2721 = vmatmul.msk.f32.vlgmr.msrb.gmra.mxu3 %vm1562_vm7, %v2061_v15 }
 0x93f   : > { %v2107_v17 = vpop.f32.mrf.mxu0 }
 0x9a0   : > { %v2084_v18 = vpop.f32.mrf.mxu3 }
 0x9a1   : > { %v2108_v19 = vadd.f32 %v2107_v17, %v2084_v18 }
 0x9a3   : > { %v2113_v20 = vadd.f32 %v2848_v16, %v2108_v19 }
 0x9a5   : > { %v3739_v21 = vadd.f32 %v2113_v20, %v3661_v48  ;;  %v2147_v48 = vld [vmem:[%s3947_s16] sm:$0xff] }
 0x9a6   : > { %2173 = vmatpush.msra.mxu1 %v2147_v48 }
 0x9a7   : > { %v2117_v22 = vsel %vm1431_vm1, %v3739_v21, 0.0 }
 0x9a8   : > { %2118 = vadd.xlane.f32.xlu2 %v2117_v22 }
 0xa1b   : > { %v2119_v23 = vpop.xlane.xlu2 %2118 }
 0xa1c   : > { %v2120_v24 = vmul.f32 %v2119_v23, %v3588_v9 }
 0xa1e   : > { %v2121_v25 = vsub.f32 %v3739_v21, %v2120_v24 }
 0xa20   : > { %v2122_v26 = vmul.f32 %v2121_v25, %v2121_v25 }
 0xa22   : > { %v2123_v27 = vsel %vm1431_vm1, %v2122_v26, 0.0 }
 0xa23   : > { %2124 = vadd.xlane.f32.xlu2 %v2123_v27 }
 0xa96   : > { %v2125_v31 = vpop.xlane.xlu2 %2124 }
 0xa97   : > { %v2126_v32 = vmul.f32 %v2125_v31, %v3588_v9 }
 0xa99   : > { %v2127_v33 = vadd.f32 1e-05, %v2126_v32 }
 0xa9b   : > { %2875 = vrsqrt.f32 %v2127_v33  ;;  %vm2134_vm5 = vweird.f32 %v2127_v33 }
 0xaa1   : > { %v2876_v34 = vpop.eup %2875 }
 0xaa2   : > { %v2129_v35 = vmul.f32 %v2876_v34, %v2127_v33  ;;  %vm2135_vm7 = vweird.f32 %v2876_v34 }
 0xaa3   : > { %vm2136_vm8 = vmor %vm2134_vm5, %vm2135_vm7 }
 0xaa4   : > { %v2130_v36 = vmul.f32 %v2876_v34, %v2129_v35 }
 0xaa6   : > { %v2131_v37 = vmul.f32 0.5, %v2130_v36 }
 0xaa8   : > { %v2132_v38 = vsub.f32 1.5, %v2131_v37 }
 0xaaa   : > { %v2133_v39 = vmul.f32 %v2876_v34, %v2132_v38 }
 0xaac   : > { %v2137_v41 = vsel %vm2136_vm8, %v2876_v34, %v2133_v39 }
 0xaad   : > { %v2138_v9 = vmul.f32 %v2137_v41, %v2121_v25 }
 0xaaf   : > { %v2142_v43 = vmul.f32 %v2849_v40, %v2138_v9 }
 0xab1   : > { %v2146_v44 = vadd.f32 %v2850_v42, %v2142_v43 }
 0xab3   : > { %2723 = vmatmul.msk.f32.vlgmr.msra.gmra.mxu1 %vm1492_vm6, %v2146_v44 }
 0xb30   : > { %v2175_v46 = vpop.f32.mrf.mxu1 }
 0xb31   : > { %v2176_v47 = vadd.f32 %v2851_v45, %v2175_v46 }
 0xb33   : > { %v2179_v49 = vmul.f32 0.70710677, %v2176_v47  ;;  %v2178_v26 = vmul.f32 0.5, %v2176_v47 }
 0xb35   : > { %v2180_v50 = vand.u32 2147483647, %v2179_v49  ;;  %vm2213_vm12 = vcmp.ge.f32.partialorder %v2179_v49, 0.0 }
 0xb37   : > { %v2181_v51 = vmul.f32 0.3275911, %v2180_v50  ;;  %v2207_v7 = vsub.f32 0.0, %v2180_v50 }
 0xb39   : > { %v2182_v52 = vadd.f32 1.0, %v2181_v51  ;;  %v2208_v11 = vmul.f32 %v2207_v7, %v2180_v50 }
 0xb3b   : > { %2877 = vrcp.f32 %v2182_v52  ;;  %v2194_v61 = vand.u32 2147483648, %v2182_v52  ;;  %v2192_v63 = vand.u32 2147483647, %v2182_v52  ;;  %vm2188_vm9 = vweird.f32 %v2182_v52 }
 0xb3c   : > { %v2209_v14 = vmul.f32 1.442695, %v2208_v11 }
 0xb3d   : > { %v2195_v4 = vor.u32 1.1754944e-38, %v2194_v61  ;;  %vm2193_vm11 = vcmp.eq.f32.partialorder %v2192_v63, 8.507059e+37 }
 0xb3e   : > { %2879 = vpow2.f32 %v2209_v14 }
 0xb41   : > { %v2878_v56 = vpop.eup %2877 }
 0xb42   : > { %v2184_v57 = vmul.f32 %v2878_v56, %v2182_v52  ;;  %vm2189_vm6 = vweird.f32 %v2878_v56 }
 0xb43   : > { %vm2190_vm10 = vmor %vm2188_vm9, %vm2189_vm6 }
 0xb44   : > { %v2185_v59 = vsub.f32 1.0, %v2184_v57  ;;  %v2880_v20 = vpop.eup %2879 }
 0xb46   : > { %v2186_v62 = vmul.f32 %v2878_v56, %v2185_v59 }
 0xb48   : > { %v2187_v3 = vadd.f32 %v2878_v56, %v2186_v62 }
 0xb4a   : > { %v2191_v5 = vsel %vm2190_vm10, %v2878_v56, %v2187_v3 }
 0xb4b   : > { %v2196_v6 = vsel %vm2193_vm11, %v2195_v4, %v2191_v5 }
 0xb4c   : > { %v2198_v8 = vmul.f32 1.0614054, %v2196_v6 }
 0xb4e   : > { %v2199_v10 = vadd.f32 -1.4531521, %v2198_v8 }
 0xb50   : > { %v2200_v12 = vmul.f32 %v2199_v10, %v2196_v6 }
 0xb52   : > { %v2201_v13 = vadd.f32 1.4214138, %v2200_v12 }
 0xb54   : > { %v2202_v15 = vmul.f32 %v2201_v13, %v2196_v6 }
 0xb56   : > { %v2203_v16 = vadd.f32 -0.28449672, %v2202_v15 }
 0xb58   : > { %v2204_v17 = vmul.f32 %v2203_v16, %v2196_v6 }
 0xb5a   : > { %v2205_v18 = vadd.f32 0.2548296, %v2204_v17 }
 0xb5c   : > { %v2206_v19 = vmul.f32 %v2205_v18, %v2196_v6 }
 0xb5e   : > { %v2211_v22 = vmul.f32 %v2880_v20, %v2206_v19 }
 0xb60   : > { %v2212_v23 = vsub.f32 1.0, %v2211_v22 }
 0xb62   : > { %v2214_v24 = vsub.f32 0.0, %v2212_v23 }
 0xb64   : > { %v2215_v25 = vsel %vm2213_vm12, %v2212_v23, %v2214_v24 }
 0xb65   : > { %v2216_v27 = vadd.f32 1.0, %v2215_v25 }
 0xb67   : > { %v2217_v28 = vmul.f32 %v2216_v27, %v2178_v26 }
 0xb69   : > { %2724 = vmatmul.msk.f32.vlgmr.msrb.gmra.mxu2 %vm2226_vm13, %v2217_v28 }
 0xbec   : > { %v2247_v30 = vpop.f32.mrf.mxu2 }
 0xbed   : > { %v2250_v48 = vadd.f32 %v2247_v30, %v3739_v21 }
 0xbef   : > { %v2255_v31 = vadd.f32 %v2852_v29, %v2250_v48 }
 0xbf1   : > { %2256 = vst.msk [vmem:[%s3579_s24] sm:$0xf] %vm1431_vm1, %v2255_v31 }
 0xbf2 PF: > { %s3955_s18 = sld [smem:[#allocation20_spill]] }
 0xbf3   : > { %s3956_s8 = sld [smem:[#allocation16_spill]] }
 0xbf4   : > { %s3957_s5 = sld [smem:[#allocation17_spill]] }
 0xbf5   : > { %s3958_s9 = sld [smem:[#allocation23_spill]] }
 0xbf6   : > { %s3959_s30 = sld [smem:[#allocation18_spill]] }
 0xbf7   : > { %s3960_s3 = sld [smem:[#allocation19_spill]] }
 0xbf8   : > { %s50_s0 = sadd.s32 1, %s3955_s18   ;;  %s3961_s6 = sld [smem:[#allocation21_spill]] }
 0xbf9   : > { %p47_p3 = scmp.ge.s32.totalorder %s50_s0, 6   ;;  %s3962_s10 = sld [smem:[#allocation22_spill]] }
 0xbfb   :  { %49 = sbr.rel (!%p47_p3) target bundleno = 40 (0x28), region = 303 }
 0xc00   :  { %2276 = vsyncpa [#allocation3], 1 }
 0xc01   :  { %2278 = vsyncpa [#allocation3 + $0x1], 1 }
 0xc02   :  { %2279 = vsyncpa [#allocation5], 1 }
 0xc03   :  { %2281 = vsyncpa [#allocation5 + $0x1], 1 }
 0xc04   :  { %2282 = vsyncpa [#allocation8], 1 }
 0xc05   :  { %2284 = vsyncpa [#allocation8 + $0x1], 1 }
 0xc06   :  { %2285 = vsyncpa [#allocation11], 1 }
 0xc07   :  { %2287 = vsyncpa [#allocation11 + $0x1], 1 }

</bundles_post_ra>
